<compile_context>
chip_gen: v6e
topology: v6e:2x2x1
jax: 0.10.0
libtpu: 0.0.40
codegen_flags: <defaults>
</compile_context>

<pallas_src>
import jax
import jax.numpy as jnp
from jax.experimental import pallas as pl
from jax.experimental.pallas import tpu as pltpu


# ----------------------------- Pallas kernel --------------------------------
def memory_kernel(x_ref,
                  wih1_ref, whh1_ref, b1_ref, bhhn1_ref,
                  wih2_ref, whh2_ref, b2_ref, bhhn2_ref,
                  z_ref, y_scr, gx_scr):
    T, BB, D = x_ref.shape           # time, batch block, input features
    Hp = whh1_ref.shape[0]           # lane-padded hidden size (multiple of 128)
    H3 = 3 * Hp
    mxu_dtype = whh1_ref.dtype       # bf16 (or f32 for the exactness check)
    unroll = True if T <= 32 else 8  # guard full unroll for large T

    def run_layer(x2d, wih_ref, whh_ref, b_ref, bhhn_ref, out_ref, add_ref):
        # One big MXU matmul for all gates & timesteps (bf16 operands, f32
        # accumulate).  b already contains b_ih (all gates) + b_hh (r, z).
        gx = (jnp.dot(x2d.astype(mxu_dtype), wih_ref[...],
                      preferred_element_type=jnp.float32)
              + b_ref[...])                               # [T*BB, 3Hp] f32
        # Reshape while still f32 (tile-aligned split), then cast for storage.
        gx_scr[...] = gx.reshape(T, BB, H3).astype(gx_scr.dtype)

        whh = whh_ref[...]                                # [Hp, 3Hp] resident
        bhh_n = jnp.broadcast_to(bhhn_ref[...], (BB, Hp))  # hoisted broadcast

        def step(t, h):
            gx_t = gx_scr[t].astype(jnp.float32)          # [BB, 3Hp]
            gh = jnp.dot(h.astype(mxu_dtype), whh,
                         preferred_element_type=jnp.float32)
            # 128-lane-aligned gate slices (Hp is a multiple of 128).
            r = jax.nn.sigmoid(gx_t[:, 0:Hp] + gh[:, 0:Hp])
            zg = jax.nn.sigmoid(gx_t[:, Hp:2 * Hp] + gh[:, Hp:2 * Hp])
            n = jnp.tanh(gx_t[:, 2 * Hp:] + r * (gh[:, 2 * Hp:] + bhh_n))
            h = (1.0 - zg) * n + zg * h
            if add_ref is None:
                out_ref[t] = h                            # lane-dense store
            else:
                out_ref[t] = h + add_ref[t]               # fused residual skip
            return h

        jax.lax.fori_loop(0, T, step,
                          jnp.zeros((BB, Hp), jnp.float32),
                          unroll=unroll)

    # ---- GRU layer 1: x -> y (time-major history kept in VMEM scratch) ----
    run_layer(x_ref[...].reshape(T * BB, D),
              wih1_ref, whh1_ref, b1_ref, bhhn1_ref, y_scr, None)
    # ---- GRU layer 2: y -> z, residual fused into the per-step store ----
    run_layer(y_scr[...].reshape(T * BB, Hp),
              wih2_ref, whh2_ref, b2_ref, bhhn2_ref, z_ref, y_scr)


# ------------------------------- wrapper -------------------------------------
def _round_up(x, m):
    return ((x + m - 1) // m) * m


def _choose_block_b(batch, cap=256):
    """MXU-sized batch blocks; >=2 blocks for big batches (v7x two-TC split)."""
    bp = _round_up(batch, 8)
    if bp <= cap:
        return bp
    nblk = max(2, -(-bp // cap))
    return _round_up(-(-bp // nblk), 8)


def memory_forward(x, params, mxu_dtype=jnp.bfloat16):
    B, T, D = x.shape
    H = params["whh1"].shape[-1]
    Hp = _round_up(H, 128)            # lane-aligned gates & lane-dense stores
    H3 = 3 * Hp
    f32 = jnp.float32

    block_b = _choose_block_b(B)
    Bp = _round_up(B, block_b)

    # ---- gate-fused, lane-padded weights (PyTorch gate order r, z, n) ----
    def pad_w(w, in_dim):             # [3, I, H] -> [3, in_dim, Hp]
        return jnp.pad(w, ((0, 0), (0, in_dim - w.shape[1]), (0, Hp - w.shape[2])))

    def pad_b(b):                     # [3, 1, H] -> [3, 1, Hp]
        return jnp.pad(b, ((0, 0), (0, 0), (0, Hp - b.shape[-1])))

    def cat_w(w):                     # [3, I, Hp] -> [I, 3Hp], MXU dtype
        return jnp.concatenate([w[0], w[1], w[2]], axis=-1).astype(mxu_dtype)

    def cat_b(bih, bhh):              # fold b_hh for r/z into the input bias
        return jnp.concatenate([bih[0] + bhh[0],
                                bih[1] + bhh[1],
                                bih[2]], axis=-1).astype(f32)     # [1, 3Hp]

    wih1 = cat_w(pad_w(params["wih1"], D))
    whh1 = cat_w(pad_w(params["whh1"], Hp))
    wih2 = cat_w(pad_w(params["wih2"], Hp))
    whh2 = cat_w(pad_w(params["whh2"], Hp))
    bih1, bhh1 = pad_b(params["bih1"]), pad_b(params["bhh1"])
    bih2, bhh2 = pad_b(params["bih2"]), pad_b(params["bhh2"])
    b1, bhhn1 = cat_b(bih1, bhh1), bhh1[2].astype(f32)
    b2, bhhn2 = cat_b(bih2, bhh2), bhh2[2].astype(f32)

    # ---- batch pad + time-major layout (wrapper-side plumbing only) ----
    x_tm = jnp.swapaxes(x, 0, 1)                                  # [T, B, D]
    if Bp != B:
        x_tm = jnp.pad(x_tm, ((0, 0), (0, Bp - B), (0, 0)))

    # ---- explicit VMEM budget (default scoped limits are 16/32 MiB) ----
    itm = jnp.dtype(mxu_dtype).itemsize
    need = (2 * T * block_b * D * 4                 # x block   (double-buffered)
            + 2 * T * block_b * Hp * 4              # z block   (double-buffered)
            + 2 * itm * (D * H3 + 3 * Hp * H3)      # weights   (2 buffers)
            + 2 * 4 * (2 * H3 + 2 * Hp)             # biases
            + T * block_b * Hp * 4                  # y scratch
            + T * block_b * H3 * itm)               # fused gate scratch
    vmem_limit = int(min(max(32 << 20, 1.5 * need + (2 << 20)), 56 << 20))

    def w_spec(shape):                # resident weights, constant block index
        return pl.BlockSpec(shape, lambda b: (0,) * len(shape))

    z_tm = pl.pallas_call(
        memory_kernel,
        out_shape=jax.ShapeDtypeStruct((T, Bp, Hp), f32),
        grid=(Bp // block_b,),
        in_specs=[
            pl.BlockSpec((T, block_b, D), lambda b: (0, b, 0)),   # x (time-major)
            w_spec((D, H3)), w_spec((Hp, H3)),
            w_spec((1, H3)), w_spec((1, Hp)),
            w_spec((Hp, H3)), w_spec((Hp, H3)),
            w_spec((1, H3)), w_spec((1, Hp)),
        ],
        out_specs=pl.BlockSpec((T, block_b, Hp), lambda b: (0, b, 0)),
        scratch_shapes=[
            pltpu.VMEM((T, block_b, Hp), f32),        # y: layer-1 history
            pltpu.VMEM((T, block_b, H3), mxu_dtype),  # fused gate slabs
        ],
        compiler_params=pltpu.CompilerParams(
            dimension_semantics=("parallel",),
            vmem_limit_bytes=vmem_limit),
    )(x_tm, wih1, whh1, b1, bhhn1, wih2, whh2, b2, bhhn2)

    return jnp.swapaxes(z_tm, 0, 1)[:B, :, :H]                    # [B, T, H]


# ---------------- pure-JAX reference (for correctness check) ----------------
def _gru_ref(x, wih, whh, bih, bhh):
    B, T, _ = x.shape
    H = whh.shape[-1]

    def step(h, xt):
        gx = [xt @ wih[g] + bih[g] for g in range(3)]
        gh = [h @ whh[g] + bhh[g] for g in range(3)]
        r = jax.nn.sigmoid(gx[0] + gh[0])
        z = jax.nn.sigmoid(gx[1] + gh[1])
        n = jnp.tanh(gx[2] + r * gh[2])
        h = (1.0 - z) * n + z * h
        return h, h

    _, ys = jax.lax.scan(step, jnp.zeros((B, H), jnp.float32),
                         jnp.swapaxes(x, 0, 1))
    return jnp.swapaxes(ys, 0, 1)


def memory_ref(x, p):
    y = _gru_ref(x, p["wih1"], p["whh1"], p["bih1"], p["bhh1"])
    z = _gru_ref(y, p["wih2"], p["whh2"], p["bih2"], p["bhh2"])
    return z + y


def init_params(key, input_size, hidden_size):
    """Deterministic synthetic GRU params (PyTorch-style U(-1/sqrt(H), 1/sqrt(H)))."""
    k = 1.0 / jnp.sqrt(jnp.float32(hidden_size))
    keys = jax.random.split(key, 8)
    u = lambda kk, shape: jax.random.uniform(kk, shape, jnp.float32, -k, k)
    return {
        "wih1": u(keys[0], (3, input_size, hidden_size)),
        "whh1": u(keys[1], (3, hidden_size, hidden_size)),
        "bih1": u(keys[2], (3, 1, hidden_size)),
        "bhh1": u(keys[3], (3, 1, hidden_size)),
        "wih2": u(keys[4], (3, hidden_size, hidden_size)),
        "whh2": u(keys[5], (3, hidden_size, hidden_size)),
        "bih2": u(keys[6], (3, 1, hidden_size)),
        "bhh2": u(keys[7], (3, 1, hidden_size)),
    }


if __name__ == "__main__":
    B, T, D, H = 2, 8, 16, 32  # batch, time, input_size, hidden_size

    key = jax.random.PRNGKey(0)
    kx, kp = jax.random.split(key)
    x = jax.random.normal(kx, (B, T, D), jnp.float32)
    params = init_params(kp, D, H)

    z_ref = memory_ref(x, params)

    # f32 MXU path: verifies the padded/fused algorithm exactly.
    z_f32 = jax.block_until_ready(memory_forward(x, params, mxu_dtype=jnp.float32))
    assert z_f32.shape == (B, T, H)
    assert jnp.allclose(z_f32, z_ref, atol=1e-4, rtol=1e-4), \
        "Pallas (f32 MXU) output mismatch vs reference"

    # bf16 MXU path (production config): f32 elementwise/recurrence, looser tol.
    z_bf16 = jax.block_until_ready(memory_forward(x, params))
    assert z_bf16.shape == (B, T, H)
    assert jnp.allclose(z_bf16, z_ref, atol=5e-2, rtol=5e-2), \
        "Pallas (bf16 MXU) output drifted beyond tolerance vs reference"

    print("KERNEL_OK")
</pallas_src>

<mosaic_0001>
module attributes {stable_mosaic.version = 11 : i64} {
  func.func @memory_kernel(%arg0: i32, %arg1: memref<8x8x16xf32, #tpu.memory_space<vmem>>, %arg2: memref<16x384xf32, #tpu.memory_space<vmem>>, %arg3: memref<128x384xf32, #tpu.memory_space<vmem>>, %arg4: memref<1x384xf32, #tpu.memory_space<vmem>>, %arg5: memref<1x128xf32, #tpu.memory_space<vmem>>, %arg6: memref<128x384xf32, #tpu.memory_space<vmem>>, %arg7: memref<128x384xf32, #tpu.memory_space<vmem>>, %arg8: memref<1x384xf32, #tpu.memory_space<vmem>>, %arg9: memref<1x128xf32, #tpu.memory_space<vmem>>, %arg10: memref<8x8x128xf32, #tpu.memory_space<vmem>>, %arg11: memref<8x8x128xf32, #tpu.memory_space<vmem>>, %arg12: memref<8x8x384xf32, #tpu.memory_space<vmem>>) attributes {dimension_semantics = [#tpu.dimension_semantics<parallel>], iteration_bounds = array<i64: 1>, scalar_prefetch = 0 : i64, scratch_operands = 2 : i64, tpu.core_type = #tpu.core_type<tc>, window_params = [{transform_indices = @transform_0, window_bounds = array<i64: 8, 8, 16>}, {pipeline_mode = #tpu.pipeline_mode<synchronous>, transform_indices = @transform_1, window_bounds = array<i64: 16, 384>}, {pipeline_mode = #tpu.pipeline_mode<synchronous>, transform_indices = @transform_2, window_bounds = array<i64: 128, 384>}, {pipeline_mode = #tpu.pipeline_mode<synchronous>, transform_indices = @transform_3, window_bounds = array<i64: 1, 384>}, {pipeline_mode = #tpu.pipeline_mode<synchronous>, transform_indices = @transform_4, window_bounds = array<i64: 1, 128>}, {pipeline_mode = #tpu.pipeline_mode<synchronous>, transform_indices = @transform_5, window_bounds = array<i64: 128, 384>}, {pipeline_mode = #tpu.pipeline_mode<synchronous>, transform_indices = @transform_6, window_bounds = array<i64: 128, 384>}, {pipeline_mode = #tpu.pipeline_mode<synchronous>, transform_indices = @transform_7, window_bounds = array<i64: 1, 384>}, {pipeline_mode = #tpu.pipeline_mode<synchronous>, transform_indices = @transform_8, window_bounds = array<i64: 1, 128>}, {transform_indices = @transform_9, window_bounds = array<i64: 8, 8, 128>}]} {
    %c0 = arith.constant 0 : index
    %c0_0 = arith.constant 0 : index
    %c0_1 = arith.constant 0 : index
    %0 = vector.load %arg1[%c0, %c0_0, %c0_1] : memref<8x8x16xf32, #tpu.memory_space<vmem>>, vector<8x8x16xf32>
    %1 = vector.shape_cast %0 : vector<8x8x16xf32> to vector<64x16xf32>
    %c0_2 = arith.constant 0 : index
    %c0_3 = arith.constant 0 : index
    %2 = vector.load %arg2[%c0_2, %c0_3] : memref<16x384xf32, #tpu.memory_space<vmem>>, vector<16x384xf32>
    %cst = arith.constant dense<0.000000e+00> : vector<64x384xf32>
    %3 = tpu.matmul %1, %2, %cst {dimension_numbers = #tpu.dot_dimension_numbers<[1], [0], [0], [1], [0, 0, 1, 1], [], []>} : vector<64x16xf32>, vector<16x384xf32>, vector<64x384xf32> -> vector<64x384xf32>
    %c0_4 = arith.constant 0 : index
    %c0_5 = arith.constant 0 : index
    %4 = vector.load %arg4[%c0_4, %c0_5] : memref<1x384xf32, #tpu.memory_space<vmem>>, vector<1x384xf32>
    %5 = vector.broadcast %4 : vector<1x384xf32> to vector<64x384xf32>
    %6 = arith.addf %3, %5 : vector<64x384xf32>
    %7 = vector.shape_cast %6 : vector<64x384xf32> to vector<8x8x384xf32>
    %c0_6 = arith.constant 0 : index
    %c0_7 = arith.constant 0 : index
    %c0_8 = arith.constant 0 : index
    %8 = vector.load %arg12[%c0_6, %c0_7, %c0_8] : memref<8x8x384xf32, #tpu.memory_space<vmem>>, vector<8x8x384xf32>
    tpu.vector_store %arg12[%c0_6, %c0_7, %c0_8], %7 {strides = array<i32>} : memref<8x8x384xf32, #tpu.memory_space<vmem>>, vector<8x8x384xf32>,
    %c0_9 = arith.constant 0 : index
    %c0_10 = arith.constant 0 : index
    %9 = vector.load %arg3[%c0_9, %c0_10] : memref<128x384xf32, #tpu.memory_space<vmem>>, vector<128x384xf32>
    %c0_11 = arith.constant 0 : index
    %c0_12 = arith.constant 0 : index
    %10 = vector.load %arg5[%c0_11, %c0_12] : memref<1x128xf32, #tpu.memory_space<vmem>>, vector<1x128xf32>
    %11 = vector.shape_cast %10 : vector<1x128xf32> to vector<1x128xf32>
    %12 = vector.broadcast %11 : vector<1x128xf32> to vector<8x128xf32>
    %cst_13 = arith.constant 0.000000e+00 : f32
    %13 = vector.broadcast %cst_13 : f32 to vector<8x128xf32>
    %c0_i32 = arith.constant 0 : i32
    %14 = arith.index_cast %c0_i32 : i32 to index
    %c0_14 = arith.constant 0 : index
    %c0_15 = arith.constant 0 : index
    %15 = vector.load %arg12[%14, %c0_14, %c0_15] : memref<8x8x384xf32, #tpu.memory_space<vmem>>, vector<1x8x384xf32>
    %16 = vector.shape_cast %15 : vector<1x8x384xf32> to vector<8x384xf32>
    %cst_16 = arith.constant dense<0.000000e+00> : vector<8x384xf32>
    %17 = tpu.matmul %13, %9, %cst_16 {dimension_numbers = #tpu.dot_dimension_numbers<[1], [0], [0], [1], [0, 0, 1, 1], [], []>} : vector<8x128xf32>, vector<128x384xf32>, vector<8x384xf32> -> vector<8x384xf32>
    %18 = vector.extract_strided_slice %16 {offsets = [0, 0], sizes = [8, 128], strides = [1, 1]} : vector<8x384xf32> to vector<8x128xf32>
    %19 = vector.extract_strided_slice %17 {offsets = [0, 0], sizes = [8, 128], strides = [1, 1]} : vector<8x384xf32> to vector<8x128xf32>
    %20 = arith.addf %18, %19 : vector<8x128xf32>
    %21 = arith.negf %20 : vector<8x128xf32>
    %22 = math.exp %21 : vector<8x128xf32>
    %cst_17 = arith.constant 1.000000e+00 : f32
    %23 = vector.broadcast %cst_17 : f32 to vector<8x128xf32>
    %24 = arith.addf %23, %22 : vector<8x128xf32>
    %25 = arith.divf %23, %24 : vector<8x128xf32>
    %26 = vector.extract_strided_slice %16 {offsets = [0, 128], sizes = [8, 128], strides = [1, 1]} : vector<8x384xf32> to vector<8x128xf32>
    %27 = vector.extract_strided_slice %17 {offsets = [0, 128], sizes = [8, 128], strides = [1, 1]} : vector<8x384xf32> to vector<8x128xf32>
    %28 = arith.addf %26, %27 : vector<8x128xf32>
    %29 = arith.negf %28 : vector<8x128xf32>
    %30 = math.exp %29 : vector<8x128xf32>
    %cst_18 = arith.constant 1.000000e+00 : f32
    %31 = vector.broadcast %cst_18 : f32 to vector<8x128xf32>
    %32 = arith.addf %31, %30 : vector<8x128xf32>
    %33 = arith.divf %31, %32 : vector<8x128xf32>
    %34 = vector.extract_strided_slice %16 {offsets = [0, 256], sizes = [8, 128], strides = [1, 1]} : vector<8x384xf32> to vector<8x128xf32>
    %35 = vector.extract_strided_slice %17 {offsets = [0, 256], sizes = [8, 128], strides = [1, 1]} : vector<8x384xf32> to vector<8x128xf32>
    %36 = arith.addf %35, %12 : vector<8x128xf32>
    %37 = arith.mulf %25, %36 : vector<8x128xf32>
    %38 = arith.addf %34, %37 : vector<8x128xf32>
    %39 = math.tanh %38 : vector<8x128xf32>
    %cst_19 = arith.constant 1.000000e+00 : f32
    %40 = vector.broadcast %cst_19 : f32 to vector<8x128xf32>
    %41 = arith.subf %40, %33 : vector<8x128xf32>
    %42 = arith.mulf %41, %39 : vector<8x128xf32>
    %43 = arith.mulf %33, %13 : vector<8x128xf32>
    %44 = arith.addf %42, %43 : vector<8x128xf32>
    %45 = arith.index_cast %c0_i32 : i32 to index
    %c0_20 = arith.constant 0 : index
    %c0_21 = arith.constant 0 : index
    %46 = vector.load %arg11[%45, %c0_20, %c0_21] : memref<8x8x128xf32, #tpu.memory_space<vmem>>, vector<1x8x128xf32>
    %47 = vector.shape_cast %46 : vector<1x8x128xf32> to vector<8x128xf32>
    %48 = vector.shape_cast %44 : vector<8x128xf32> to vector<1x8x128xf32>
    tpu.vector_store %arg11[%45, %c0_20, %c0_21], %48 {strides = array<i32>} : memref<8x8x128xf32, #tpu.memory_space<vmem>>, vector<1x8x128xf32>,
    %c1_i32 = arith.constant 1 : i32
    %49 = arith.index_cast %c1_i32 : i32 to index
    %c0_22 = arith.constant 0 : index
    %c0_23 = arith.constant 0 : index
    %50 = vector.load %arg12[%49, %c0_22, %c0_23] : memref<8x8x384xf32, #tpu.memory_space<vmem>>, vector<1x8x384xf32>
    %51 = vector.shape_cast %50 : vector<1x8x384xf32> to vector<8x384xf32>
    %cst_24 = arith.constant dense<0.000000e+00> : vector<8x384xf32>
    %52 = tpu.matmul %44, %9, %cst_24 {dimension_numbers = #tpu.dot_dimension_numbers<[1], [0], [0], [1], [0, 0, 1, 1], [], []>} : vector<8x128xf32>, vector<128x384xf32>, vector<8x384xf32> -> vector<8x384xf32>
    %53 = vector.extract_strided_slice %51 {offsets = [0, 0], sizes = [8, 128], strides = [1, 1]} : vector<8x384xf32> to vector<8x128xf32>
    %54 = vector.extract_strided_slice %52 {offsets = [0, 0], sizes = [8, 128], strides = [1, 1]} : vector<8x384xf32> to vector<8x128xf32>
    %55 = arith.addf %53, %54 : vector<8x128xf32>
    %56 = arith.negf %55 : vector<8x128xf32>
    %57 = math.exp %56 : vector<8x128xf32>
    %cst_25 = arith.constant 1.000000e+00 : f32
    %58 = vector.broadcast %cst_25 : f32 to vector<8x128xf32>
    %59 = arith.addf %58, %57 : vector<8x128xf32>
    %60 = arith.divf %58, %59 : vector<8x128xf32>
    %61 = vector.extract_strided_slice %51 {offsets = [0, 128], sizes = [8, 128], strides = [1, 1]} : vector<8x384xf32> to vector<8x128xf32>
    %62 = vector.extract_strided_slice %52 {offsets = [0, 128], sizes = [8, 128], strides = [1, 1]} : vector<8x384xf32> to vector<8x128xf32>
    %63 = arith.addf %61, %62 : vector<8x128xf32>
    %64 = arith.negf %63 : vector<8x128xf32>
    %65 = math.exp %64 : vector<8x128xf32>
    %cst_26 = arith.constant 1.000000e+00 : f32
    %66 = vector.broadcast %cst_26 : f32 to vector<8x128xf32>
    %67 = arith.addf %66, %65 : vector<8x128xf32>
    %68 = arith.divf %66, %67 : vector<8x128xf32>
    %69 = vector.extract_strided_slice %51 {offsets = [0, 256], sizes = [8, 128], strides = [1, 1]} : vector<8x384xf32> to vector<8x128xf32>
    %70 = vector.extract_strided_slice %52 {offsets = [0, 256], sizes = [8, 128], strides = [1, 1]} : vector<8x384xf32> to vector<8x128xf32>
    %71 = arith.addf %70, %12 : vector<8x128xf32>
    %72 = arith.mulf %60, %71 : vector<8x128xf32>
    %73 = arith.addf %69, %72 : vector<8x128xf32>
    %74 = math.tanh %73 : vector<8x128xf32>
    %cst_27 = arith.constant 1.000000e+00 : f32
    %75 = vector.broadcast %cst_27 : f32 to vector<8x128xf32>
    %76 = arith.subf %75, %68 : vector<8x128xf32>
    %77 = arith.mulf %76, %74 : vector<8x128xf32>
    %78 = arith.mulf %68, %44 : vector<8x128xf32>
    %79 = arith.addf %77, %78 : vector<8x128xf32>
    %80 = arith.index_cast %c1_i32 : i32 to index
    %c0_28 = arith.constant 0 : index
    %c0_29 = arith.constant 0 : index
    %81 = vector.load %arg11[%80, %c0_28, %c0_29] : memref<8x8x128xf32, #tpu.memory_space<vmem>>, vector<1x8x128xf32>
    %82 = vector.shape_cast %81 : vector<1x8x128xf32> to vector<8x128xf32>
    %83 = vector.shape_cast %79 : vector<8x128xf32> to vector<1x8x128xf32>
    tpu.vector_store %arg11[%80, %c0_28, %c0_29], %83 {strides = array<i32>} : memref<8x8x128xf32, #tpu.memory_space<vmem>>, vector<1x8x128xf32>,
    %c2_i32 = arith.constant 2 : i32
    %84 = arith.index_cast %c2_i32 : i32 to index
    %c0_30 = arith.constant 0 : index
    %c0_31 = arith.constant 0 : index
    %85 = vector.load %arg12[%84, %c0_30, %c0_31] : memref<8x8x384xf32, #tpu.memory_space<vmem>>, vector<1x8x384xf32>
    %86 = vector.shape_cast %85 : vector<1x8x384xf32> to vector<8x384xf32>
    %cst_32 = arith.constant dense<0.000000e+00> : vector<8x384xf32>
    %87 = tpu.matmul %79, %9, %cst_32 {dimension_numbers = #tpu.dot_dimension_numbers<[1], [0], [0], [1], [0, 0, 1, 1], [], []>} : vector<8x128xf32>, vector<128x384xf32>, vector<8x384xf32> -> vector<8x384xf32>
    %88 = vector.extract_strided_slice %86 {offsets = [0, 0], sizes = [8, 128], strides = [1, 1]} : vector<8x384xf32> to vector<8x128xf32>
    %89 = vector.extract_strided_slice %87 {offsets = [0, 0], sizes = [8, 128], strides = [1, 1]} : vector<8x384xf32> to vector<8x128xf32>
    %90 = arith.addf %88, %89 : vector<8x128xf32>
    %91 = arith.negf %90 : vector<8x128xf32>
    %92 = math.exp %91 : vector<8x128xf32>
    %cst_33 = arith.constant 1.000000e+00 : f32
    %93 = vector.broadcast %cst_33 : f32 to vector<8x128xf32>
    %94 = arith.addf %93, %92 : vector<8x128xf32>
    %95 = arith.divf %93, %94 : vector<8x128xf32>
    %96 = vector.extract_strided_slice %86 {offsets = [0, 128], sizes = [8, 128], strides = [1, 1]} : vector<8x384xf32> to vector<8x128xf32>
    %97 = vector.extract_strided_slice %87 {offsets = [0, 128], sizes = [8, 128], strides = [1, 1]} : vector<8x384xf32> to vector<8x128xf32>
    %98 = arith.addf %96, %97 : vector<8x128xf32>
    %99 = arith.negf %98 : vector<8x128xf32>
    %100 = math.exp %99 : vector<8x128xf32>
    %cst_34 = arith.constant 1.000000e+00 : f32
    %101 = vector.broadcast %cst_34 : f32 to vector<8x128xf32>
    %102 = arith.addf %101, %100 : vector<8x128xf32>
    %103 = arith.divf %101, %102 : vector<8x128xf32>
    %104 = vector.extract_strided_slice %86 {offsets = [0, 256], sizes = [8, 128], strides = [1, 1]} : vector<8x384xf32> to vector<8x128xf32>
    %105 = vector.extract_strided_slice %87 {offsets = [0, 256], sizes = [8, 128], strides = [1, 1]} : vector<8x384xf32> to vector<8x128xf32>
    %106 = arith.addf %105, %12 : vector<8x128xf32>
    %107 = arith.mulf %95, %106 : vector<8x128xf32>
    %108 = arith.addf %104, %107 : vector<8x128xf32>
    %109 = math.tanh %108 : vector<8x128xf32>
    %cst_35 = arith.constant 1.000000e+00 : f32
    %110 = vector.broadcast %cst_35 : f32 to vector<8x128xf32>
    %111 = arith.subf %110, %103 : vector<8x128xf32>
    %112 = arith.mulf %111, %109 : vector<8x128xf32>
    %113 = arith.mulf %103, %79 : vector<8x128xf32>
    %114 = arith.addf %112, %113 : vector<8x128xf32>
    %115 = arith.index_cast %c2_i32 : i32 to index
    %c0_36 = arith.constant 0 : index
    %c0_37 = arith.constant 0 : index
    %116 = vector.load %arg11[%115, %c0_36, %c0_37] : memref<8x8x128xf32, #tpu.memory_space<vmem>>, vector<1x8x128xf32>
    %117 = vector.shape_cast %116 : vector<1x8x128xf32> to vector<8x128xf32>
    %118 = vector.shape_cast %114 : vector<8x128xf32> to vector<1x8x128xf32>
    tpu.vector_store %arg11[%115, %c0_36, %c0_37], %118 {strides = array<i32>} : memref<8x8x128xf32, #tpu.memory_space<vmem>>, vector<1x8x128xf32>,
    %c3_i32 = arith.constant 3 : i32
    %119 = arith.index_cast %c3_i32 : i32 to index
    %c0_38 = arith.constant 0 : index
    %c0_39 = arith.constant 0 : index
    %120 = vector.load %arg12[%119, %c0_38, %c0_39] : memref<8x8x384xf32, #tpu.memory_space<vmem>>, vector<1x8x384xf32>
    %121 = vector.shape_cast %120 : vector<1x8x384xf32> to vector<8x384xf32>
    %cst_40 = arith.constant dense<0.000000e+00> : vector<8x384xf32>
    %122 = tpu.matmul %114, %9, %cst_40 {dimension_numbers = #tpu.dot_dimension_numbers<[1], [0], [0], [1], [0, 0, 1, 1], [], []>} : vector<8x128xf32>, vector<128x384xf32>, vector<8x384xf32> -> vector<8x384xf32>
    %123 = vector.extract_strided_slice %121 {offsets = [0, 0], sizes = [8, 128], strides = [1, 1]} : vector<8x384xf32> to vector<8x128xf32>
    %124 = vector.extract_strided_slice %122 {offsets = [0, 0], sizes = [8, 128], strides = [1, 1]} : vector<8x384xf32> to vector<8x128xf32>
    %125 = arith.addf %123, %124 : vector<8x128xf32>
    %126 = arith.negf %125 : vector<8x128xf32>
    %127 = math.exp %126 : vector<8x128xf32>
    %cst_41 = arith.constant 1.000000e+00 : f32
    %128 = vector.broadcast %cst_41 : f32 to vector<8x128xf32>
    %129 = arith.addf %128, %127 : vector<8x128xf32>
    %130 = arith.divf %128, %129 : vector<8x128xf32>
    %131 = vector.extract_strided_slice %121 {offsets = [0, 128], sizes = [8, 128], strides = [1, 1]} : vector<8x384xf32> to vector<8x128xf32>
    %132 = vector.extract_strided_slice %122 {offsets = [0, 128], sizes = [8, 128], strides = [1, 1]} : vector<8x384xf32> to vector<8x128xf32>
    %133 = arith.addf %131, %132 : vector<8x128xf32>
    %134 = arith.negf %133 : vector<8x128xf32>
    %135 = math.exp %134 : vector<8x128xf32>
    %cst_42 = arith.constant 1.000000e+00 : f32
    %136 = vector.broadcast %cst_42 : f32 to vector<8x128xf32>
    %137 = arith.addf %136, %135 : vector<8x128xf32>
    %138 = arith.divf %136, %137 : vector<8x128xf32>
    %139 = vector.extract_strided_slice %121 {offsets = [0, 256], sizes = [8, 128], strides = [1, 1]} : vector<8x384xf32> to vector<8x128xf32>
    %140 = vector.extract_strided_slice %122 {offsets = [0, 256], sizes = [8, 128], strides = [1, 1]} : vector<8x384xf32> to vector<8x128xf32>
    %141 = arith.addf %140, %12 : vector<8x128xf32>
    %142 = arith.mulf %130, %141 : vector<8x128xf32>
    %143 = arith.addf %139, %142 : vector<8x128xf32>
    %144 = math.tanh %143 : vector<8x128xf32>
    %cst_43 = arith.constant 1.000000e+00 : f32
    %145 = vector.broadcast %cst_43 : f32 to vector<8x128xf32>
    %146 = arith.subf %145, %138 : vector<8x128xf32>
    %147 = arith.mulf %146, %144 : vector<8x128xf32>
    %148 = arith.mulf %138, %114 : vector<8x128xf32>
    %149 = arith.addf %147, %148 : vector<8x128xf32>
    %150 = arith.index_cast %c3_i32 : i32 to index
    %c0_44 = arith.constant 0 : index
    %c0_45 = arith.constant 0 : index
    %151 = vector.load %arg11[%150, %c0_44, %c0_45] : memref<8x8x128xf32, #tpu.memory_space<vmem>>, vector<1x8x128xf32>
    %152 = vector.shape_cast %151 : vector<1x8x128xf32> to vector<8x128xf32>
    %153 = vector.shape_cast %149 : vector<8x128xf32> to vector<1x8x128xf32>
    tpu.vector_store %arg11[%150, %c0_44, %c0_45], %153 {strides = array<i32>} : memref<8x8x128xf32, #tpu.memory_space<vmem>>, vector<1x8x128xf32>,
    %c4_i32 = arith.constant 4 : i32
    %154 = arith.index_cast %c4_i32 : i32 to index
    %c0_46 = arith.constant 0 : index
    %c0_47 = arith.constant 0 : index
    %155 = vector.load %arg12[%154, %c0_46, %c0_47] : memref<8x8x384xf32, #tpu.memory_space<vmem>>, vector<1x8x384xf32>
    %156 = vector.shape_cast %155 : vector<1x8x384xf32> to vector<8x384xf32>
    %cst_48 = arith.constant dense<0.000000e+00> : vector<8x384xf32>
    %157 = tpu.matmul %149, %9, %cst_48 {dimension_numbers = #tpu.dot_dimension_numbers<[1], [0], [0], [1], [0, 0, 1, 1], [], []>} : vector<8x128xf32>, vector<128x384xf32>, vector<8x384xf32> -> vector<8x384xf32>
    %158 = vector.extract_strided_slice %156 {offsets = [0, 0], sizes = [8, 128], strides = [1, 1]} : vector<8x384xf32> to vector<8x128xf32>
    %159 = vector.extract_strided_slice %157 {offsets = [0, 0], sizes = [8, 128], strides = [1, 1]} : vector<8x384xf32> to vector<8x128xf32>
    %160 = arith.addf %158, %159 : vector<8x128xf32>
    %161 = arith.negf %160 : vector<8x128xf32>
    %162 = math.exp %161 : vector<8x128xf32>
    %cst_49 = arith.constant 1.000000e+00 : f32
    %163 = vector.broadcast %cst_49 : f32 to vector<8x128xf32>
    %164 = arith.addf %163, %162 : vector<8x128xf32>
    %165 = arith.divf %163, %164 : vector<8x128xf32>
    %166 = vector.extract_strided_slice %156 {offsets = [0, 128], sizes = [8, 128], strides = [1, 1]} : vector<8x384xf32> to vector<8x128xf32>
    %167 = vector.extract_strided_slice %157 {offsets = [0, 128], sizes = [8, 128], strides = [1, 1]} : vector<8x384xf32> to vector<8x128xf32>
    %168 = arith.addf %166, %167 : vector<8x128xf32>
    %169 = arith.negf %168 : vector<8x128xf32>
    %170 = math.exp %169 : vector<8x128xf32>
    %cst_50 = arith.constant 1.000000e+00 : f32
    %171 = vector.broadcast %cst_50 : f32 to vector<8x128xf32>
    %172 = arith.addf %171, %170 : vector<8x128xf32>
    %173 = arith.divf %171, %172 : vector<8x128xf32>
    %174 = vector.extract_strided_slice %156 {offsets = [0, 256], sizes = [8, 128], strides = [1, 1]} : vector<8x384xf32> to vector<8x128xf32>
    %175 = vector.extract_strided_slice %157 {offsets = [0, 256], sizes = [8, 128], strides = [1, 1]} : vector<8x384xf32> to vector<8x128xf32>
    %176 = arith.addf %175, %12 : vector<8x128xf32>
    %177 = arith.mulf %165, %176 : vector<8x128xf32>
    %178 = arith.addf %174, %177 : vector<8x128xf32>
    %179 = math.tanh %178 : vector<8x128xf32>
    %cst_51 = arith.constant 1.000000e+00 : f32
    %180 = vector.broadcast %cst_51 : f32 to vector<8x128xf32>
    %181 = arith.subf %180, %173 : vector<8x128xf32>
    %182 = arith.mulf %181, %179 : vector<8x128xf32>
    %183 = arith.mulf %173, %149 : vector<8x128xf32>
    %184 = arith.addf %182, %183 : vector<8x128xf32>
    %185 = arith.index_cast %c4_i32 : i32 to index
    %c0_52 = arith.constant 0 : index
    %c0_53 = arith.constant 0 : index
    %186 = vector.load %arg11[%185, %c0_52, %c0_53] : memref<8x8x128xf32, #tpu.memory_space<vmem>>, vector<1x8x128xf32>
    %187 = vector.shape_cast %186 : vector<1x8x128xf32> to vector<8x128xf32>
    %188 = vector.shape_cast %184 : vector<8x128xf32> to vector<1x8x128xf32>
    tpu.vector_store %arg11[%185, %c0_52, %c0_53], %188 {strides = array<i32>} : memref<8x8x128xf32, #tpu.memory_space<vmem>>, vector<1x8x128xf32>,
    %c5_i32 = arith.constant 5 : i32
    %189 = arith.index_cast %c5_i32 : i32 to index
    %c0_54 = arith.constant 0 : index
    %c0_55 = arith.constant 0 : index
    %190 = vector.load %arg12[%189, %c0_54, %c0_55] : memref<8x8x384xf32, #tpu.memory_space<vmem>>, vector<1x8x384xf32>
    %191 = vector.shape_cast %190 : vector<1x8x384xf32> to vector<8x384xf32>
    %cst_56 = arith.constant dense<0.000000e+00> : vector<8x384xf32>
    %192 = tpu.matmul %184, %9, %cst_56 {dimension_numbers = #tpu.dot_dimension_numbers<[1], [0], [0], [1], [0, 0, 1, 1], [], []>} : vector<8x128xf32>, vector<128x384xf32>, vector<8x384xf32> -> vector<8x384xf32>
    %193 = vector.extract_strided_slice %191 {offsets = [0, 0], sizes = [8, 128], strides = [1, 1]} : vector<8x384xf32> to vector<8x128xf32>
    %194 = vector.extract_strided_slice %192 {offsets = [0, 0], sizes = [8, 128], strides = [1, 1]} : vector<8x384xf32> to vector<8x128xf32>
    %195 = arith.addf %193, %194 : vector<8x128xf32>
    %196 = arith.negf %195 : vector<8x128xf32>
    %197 = math.exp %196 : vector<8x128xf32>
    %cst_57 = arith.constant 1.000000e+00 : f32
    %198 = vector.broadcast %cst_57 : f32 to vector<8x128xf32>
    %199 = arith.addf %198, %197 : vector<8x128xf32>
    %200 = arith.divf %198, %199 : vector<8x128xf32>
    %201 = vector.extract_strided_slice %191 {offsets = [0, 128], sizes = [8, 128], strides = [1, 1]} : vector<8x384xf32> to vector<8x128xf32>
    %202 = vector.extract_strided_slice %192 {offsets = [0, 128], sizes = [8, 128], strides = [1, 1]} : vector<8x384xf32> to vector<8x128xf32>
    %203 = arith.addf %201, %202 : vector<8x128xf32>
    %204 = arith.negf %203 : vector<8x128xf32>
    %205 = math.exp %204 : vector<8x128xf32>
    %cst_58 = arith.constant 1.000000e+00 : f32
    %206 = vector.broadcast %cst_58 : f32 to vector<8x128xf32>
    %207 = arith.addf %206, %205 : vector<8x128xf32>
    %208 = arith.divf %206, %207 : vector<8x128xf32>
    %209 = vector.extract_strided_slice %191 {offsets = [0, 256], sizes = [8, 128], strides = [1, 1]} : vector<8x384xf32> to vector<8x128xf32>
    %210 = vector.extract_strided_slice %192 {offsets = [0, 256], sizes = [8, 128], strides = [1, 1]} : vector<8x384xf32> to vector<8x128xf32>
    %211 = arith.addf %210, %12 : vector<8x128xf32>
    %212 = arith.mulf %200, %211 : vector<8x128xf32>
    %213 = arith.addf %209, %212 : vector<8x128xf32>
    %214 = math.tanh %213 : vector<8x128xf32>
    %cst_59 = arith.constant 1.000000e+00 : f32
    %215 = vector.broadcast %cst_59 : f32 to vector<8x128xf32>
    %216 = arith.subf %215, %208 : vector<8x128xf32>
    %217 = arith.mulf %216, %214 : vector<8x128xf32>
    %218 = arith.mulf %208, %184 : vector<8x128xf32>
    %219 = arith.addf %217, %218 : vector<8x128xf32>
    %220 = arith.index_cast %c5_i32 : i32 to index
    %c0_60 = arith.constant 0 : index
    %c0_61 = arith.constant 0 : index
    %221 = vector.load %arg11[%220, %c0_60, %c0_61] : memref<8x8x128xf32, #tpu.memory_space<vmem>>, vector<1x8x128xf32>
    %222 = vector.shape_cast %221 : vector<1x8x128xf32> to vector<8x128xf32>
    %223 = vector.shape_cast %219 : vector<8x128xf32> to vector<1x8x128xf32>
    tpu.vector_store %arg11[%220, %c0_60, %c0_61], %223 {strides = array<i32>} : memref<8x8x128xf32, #tpu.memory_space<vmem>>, vector<1x8x128xf32>,
    %c6_i32 = arith.constant 6 : i32
    %224 = arith.index_cast %c6_i32 : i32 to index
    %c0_62 = arith.constant 0 : index
    %c0_63 = arith.constant 0 : index
    %225 = vector.load %arg12[%224, %c0_62, %c0_63] : memref<8x8x384xf32, #tpu.memory_space<vmem>>, vector<1x8x384xf32>
    %226 = vector.shape_cast %225 : vector<1x8x384xf32> to vector<8x384xf32>
    %cst_64 = arith.constant dense<0.000000e+00> : vector<8x384xf32>
    %227 = tpu.matmul %219, %9, %cst_64 {dimension_numbers = #tpu.dot_dimension_numbers<[1], [0], [0], [1], [0, 0, 1, 1], [], []>} : vector<8x128xf32>, vector<128x384xf32>, vector<8x384xf32> -> vector<8x384xf32>
    %228 = vector.extract_strided_slice %226 {offsets = [0, 0], sizes = [8, 128], strides = [1, 1]} : vector<8x384xf32> to vector<8x128xf32>
    %229 = vector.extract_strided_slice %227 {offsets = [0, 0], sizes = [8, 128], strides = [1, 1]} : vector<8x384xf32> to vector<8x128xf32>
    %230 = arith.addf %228, %229 : vector<8x128xf32>
    %231 = arith.negf %230 : vector<8x128xf32>
    %232 = math.exp %231 : vector<8x128xf32>
    %cst_65 = arith.constant 1.000000e+00 : f32
    %233 = vector.broadcast %cst_65 : f32 to vector<8x128xf32>
    %234 = arith.addf %233, %232 : vector<8x128xf32>
    %235 = arith.divf %233, %234 : vector<8x128xf32>
    %236 = vector.extract_strided_slice %226 {offsets = [0, 128], sizes = [8, 128], strides = [1, 1]} : vector<8x384xf32> to vector<8x128xf32>
    %237 = vector.extract_strided_slice %227 {offsets = [0, 128], sizes = [8, 128], strides = [1, 1]} : vector<8x384xf32> to vector<8x128xf32>
    %238 = arith.addf %236, %237 : vector<8x128xf32>
    %239 = arith.negf %238 : vector<8x128xf32>
    %240 = math.exp %239 : vector<8x128xf32>
    %cst_66 = arith.constant 1.000000e+00 : f32
    %241 = vector.broadcast %cst_66 : f32 to vector<8x128xf32>
    %242 = arith.addf %241, %240 : vector<8x128xf32>
    %243 = arith.divf %241, %242 : vector<8x128xf32>
    %244 = vector.extract_strided_slice %226 {offsets = [0, 256], sizes = [8, 128], strides = [1, 1]} : vector<8x384xf32> to vector<8x128xf32>
    %245 = vector.extract_strided_slice %227 {offsets = [0, 256], sizes = [8, 128], strides = [1, 1]} : vector<8x384xf32> to vector<8x128xf32>
    %246 = arith.addf %245, %12 : vector<8x128xf32>
    %247 = arith.mulf %235, %246 : vector<8x128xf32>
    %248 = arith.addf %244, %247 : vector<8x128xf32>
    %249 = math.tanh %248 : vector<8x128xf32>
    %cst_67 = arith.constant 1.000000e+00 : f32
    %250 = vector.broadcast %cst_67 : f32 to vector<8x128xf32>
    %251 = arith.subf %250, %243 : vector<8x128xf32>
    %252 = arith.mulf %251, %249 : vector<8x128xf32>
    %253 = arith.mulf %243, %219 : vector<8x128xf32>
    %254 = arith.addf %252, %253 : vector<8x128xf32>
    %255 = arith.index_cast %c6_i32 : i32 to index
    %c0_68 = arith.constant 0 : index
    %c0_69 = arith.constant 0 : index
    %256 = vector.load %arg11[%255, %c0_68, %c0_69] : memref<8x8x128xf32, #tpu.memory_space<vmem>>, vector<1x8x128xf32>
    %257 = vector.shape_cast %256 : vector<1x8x128xf32> to vector<8x128xf32>
    %258 = vector.shape_cast %254 : vector<8x128xf32> to vector<1x8x128xf32>
    tpu.vector_store %arg11[%255, %c0_68, %c0_69], %258 {strides = array<i32>} : memref<8x8x128xf32, #tpu.memory_space<vmem>>, vector<1x8x128xf32>,
    %c7_i32 = arith.constant 7 : i32
    %259 = arith.index_cast %c7_i32 : i32 to index
    %c0_70 = arith.constant 0 : index
    %c0_71 = arith.constant 0 : index
    %260 = vector.load %arg12[%259, %c0_70, %c0_71] : memref<8x8x384xf32, #tpu.memory_space<vmem>>, vector<1x8x384xf32>
    %261 = vector.shape_cast %260 : vector<1x8x384xf32> to vector<8x384xf32>
    %cst_72 = arith.constant dense<0.000000e+00> : vector<8x384xf32>
    %262 = tpu.matmul %254, %9, %cst_72 {dimension_numbers = #tpu.dot_dimension_numbers<[1], [0], [0], [1], [0, 0, 1, 1], [], []>} : vector<8x128xf32>, vector<128x384xf32>, vector<8x384xf32> -> vector<8x384xf32>
    %263 = vector.extract_strided_slice %261 {offsets = [0, 0], sizes = [8, 128], strides = [1, 1]} : vector<8x384xf32> to vector<8x128xf32>
    %264 = vector.extract_strided_slice %262 {offsets = [0, 0], sizes = [8, 128], strides = [1, 1]} : vector<8x384xf32> to vector<8x128xf32>
    %265 = arith.addf %263, %264 : vector<8x128xf32>
    %266 = arith.negf %265 : vector<8x128xf32>
    %267 = math.exp %266 : vector<8x128xf32>
    %cst_73 = arith.constant 1.000000e+00 : f32
    %268 = vector.broadcast %cst_73 : f32 to vector<8x128xf32>
    %269 = arith.addf %268, %267 : vector<8x128xf32>
    %270 = arith.divf %268, %269 : vector<8x128xf32>
    %271 = vector.extract_strided_slice %261 {offsets = [0, 128], sizes = [8, 128], strides = [1, 1]} : vector<8x384xf32> to vector<8x128xf32>
    %272 = vector.extract_strided_slice %262 {offsets = [0, 128], sizes = [8, 128], strides = [1, 1]} : vector<8x384xf32> to vector<8x128xf32>
    %273 = arith.addf %271, %272 : vector<8x128xf32>
    %274 = arith.negf %273 : vector<8x128xf32>
    %275 = math.exp %274 : vector<8x128xf32>
    %cst_74 = arith.constant 1.000000e+00 : f32
    %276 = vector.broadcast %cst_74 : f32 to vector<8x128xf32>
    %277 = arith.addf %276, %275 : vector<8x128xf32>
    %278 = arith.divf %276, %277 : vector<8x128xf32>
    %279 = vector.extract_strided_slice %261 {offsets = [0, 256], sizes = [8, 128], strides = [1, 1]} : vector<8x384xf32> to vector<8x128xf32>
    %280 = vector.extract_strided_slice %262 {offsets = [0, 256], sizes = [8, 128], strides = [1, 1]} : vector<8x384xf32> to vector<8x128xf32>
    %281 = arith.addf %280, %12 : vector<8x128xf32>
    %282 = arith.mulf %270, %281 : vector<8x128xf32>
    %283 = arith.addf %279, %282 : vector<8x128xf32>
    %284 = math.tanh %283 : vector<8x128xf32>
    %cst_75 = arith.constant 1.000000e+00 : f32
    %285 = vector.broadcast %cst_75 : f32 to vector<8x128xf32>
    %286 = arith.subf %285, %278 : vector<8x128xf32>
    %287 = arith.mulf %286, %284 : vector<8x128xf32>
    %288 = arith.mulf %278, %254 : vector<8x128xf32>
    %289 = arith.addf %287, %288 : vector<8x128xf32>
    %290 = arith.index_cast %c7_i32 : i32 to index
    %c0_76 = arith.constant 0 : index
    %c0_77 = arith.constant 0 : index
    %291 = vector.load %arg11[%290, %c0_76, %c0_77] : memref<8x8x128xf32, #tpu.memory_space<vmem>>, vector<1x8x128xf32>
    %292 = vector.shape_cast %291 : vector<1x8x128xf32> to vector<8x128xf32>
    %293 = vector.shape_cast %289 : vector<8x128xf32> to vector<1x8x128xf32>
    tpu.vector_store %arg11[%290, %c0_76, %c0_77], %293 {strides = array<i32>} : memref<8x8x128xf32, #tpu.memory_space<vmem>>, vector<1x8x128xf32>,
    %c8_i32 = arith.constant 8 : i32
    %c0_78 = arith.constant 0 : index
    %c0_79 = arith.constant 0 : index
    %c0_80 = arith.constant 0 : index
    %294 = vector.load %arg11[%c0_78, %c0_79, %c0_80] : memref<8x8x128xf32, #tpu.memory_space<vmem>>, vector<8x8x128xf32>
    %295 = vector.shape_cast %294 : vector<8x8x128xf32> to vector<64x128xf32>
    %c0_81 = arith.constant 0 : index
    %c0_82 = arith.constant 0 : index
    %296 = vector.load %arg6[%c0_81, %c0_82] : memref<128x384xf32, #tpu.memory_space<vmem>>, vector<128x384xf32>
    %cst_83 = arith.constant dense<0.000000e+00> : vector<64x384xf32>
    %297 = tpu.matmul %295, %296, %cst_83 {dimension_numbers = #tpu.dot_dimension_numbers<[1], [0], [0], [1], [0, 0, 1, 1], [], []>} : vector<64x128xf32>, vector<128x384xf32>, vector<64x384xf32> -> vector<64x384xf32>
    %c0_84 = arith.constant 0 : index
    %c0_85 = arith.constant 0 : index
    %298 = vector.load %arg8[%c0_84, %c0_85] : memref<1x384xf32, #tpu.memory_space<vmem>>, vector<1x384xf32>
    %299 = vector.broadcast %298 : vector<1x384xf32> to vector<64x384xf32>
    %300 = arith.addf %297, %299 : vector<64x384xf32>
    %301 = vector.shape_cast %300 : vector<64x384xf32> to vector<8x8x384xf32>
    %c0_86 = arith.constant 0 : index
    %c0_87 = arith.constant 0 : index
    %c0_88 = arith.constant 0 : index
    %302 = vector.load %arg12[%c0_86, %c0_87, %c0_88] : memref<8x8x384xf32, #tpu.memory_space<vmem>>, vector<8x8x384xf32>
    tpu.vector_store %arg12[%c0_86, %c0_87, %c0_88], %301 {strides = array<i32>} : memref<8x8x384xf32, #tpu.memory_space<vmem>>, vector<8x8x384xf32>,
    %c0_89 = arith.constant 0 : index
    %c0_90 = arith.constant 0 : index
    %303 = vector.load %arg7[%c0_89, %c0_90] : memref<128x384xf32, #tpu.memory_space<vmem>>, vector<128x384xf32>
    %c0_91 = arith.constant 0 : index
    %c0_92 = arith.constant 0 : index
    %304 = vector.load %arg9[%c0_91, %c0_92] : memref<1x128xf32, #tpu.memory_space<vmem>>, vector<1x128xf32>
    %305 = vector.shape_cast %304 : vector<1x128xf32> to vector<1x128xf32>
    %306 = vector.broadcast %305 : vector<1x128xf32> to vector<8x128xf32>
    %cst_93 = arith.constant 0.000000e+00 : f32
    %307 = vector.broadcast %cst_93 : f32 to vector<8x128xf32>
    %c0_i32_94 = arith.constant 0 : i32
    %308 = arith.index_cast %c0_i32_94 : i32 to index
    %c0_95 = arith.constant 0 : index
    %c0_96 = arith.constant 0 : index
    %309 = vector.load %arg12[%308, %c0_95, %c0_96] : memref<8x8x384xf32, #tpu.memory_space<vmem>>, vector<1x8x384xf32>
    %310 = vector.shape_cast %309 : vector<1x8x384xf32> to vector<8x384xf32>
    %cst_97 = arith.constant dense<0.000000e+00> : vector<8x384xf32>
    %311 = tpu.matmul %307, %303, %cst_97 {dimension_numbers = #tpu.dot_dimension_numbers<[1], [0], [0], [1], [0, 0, 1, 1], [], []>} : vector<8x128xf32>, vector<128x384xf32>, vector<8x384xf32> -> vector<8x384xf32>
    %312 = vector.extract_strided_slice %310 {offsets = [0, 0], sizes = [8, 128], strides = [1, 1]} : vector<8x384xf32> to vector<8x128xf32>
    %313 = vector.extract_strided_slice %311 {offsets = [0, 0], sizes = [8, 128], strides = [1, 1]} : vector<8x384xf32> to vector<8x128xf32>
    %314 = arith.addf %312, %313 : vector<8x128xf32>
    %315 = arith.negf %314 : vector<8x128xf32>
    %316 = math.exp %315 : vector<8x128xf32>
    %cst_98 = arith.constant 1.000000e+00 : f32
    %317 = vector.broadcast %cst_98 : f32 to vector<8x128xf32>
    %318 = arith.addf %317, %316 : vector<8x128xf32>
    %319 = arith.divf %317, %318 : vector<8x128xf32>
    %320 = vector.extract_strided_slice %310 {offsets = [0, 128], sizes = [8, 128], strides = [1, 1]} : vector<8x384xf32> to vector<8x128xf32>
    %321 = vector.extract_strided_slice %311 {offsets = [0, 128], sizes = [8, 128], strides = [1, 1]} : vector<8x384xf32> to vector<8x128xf32>
    %322 = arith.addf %320, %321 : vector<8x128xf32>
    %323 = arith.negf %322 : vector<8x128xf32>
    %324 = math.exp %323 : vector<8x128xf32>
    %cst_99 = arith.constant 1.000000e+00 : f32
    %325 = vector.broadcast %cst_99 : f32 to vector<8x128xf32>
    %326 = arith.addf %325, %324 : vector<8x128xf32>
    %327 = arith.divf %325, %326 : vector<8x128xf32>
    %328 = vector.extract_strided_slice %310 {offsets = [0, 256], sizes = [8, 128], strides = [1, 1]} : vector<8x384xf32> to vector<8x128xf32>
    %329 = vector.extract_strided_slice %311 {offsets = [0, 256], sizes = [8, 128], strides = [1, 1]} : vector<8x384xf32> to vector<8x128xf32>
    %330 = arith.addf %329, %306 : vector<8x128xf32>
    %331 = arith.mulf %319, %330 : vector<8x128xf32>
    %332 = arith.addf %328, %331 : vector<8x128xf32>
    %333 = math.tanh %332 : vector<8x128xf32>
    %cst_100 = arith.constant 1.000000e+00 : f32
    %334 = vector.broadcast %cst_100 : f32 to vector<8x128xf32>
    %335 = arith.subf %334, %327 : vector<8x128xf32>
    %336 = arith.mulf %335, %333 : vector<8x128xf32>
    %337 = arith.mulf %327, %307 : vector<8x128xf32>
    %338 = arith.addf %336, %337 : vector<8x128xf32>
    %339 = arith.index_cast %c0_i32_94 : i32 to index
    %c0_101 = arith.constant 0 : index
    %c0_102 = arith.constant 0 : index
    %340 = vector.load %arg11[%339, %c0_101, %c0_102] : memref<8x8x128xf32, #tpu.memory_space<vmem>>, vector<1x8x128xf32>
    %341 = vector.shape_cast %340 : vector<1x8x128xf32> to vector<8x128xf32>
    %342 = arith.addf %338, %341 : vector<8x128xf32>
    %343 = arith.index_cast %c0_i32_94 : i32 to index
    %c0_103 = arith.constant 0 : index
    %c0_104 = arith.constant 0 : index
    %344 = vector.load %arg10[%343, %c0_103, %c0_104] : memref<8x8x128xf32, #tpu.memory_space<vmem>>, vector<1x8x128xf32>
    %345 = vector.shape_cast %344 : vector<1x8x128xf32> to vector<8x128xf32>
    %346 = vector.shape_cast %342 : vector<8x128xf32> to vector<1x8x128xf32>
    tpu.vector_store %arg10[%343, %c0_103, %c0_104], %346 {strides = array<i32>} : memref<8x8x128xf32, #tpu.memory_space<vmem>>, vector<1x8x128xf32>,
    %c1_i32_105 = arith.constant 1 : i32
    %347 = arith.index_cast %c1_i32_105 : i32 to index
    %c0_106 = arith.constant 0 : index
    %c0_107 = arith.constant 0 : index
    %348 = vector.load %arg12[%347, %c0_106, %c0_107] : memref<8x8x384xf32, #tpu.memory_space<vmem>>, vector<1x8x384xf32>
    %349 = vector.shape_cast %348 : vector<1x8x384xf32> to vector<8x384xf32>
    %cst_108 = arith.constant dense<0.000000e+00> : vector<8x384xf32>
    %350 = tpu.matmul %338, %303, %cst_108 {dimension_numbers = #tpu.dot_dimension_numbers<[1], [0], [0], [1], [0, 0, 1, 1], [], []>} : vector<8x128xf32>, vector<128x384xf32>, vector<8x384xf32> -> vector<8x384xf32>
    %351 = vector.extract_strided_slice %349 {offsets = [0, 0], sizes = [8, 128], strides = [1, 1]} : vector<8x384xf32> to vector<8x128xf32>
    %352 = vector.extract_strided_slice %350 {offsets = [0, 0], sizes = [8, 128], strides = [1, 1]} : vector<8x384xf32> to vector<8x128xf32>
    %353 = arith.addf %351, %352 : vector<8x128xf32>
    %354 = arith.negf %353 : vector<8x128xf32>
    %355 = math.exp %354 : vector<8x128xf32>
    %cst_109 = arith.constant 1.000000e+00 : f32
    %356 = vector.broadcast %cst_109 : f32 to vector<8x128xf32>
    %357 = arith.addf %356, %355 : vector<8x128xf32>
    %358 = arith.divf %356, %357 : vector<8x128xf32>
    %359 = vector.extract_strided_slice %349 {offsets = [0, 128], sizes = [8, 128], strides = [1, 1]} : vector<8x384xf32> to vector<8x128xf32>
    %360 = vector.extract_strided_slice %350 {offsets = [0, 128], sizes = [8, 128], strides = [1, 1]} : vector<8x384xf32> to vector<8x128xf32>
    %361 = arith.addf %359, %360 : vector<8x128xf32>
    %362 = arith.negf %361 : vector<8x128xf32>
    %363 = math.exp %362 : vector<8x128xf32>
    %cst_110 = arith.constant 1.000000e+00 : f32
    %364 = vector.broadcast %cst_110 : f32 to vector<8x128xf32>
    %365 = arith.addf %364, %363 : vector<8x128xf32>
    %366 = arith.divf %364, %365 : vector<8x128xf32>
    %367 = vector.extract_strided_slice %349 {offsets = [0, 256], sizes = [8, 128], strides = [1, 1]} : vector<8x384xf32> to vector<8x128xf32>
    %368 = vector.extract_strided_slice %350 {offsets = [0, 256], sizes = [8, 128], strides = [1, 1]} : vector<8x384xf32> to vector<8x128xf32>
    %369 = arith.addf %368, %306 : vector<8x128xf32>
    %370 = arith.mulf %358, %369 : vector<8x128xf32>
    %371 = arith.addf %367, %370 : vector<8x128xf32>
    %372 = math.tanh %371 : vector<8x128xf32>
    %cst_111 = arith.constant 1.000000e+00 : f32
    %373 = vector.broadcast %cst_111 : f32 to vector<8x128xf32>
    %374 = arith.subf %373, %366 : vector<8x128xf32>
    %375 = arith.mulf %374, %372 : vector<8x128xf32>
    %376 = arith.mulf %366, %338 : vector<8x128xf32>
    %377 = arith.addf %375, %376 : vector<8x128xf32>
    %378 = arith.index_cast %c1_i32_105 : i32 to index
    %c0_112 = arith.constant 0 : index
    %c0_113 = arith.constant 0 : index
    %379 = vector.load %arg11[%378, %c0_112, %c0_113] : memref<8x8x128xf32, #tpu.memory_space<vmem>>, vector<1x8x128xf32>
    %380 = vector.shape_cast %379 : vector<1x8x128xf32> to vector<8x128xf32>
    %381 = arith.addf %377, %380 : vector<8x128xf32>
    %382 = arith.index_cast %c1_i32_105 : i32 to index
    %c0_114 = arith.constant 0 : index
    %c0_115 = arith.constant 0 : index
    %383 = vector.load %arg10[%382, %c0_114, %c0_115] : memref<8x8x128xf32, #tpu.memory_space<vmem>>, vector<1x8x128xf32>
    %384 = vector.shape_cast %383 : vector<1x8x128xf32> to vector<8x128xf32>
    %385 = vector.shape_cast %381 : vector<8x128xf32> to vector<1x8x128xf32>
    tpu.vector_store %arg10[%382, %c0_114, %c0_115], %385 {strides = array<i32>} : memref<8x8x128xf32, #tpu.memory_space<vmem>>, vector<1x8x128xf32>,
    %c2_i32_116 = arith.constant 2 : i32
    %386 = arith.index_cast %c2_i32_116 : i32 to index
    %c0_117 = arith.constant 0 : index
    %c0_118 = arith.constant 0 : index
    %387 = vector.load %arg12[%386, %c0_117, %c0_118] : memref<8x8x384xf32, #tpu.memory_space<vmem>>, vector<1x8x384xf32>
    %388 = vector.shape_cast %387 : vector<1x8x384xf32> to vector<8x384xf32>
    %cst_119 = arith.constant dense<0.000000e+00> : vector<8x384xf32>
    %389 = tpu.matmul %377, %303, %cst_119 {dimension_numbers = #tpu.dot_dimension_numbers<[1], [0], [0], [1], [0, 0, 1, 1], [], []>} : vector<8x128xf32>, vector<128x384xf32>, vector<8x384xf32> -> vector<8x384xf32>
    %390 = vector.extract_strided_slice %388 {offsets = [0, 0], sizes = [8, 128], strides = [1, 1]} : vector<8x384xf32> to vector<8x128xf32>
    %391 = vector.extract_strided_slice %389 {offsets = [0, 0], sizes = [8, 128], strides = [1, 1]} : vector<8x384xf32> to vector<8x128xf32>
    %392 = arith.addf %390, %391 : vector<8x128xf32>
    %393 = arith.negf %392 : vector<8x128xf32>
    %394 = math.exp %393 : vector<8x128xf32>
    %cst_120 = arith.constant 1.000000e+00 : f32
    %395 = vector.broadcast %cst_120 : f32 to vector<8x128xf32>
    %396 = arith.addf %395, %394 : vector<8x128xf32>
    %397 = arith.divf %395, %396 : vector<8x128xf32>
    %398 = vector.extract_strided_slice %388 {offsets = [0, 128], sizes = [8, 128], strides = [1, 1]} : vector<8x384xf32> to vector<8x128xf32>
    %399 = vector.extract_strided_slice %389 {offsets = [0, 128], sizes = [8, 128], strides = [1, 1]} : vector<8x384xf32> to vector<8x128xf32>
    %400 = arith.addf %398, %399 : vector<8x128xf32>
    %401 = arith.negf %400 : vector<8x128xf32>
    %402 = math.exp %401 : vector<8x128xf32>
    %cst_121 = arith.constant 1.000000e+00 : f32
    %403 = vector.broadcast %cst_121 : f32 to vector<8x128xf32>
    %404 = arith.addf %403, %402 : vector<8x128xf32>
    %405 = arith.divf %403, %404 : vector<8x128xf32>
    %406 = vector.extract_strided_slice %388 {offsets = [0, 256], sizes = [8, 128], strides = [1, 1]} : vector<8x384xf32> to vector<8x128xf32>
    %407 = vector.extract_strided_slice %389 {offsets = [0, 256], sizes = [8, 128], strides = [1, 1]} : vector<8x384xf32> to vector<8x128xf32>
    %408 = arith.addf %407, %306 : vector<8x128xf32>
    %409 = arith.mulf %397, %408 : vector<8x128xf32>
    %410 = arith.addf %406, %409 : vector<8x128xf32>
    %411 = math.tanh %410 : vector<8x128xf32>
    %cst_122 = arith.constant 1.000000e+00 : f32
    %412 = vector.broadcast %cst_122 : f32 to vector<8x128xf32>
    %413 = arith.subf %412, %405 : vector<8x128xf32>
    %414 = arith.mulf %413, %411 : vector<8x128xf32>
    %415 = arith.mulf %405, %377 : vector<8x128xf32>
    %416 = arith.addf %414, %415 : vector<8x128xf32>
    %417 = arith.index_cast %c2_i32_116 : i32 to index
    %c0_123 = arith.constant 0 : index
    %c0_124 = arith.constant 0 : index
    %418 = vector.load %arg11[%417, %c0_123, %c0_124] : memref<8x8x128xf32, #tpu.memory_space<vmem>>, vector<1x8x128xf32>
    %419 = vector.shape_cast %418 : vector<1x8x128xf32> to vector<8x128xf32>
    %420 = arith.addf %416, %419 : vector<8x128xf32>
    %421 = arith.index_cast %c2_i32_116 : i32 to index
    %c0_125 = arith.constant 0 : index
    %c0_126 = arith.constant 0 : index
    %422 = vector.load %arg10[%421, %c0_125, %c0_126] : memref<8x8x128xf32, #tpu.memory_space<vmem>>, vector<1x8x128xf32>
    %423 = vector.shape_cast %422 : vector<1x8x128xf32> to vector<8x128xf32>
    %424 = vector.shape_cast %420 : vector<8x128xf32> to vector<1x8x128xf32>
    tpu.vector_store %arg10[%421, %c0_125, %c0_126], %424 {strides = array<i32>} : memref<8x8x128xf32, #tpu.memory_space<vmem>>, vector<1x8x128xf32>,
    %c3_i32_127 = arith.constant 3 : i32
    %425 = arith.index_cast %c3_i32_127 : i32 to index
    %c0_128 = arith.constant 0 : index
    %c0_129 = arith.constant 0 : index
    %426 = vector.load %arg12[%425, %c0_128, %c0_129] : memref<8x8x384xf32, #tpu.memory_space<vmem>>, vector<1x8x384xf32>
    %427 = vector.shape_cast %426 : vector<1x8x384xf32> to vector<8x384xf32>
    %cst_130 = arith.constant dense<0.000000e+00> : vector<8x384xf32>
    %428 = tpu.matmul %416, %303, %cst_130 {dimension_numbers = #tpu.dot_dimension_numbers<[1], [0], [0], [1], [0, 0, 1, 1], [], []>} : vector<8x128xf32>, vector<128x384xf32>, vector<8x384xf32> -> vector<8x384xf32>
    %429 = vector.extract_strided_slice %427 {offsets = [0, 0], sizes = [8, 128], strides = [1, 1]} : vector<8x384xf32> to vector<8x128xf32>
    %430 = vector.extract_strided_slice %428 {offsets = [0, 0], sizes = [8, 128], strides = [1, 1]} : vector<8x384xf32> to vector<8x128xf32>
    %431 = arith.addf %429, %430 : vector<8x128xf32>
    %432 = arith.negf %431 : vector<8x128xf32>
    %433 = math.exp %432 : vector<8x128xf32>
    %cst_131 = arith.constant 1.000000e+00 : f32
    %434 = vector.broadcast %cst_131 : f32 to vector<8x128xf32>
    %435 = arith.addf %434, %433 : vector<8x128xf32>
    %436 = arith.divf %434, %435 : vector<8x128xf32>
    %437 = vector.extract_strided_slice %427 {offsets = [0, 128], sizes = [8, 128], strides = [1, 1]} : vector<8x384xf32> to vector<8x128xf32>
    %438 = vector.extract_strided_slice %428 {offsets = [0, 128], sizes = [8, 128], strides = [1, 1]} : vector<8x384xf32> to vector<8x128xf32>
    %439 = arith.addf %437, %438 : vector<8x128xf32>
    %440 = arith.negf %439 : vector<8x128xf32>
    %441 = math.exp %440 : vector<8x128xf32>
    %cst_132 = arith.constant 1.000000e+00 : f32
    %442 = vector.broadcast %cst_132 : f32 to vector<8x128xf32>
    %443 = arith.addf %442, %441 : vector<8x128xf32>
    %444 = arith.divf %442, %443 : vector<8x128xf32>
    %445 = vector.extract_strided_slice %427 {offsets = [0, 256], sizes = [8, 128], strides = [1, 1]} : vector<8x384xf32> to vector<8x128xf32>
    %446 = vector.extract_strided_slice %428 {offsets = [0, 256], sizes = [8, 128], strides = [1, 1]} : vector<8x384xf32> to vector<8x128xf32>
    %447 = arith.addf %446, %306 : vector<8x128xf32>
    %448 = arith.mulf %436, %447 : vector<8x128xf32>
    %449 = arith.addf %445, %448 : vector<8x128xf32>
    %450 = math.tanh %449 : vector<8x128xf32>
    %cst_133 = arith.constant 1.000000e+00 : f32
    %451 = vector.broadcast %cst_133 : f32 to vector<8x128xf32>
    %452 = arith.subf %451, %444 : vector<8x128xf32>
    %453 = arith.mulf %452, %450 : vector<8x128xf32>
    %454 = arith.mulf %444, %416 : vector<8x128xf32>
    %455 = arith.addf %453, %454 : vector<8x128xf32>
    %456 = arith.index_cast %c3_i32_127 : i32 to index
    %c0_134 = arith.constant 0 : index
    %c0_135 = arith.constant 0 : index
    %457 = vector.load %arg11[%456, %c0_134, %c0_135] : memref<8x8x128xf32, #tpu.memory_space<vmem>>, vector<1x8x128xf32>
    %458 = vector.shape_cast %457 : vector<1x8x128xf32> to vector<8x128xf32>
    %459 = arith.addf %455, %458 : vector<8x128xf32>
    %460 = arith.index_cast %c3_i32_127 : i32 to index
    %c0_136 = arith.constant 0 : index
    %c0_137 = arith.constant 0 : index
    %461 = vector.load %arg10[%460, %c0_136, %c0_137] : memref<8x8x128xf32, #tpu.memory_space<vmem>>, vector<1x8x128xf32>
    %462 = vector.shape_cast %461 : vector<1x8x128xf32> to vector<8x128xf32>
    %463 = vector.shape_cast %459 : vector<8x128xf32> to vector<1x8x128xf32>
    tpu.vector_store %arg10[%460, %c0_136, %c0_137], %463 {strides = array<i32>} : memref<8x8x128xf32, #tpu.memory_space<vmem>>, vector<1x8x128xf32>,
    %c4_i32_138 = arith.constant 4 : i32
    %464 = arith.index_cast %c4_i32_138 : i32 to index
    %c0_139 = arith.constant 0 : index
    %c0_140 = arith.constant 0 : index
    %465 = vector.load %arg12[%464, %c0_139, %c0_140] : memref<8x8x384xf32, #tpu.memory_space<vmem>>, vector<1x8x384xf32>
    %466 = vector.shape_cast %465 : vector<1x8x384xf32> to vector<8x384xf32>
    %cst_141 = arith.constant dense<0.000000e+00> : vector<8x384xf32>
    %467 = tpu.matmul %455, %303, %cst_141 {dimension_numbers = #tpu.dot_dimension_numbers<[1], [0], [0], [1], [0, 0, 1, 1], [], []>} : vector<8x128xf32>, vector<128x384xf32>, vector<8x384xf32> -> vector<8x384xf32>
    %468 = vector.extract_strided_slice %466 {offsets = [0, 0], sizes = [8, 128], strides = [1, 1]} : vector<8x384xf32> to vector<8x128xf32>
    %469 = vector.extract_strided_slice %467 {offsets = [0, 0], sizes = [8, 128], strides = [1, 1]} : vector<8x384xf32> to vector<8x128xf32>
    %470 = arith.addf %468, %469 : vector<8x128xf32>
    %471 = arith.negf %470 : vector<8x128xf32>
    %472 = math.exp %471 : vector<8x128xf32>
    %cst_142 = arith.constant 1.000000e+00 : f32
    %473 = vector.broadcast %cst_142 : f32 to vector<8x128xf32>
    %474 = arith.addf %473, %472 : vector<8x128xf32>
    %475 = arith.divf %473, %474 : vector<8x128xf32>
    %476 = vector.extract_strided_slice %466 {offsets = [0, 128], sizes = [8, 128], strides = [1, 1]} : vector<8x384xf32> to vector<8x128xf32>
    %477 = vector.extract_strided_slice %467 {offsets = [0, 128], sizes = [8, 128], strides = [1, 1]} : vector<8x384xf32> to vector<8x128xf32>
    %478 = arith.addf %476, %477 : vector<8x128xf32>
    %479 = arith.negf %478 : vector<8x128xf32>
    %480 = math.exp %479 : vector<8x128xf32>
    %cst_143 = arith.constant 1.000000e+00 : f32
    %481 = vector.broadcast %cst_143 : f32 to vector<8x128xf32>
    %482 = arith.addf %481, %480 : vector<8x128xf32>
    %483 = arith.divf %481, %482 : vector<8x128xf32>
    %484 = vector.extract_strided_slice %466 {offsets = [0, 256], sizes = [8, 128], strides = [1, 1]} : vector<8x384xf32> to vector<8x128xf32>
    %485 = vector.extract_strided_slice %467 {offsets = [0, 256], sizes = [8, 128], strides = [1, 1]} : vector<8x384xf32> to vector<8x128xf32>
    %486 = arith.addf %485, %306 : vector<8x128xf32>
    %487 = arith.mulf %475, %486 : vector<8x128xf32>
    %488 = arith.addf %484, %487 : vector<8x128xf32>
    %489 = math.tanh %488 : vector<8x128xf32>
    %cst_144 = arith.constant 1.000000e+00 : f32
    %490 = vector.broadcast %cst_144 : f32 to vector<8x128xf32>
    %491 = arith.subf %490, %483 : vector<8x128xf32>
    %492 = arith.mulf %491, %489 : vector<8x128xf32>
    %493 = arith.mulf %483, %455 : vector<8x128xf32>
    %494 = arith.addf %492, %493 : vector<8x128xf32>
    %495 = arith.index_cast %c4_i32_138 : i32 to index
    %c0_145 = arith.constant 0 : index
    %c0_146 = arith.constant 0 : index
    %496 = vector.load %arg11[%495, %c0_145, %c0_146] : memref<8x8x128xf32, #tpu.memory_space<vmem>>, vector<1x8x128xf32>
    %497 = vector.shape_cast %496 : vector<1x8x128xf32> to vector<8x128xf32>
    %498 = arith.addf %494, %497 : vector<8x128xf32>
    %499 = arith.index_cast %c4_i32_138 : i32 to index
    %c0_147 = arith.constant 0 : index
    %c0_148 = arith.constant 0 : index
    %500 = vector.load %arg10[%499, %c0_147, %c0_148] : memref<8x8x128xf32, #tpu.memory_space<vmem>>, vector<1x8x128xf32>
    %501 = vector.shape_cast %500 : vector<1x8x128xf32> to vector<8x128xf32>
    %502 = vector.shape_cast %498 : vector<8x128xf32> to vector<1x8x128xf32>
    tpu.vector_store %arg10[%499, %c0_147, %c0_148], %502 {strides = array<i32>} : memref<8x8x128xf32, #tpu.memory_space<vmem>>, vector<1x8x128xf32>,
    %c5_i32_149 = arith.constant 5 : i32
    %503 = arith.index_cast %c5_i32_149 : i32 to index
    %c0_150 = arith.constant 0 : index
    %c0_151 = arith.constant 0 : index
    %504 = vector.load %arg12[%503, %c0_150, %c0_151] : memref<8x8x384xf32, #tpu.memory_space<vmem>>, vector<1x8x384xf32>
    %505 = vector.shape_cast %504 : vector<1x8x384xf32> to vector<8x384xf32>
    %cst_152 = arith.constant dense<0.000000e+00> : vector<8x384xf32>
    %506 = tpu.matmul %494, %303, %cst_152 {dimension_numbers = #tpu.dot_dimension_numbers<[1], [0], [0], [1], [0, 0, 1, 1], [], []>} : vector<8x128xf32>, vector<128x384xf32>, vector<8x384xf32> -> vector<8x384xf32>
    %507 = vector.extract_strided_slice %505 {offsets = [0, 0], sizes = [8, 128], strides = [1, 1]} : vector<8x384xf32> to vector<8x128xf32>
    %508 = vector.extract_strided_slice %506 {offsets = [0, 0], sizes = [8, 128], strides = [1, 1]} : vector<8x384xf32> to vector<8x128xf32>
    %509 = arith.addf %507, %508 : vector<8x128xf32>
    %510 = arith.negf %509 : vector<8x128xf32>
    %511 = math.exp %510 : vector<8x128xf32>
    %cst_153 = arith.constant 1.000000e+00 : f32
    %512 = vector.broadcast %cst_153 : f32 to vector<8x128xf32>
    %513 = arith.addf %512, %511 : vector<8x128xf32>
    %514 = arith.divf %512, %513 : vector<8x128xf32>
    %515 = vector.extract_strided_slice %505 {offsets = [0, 128], sizes = [8, 128], strides = [1, 1]} : vector<8x384xf32> to vector<8x128xf32>
    %516 = vector.extract_strided_slice %506 {offsets = [0, 128], sizes = [8, 128], strides = [1, 1]} : vector<8x384xf32> to vector<8x128xf32>
    %517 = arith.addf %515, %516 : vector<8x128xf32>
    %518 = arith.negf %517 : vector<8x128xf32>
    %519 = math.exp %518 : vector<8x128xf32>
    %cst_154 = arith.constant 1.000000e+00 : f32
    %520 = vector.broadcast %cst_154 : f32 to vector<8x128xf32>
    %521 = arith.addf %520, %519 : vector<8x128xf32>
    %522 = arith.divf %520, %521 : vector<8x128xf32>
    %523 = vector.extract_strided_slice %505 {offsets = [0, 256], sizes = [8, 128], strides = [1, 1]} : vector<8x384xf32> to vector<8x128xf32>
    %524 = vector.extract_strided_slice %506 {offsets = [0, 256], sizes = [8, 128], strides = [1, 1]} : vector<8x384xf32> to vector<8x128xf32>
    %525 = arith.addf %524, %306 : vector<8x128xf32>
    %526 = arith.mulf %514, %525 : vector<8x128xf32>
    %527 = arith.addf %523, %526 : vector<8x128xf32>
    %528 = math.tanh %527 : vector<8x128xf32>
    %cst_155 = arith.constant 1.000000e+00 : f32
    %529 = vector.broadcast %cst_155 : f32 to vector<8x128xf32>
    %530 = arith.subf %529, %522 : vector<8x128xf32>
    %531 = arith.mulf %530, %528 : vector<8x128xf32>
    %532 = arith.mulf %522, %494 : vector<8x128xf32>
    %533 = arith.addf %531, %532 : vector<8x128xf32>
    %534 = arith.index_cast %c5_i32_149 : i32 to index
    %c0_156 = arith.constant 0 : index
    %c0_157 = arith.constant 0 : index
    %535 = vector.load %arg11[%534, %c0_156, %c0_157] : memref<8x8x128xf32, #tpu.memory_space<vmem>>, vector<1x8x128xf32>
    %536 = vector.shape_cast %535 : vector<1x8x128xf32> to vector<8x128xf32>
    %537 = arith.addf %533, %536 : vector<8x128xf32>
    %538 = arith.index_cast %c5_i32_149 : i32 to index
    %c0_158 = arith.constant 0 : index
    %c0_159 = arith.constant 0 : index
    %539 = vector.load %arg10[%538, %c0_158, %c0_159] : memref<8x8x128xf32, #tpu.memory_space<vmem>>, vector<1x8x128xf32>
    %540 = vector.shape_cast %539 : vector<1x8x128xf32> to vector<8x128xf32>
    %541 = vector.shape_cast %537 : vector<8x128xf32> to vector<1x8x128xf32>
    tpu.vector_store %arg10[%538, %c0_158, %c0_159], %541 {strides = array<i32>} : memref<8x8x128xf32, #tpu.memory_space<vmem>>, vector<1x8x128xf32>,
    %c6_i32_160 = arith.constant 6 : i32
    %542 = arith.index_cast %c6_i32_160 : i32 to index
    %c0_161 = arith.constant 0 : index
    %c0_162 = arith.constant 0 : index
    %543 = vector.load %arg12[%542, %c0_161, %c0_162] : memref<8x8x384xf32, #tpu.memory_space<vmem>>, vector<1x8x384xf32>
    %544 = vector.shape_cast %543 : vector<1x8x384xf32> to vector<8x384xf32>
    %cst_163 = arith.constant dense<0.000000e+00> : vector<8x384xf32>
    %545 = tpu.matmul %533, %303, %cst_163 {dimension_numbers = #tpu.dot_dimension_numbers<[1], [0], [0], [1], [0, 0, 1, 1], [], []>} : vector<8x128xf32>, vector<128x384xf32>, vector<8x384xf32> -> vector<8x384xf32>
    %546 = vector.extract_strided_slice %544 {offsets = [0, 0], sizes = [8, 128], strides = [1, 1]} : vector<8x384xf32> to vector<8x128xf32>
    %547 = vector.extract_strided_slice %545 {offsets = [0, 0], sizes = [8, 128], strides = [1, 1]} : vector<8x384xf32> to vector<8x128xf32>
    %548 = arith.addf %546, %547 : vector<8x128xf32>
    %549 = arith.negf %548 : vector<8x128xf32>
    %550 = math.exp %549 : vector<8x128xf32>
    %cst_164 = arith.constant 1.000000e+00 : f32
    %551 = vector.broadcast %cst_164 : f32 to vector<8x128xf32>
    %552 = arith.addf %551, %550 : vector<8x128xf32>
    %553 = arith.divf %551, %552 : vector<8x128xf32>
    %554 = vector.extract_strided_slice %544 {offsets = [0, 128], sizes = [8, 128], strides = [1, 1]} : vector<8x384xf32> to vector<8x128xf32>
    %555 = vector.extract_strided_slice %545 {offsets = [0, 128], sizes = [8, 128], strides = [1, 1]} : vector<8x384xf32> to vector<8x128xf32>
    %556 = arith.addf %554, %555 : vector<8x128xf32>
    %557 = arith.negf %556 : vector<8x128xf32>
    %558 = math.exp %557 : vector<8x128xf32>
    %cst_165 = arith.constant 1.000000e+00 : f32
    %559 = vector.broadcast %cst_165 : f32 to vector<8x128xf32>
    %560 = arith.addf %559, %558 : vector<8x128xf32>
    %561 = arith.divf %559, %560 : vector<8x128xf32>
    %562 = vector.extract_strided_slice %544 {offsets = [0, 256], sizes = [8, 128], strides = [1, 1]} : vector<8x384xf32> to vector<8x128xf32>
    %563 = vector.extract_strided_slice %545 {offsets = [0, 256], sizes = [8, 128], strides = [1, 1]} : vector<8x384xf32> to vector<8x128xf32>
    %564 = arith.addf %563, %306 : vector<8x128xf32>
    %565 = arith.mulf %553, %564 : vector<8x128xf32>
    %566 = arith.addf %562, %565 : vector<8x128xf32>
    %567 = math.tanh %566 : vector<8x128xf32>
    %cst_166 = arith.constant 1.000000e+00 : f32
    %568 = vector.broadcast %cst_166 : f32 to vector<8x128xf32>
    %569 = arith.subf %568, %561 : vector<8x128xf32>
    %570 = arith.mulf %569, %567 : vector<8x128xf32>
    %571 = arith.mulf %561, %533 : vector<8x128xf32>
    %572 = arith.addf %570, %571 : vector<8x128xf32>
    %573 = arith.index_cast %c6_i32_160 : i32 to index
    %c0_167 = arith.constant 0 : index
    %c0_168 = arith.constant 0 : index
    %574 = vector.load %arg11[%573, %c0_167, %c0_168] : memref<8x8x128xf32, #tpu.memory_space<vmem>>, vector<1x8x128xf32>
    %575 = vector.shape_cast %574 : vector<1x8x128xf32> to vector<8x128xf32>
    %576 = arith.addf %572, %575 : vector<8x128xf32>
    %577 = arith.index_cast %c6_i32_160 : i32 to index
    %c0_169 = arith.constant 0 : index
    %c0_170 = arith.constant 0 : index
    %578 = vector.load %arg10[%577, %c0_169, %c0_170] : memref<8x8x128xf32, #tpu.memory_space<vmem>>, vector<1x8x128xf32>
    %579 = vector.shape_cast %578 : vector<1x8x128xf32> to vector<8x128xf32>
    %580 = vector.shape_cast %576 : vector<8x128xf32> to vector<1x8x128xf32>
    tpu.vector_store %arg10[%577, %c0_169, %c0_170], %580 {strides = array<i32>} : memref<8x8x128xf32, #tpu.memory_space<vmem>>, vector<1x8x128xf32>,
    %c7_i32_171 = arith.constant 7 : i32
    %581 = arith.index_cast %c7_i32_171 : i32 to index
    %c0_172 = arith.constant 0 : index
    %c0_173 = arith.constant 0 : index
    %582 = vector.load %arg12[%581, %c0_172, %c0_173] : memref<8x8x384xf32, #tpu.memory_space<vmem>>, vector<1x8x384xf32>
    %583 = vector.shape_cast %582 : vector<1x8x384xf32> to vector<8x384xf32>
    %cst_174 = arith.constant dense<0.000000e+00> : vector<8x384xf32>
    %584 = tpu.matmul %572, %303, %cst_174 {dimension_numbers = #tpu.dot_dimension_numbers<[1], [0], [0], [1], [0, 0, 1, 1], [], []>} : vector<8x128xf32>, vector<128x384xf32>, vector<8x384xf32> -> vector<8x384xf32>
    %585 = vector.extract_strided_slice %583 {offsets = [0, 0], sizes = [8, 128], strides = [1, 1]} : vector<8x384xf32> to vector<8x128xf32>
    %586 = vector.extract_strided_slice %584 {offsets = [0, 0], sizes = [8, 128], strides = [1, 1]} : vector<8x384xf32> to vector<8x128xf32>
    %587 = arith.addf %585, %586 : vector<8x128xf32>
    %588 = arith.negf %587 : vector<8x128xf32>
    %589 = math.exp %588 : vector<8x128xf32>
    %cst_175 = arith.constant 1.000000e+00 : f32
    %590 = vector.broadcast %cst_175 : f32 to vector<8x128xf32>
    %591 = arith.addf %590, %589 : vector<8x128xf32>
    %592 = arith.divf %590, %591 : vector<8x128xf32>
    %593 = vector.extract_strided_slice %583 {offsets = [0, 128], sizes = [8, 128], strides = [1, 1]} : vector<8x384xf32> to vector<8x128xf32>
    %594 = vector.extract_strided_slice %584 {offsets = [0, 128], sizes = [8, 128], strides = [1, 1]} : vector<8x384xf32> to vector<8x128xf32>
    %595 = arith.addf %593, %594 : vector<8x128xf32>
    %596 = arith.negf %595 : vector<8x128xf32>
    %597 = math.exp %596 : vector<8x128xf32>
    %cst_176 = arith.constant 1.000000e+00 : f32
    %598 = vector.broadcast %cst_176 : f32 to vector<8x128xf32>
    %599 = arith.addf %598, %597 : vector<8x128xf32>
    %600 = arith.divf %598, %599 : vector<8x128xf32>
    %601 = vector.extract_strided_slice %583 {offsets = [0, 256], sizes = [8, 128], strides = [1, 1]} : vector<8x384xf32> to vector<8x128xf32>
    %602 = vector.extract_strided_slice %584 {offsets = [0, 256], sizes = [8, 128], strides = [1, 1]} : vector<8x384xf32> to vector<8x128xf32>
    %603 = arith.addf %602, %306 : vector<8x128xf32>
    %604 = arith.mulf %592, %603 : vector<8x128xf32>
    %605 = arith.addf %601, %604 : vector<8x128xf32>
    %606 = math.tanh %605 : vector<8x128xf32>
    %cst_177 = arith.constant 1.000000e+00 : f32
    %607 = vector.broadcast %cst_177 : f32 to vector<8x128xf32>
    %608 = arith.subf %607, %600 : vector<8x128xf32>
    %609 = arith.mulf %608, %606 : vector<8x128xf32>
    %610 = arith.mulf %600, %572 : vector<8x128xf32>
    %611 = arith.addf %609, %610 : vector<8x128xf32>
    %612 = arith.index_cast %c7_i32_171 : i32 to index
    %c0_178 = arith.constant 0 : index
    %c0_179 = arith.constant 0 : index
    %613 = vector.load %arg11[%612, %c0_178, %c0_179] : memref<8x8x128xf32, #tpu.memory_space<vmem>>, vector<1x8x128xf32>
    %614 = vector.shape_cast %613 : vector<1x8x128xf32> to vector<8x128xf32>
    %615 = arith.addf %611, %614 : vector<8x128xf32>
    %616 = arith.index_cast %c7_i32_171 : i32 to index
    %c0_180 = arith.constant 0 : index
    %c0_181 = arith.constant 0 : index
    %617 = vector.load %arg10[%616, %c0_180, %c0_181] : memref<8x8x128xf32, #tpu.memory_space<vmem>>, vector<1x8x128xf32>
    %618 = vector.shape_cast %617 : vector<1x8x128xf32> to vector<8x128xf32>
    %619 = vector.shape_cast %615 : vector<8x128xf32> to vector<1x8x128xf32>
    tpu.vector_store %arg10[%616, %c0_180, %c0_181], %619 {strides = array<i32>} : memref<8x8x128xf32, #tpu.memory_space<vmem>>, vector<1x8x128xf32>,
    %c8_i32_182 = arith.constant 8 : i32
    return
  }
  func.func @transform_0(%arg0: i32) -> (i32, i32, i32) {
    %c0_i32 = arith.constant 0 : i32
    %c0_i32_0 = arith.constant 0 : i32
    %c0_i32_1 = arith.constant 0 : i32
    return %c0_i32, %arg0, %c0_i32_0 : i32, i32, i32
  }
  func.func @transform_1(%arg0: i32) -> (i32, i32) {
    %c0_i32 = arith.constant 0 : i32
    %c0_i32_0 = arith.constant 0 : i32
    %c0_i32_1 = arith.constant 0 : i32
    return %c0_i32, %c0_i32_0 : i32, i32
  }
  func.func @transform_2(%arg0: i32) -> (i32, i32) {
    %c0_i32 = arith.constant 0 : i32
    %c0_i32_0 = arith.constant 0 : i32
    %c0_i32_1 = arith.constant 0 : i32
    return %c0_i32, %c0_i32_0 : i32, i32
  }
  func.func @transform_3(%arg0: i32) -> (i32, i32) {
    %c0_i32 = arith.constant 0 : i32
    %c0_i32_0 = arith.constant 0 : i32
    %c0_i32_1 = arith.constant 0 : i32
    return %c0_i32, %c0_i32_0 : i32, i32
  }
  func.func @transform_4(%arg0: i32) -> (i32, i32) {
    %c0_i32 = arith.constant 0 : i32
    %c0_i32_0 = arith.constant 0 : i32
    %c0_i32_1 = arith.constant 0 : i32
    return %c0_i32, %c0_i32_0 : i32, i32
  }
  func.func @transform_5(%arg0: i32) -> (i32, i32) {
    %c0_i32 = arith.constant 0 : i32
    %c0_i32_0 = arith.constant 0 : i32
    %c0_i32_1 = arith.constant 0 : i32
    return %c0_i32, %c0_i32_0 : i32, i32
  }
  func.func @transform_6(%arg0: i32) -> (i32, i32) {
    %c0_i32 = arith.constant 0 : i32
    %c0_i32_0 = arith.constant 0 : i32
    %c0_i32_1 = arith.constant 0 : i32
    return %c0_i32, %c0_i32_0 : i32, i32
  }
  func.func @transform_7(%arg0: i32) -> (i32, i32) {
    %c0_i32 = arith.constant 0 : i32
    %c0_i32_0 = arith.constant 0 : i32
    %c0_i32_1 = arith.constant 0 : i32
    return %c0_i32, %c0_i32_0 : i32, i32
  }
  func.func @transform_8(%arg0: i32) -> (i32, i32) {
    %c0_i32 = arith.constant 0 : i32
    %c0_i32_0 = arith.constant 0 : i32
    %c0_i32_1 = arith.constant 0 : i32
    return %c0_i32, %c0_i32_0 : i32, i32
  }
  func.func @transform_9(%arg0: i32) -> (i32, i32, i32) {
    %c0_i32 = arith.constant 0 : i32
    %c0_i32_0 = arith.constant 0 : i32
    %c0_i32_1 = arith.constant 0 : i32
    return %c0_i32, %arg0, %c0_i32_0 : i32, i32, i32
  }
}

</mosaic_0001>

<bundles_post_ra>
// kernel: tpu_custom_call.1
= control target key start
LH: loop header
LB: loop body
LE: loop exit
PB: predicated region body
PF: predicated region fallthrough
CT: control target
= control target key end

     0   :  { %14 = vsyncpa [#allocation5], 0  ;;  %s6840_s0 = inlined_call_operand.hbm [shape: f32[8,8,16], index: 0, kind: input, shape index: {}]   ;;  %s6841_s1 = inlined_call_operand.hbm [shape: f32[16,384], index: 1, kind: input, shape index: {}]   ;;  %s6842_s2 = inlined_call_operand.hbm [shape: f32[128,384], index: 2, kind: input, shape index: {}]   ;;  %s6843_s3 = inlined_call_operand.vmem [shape: f32[1,384], index: 3, kind: input, shape index: {}]   ;;  %s6844_s4 = inlined_call_operand.vmem [shape: f32[1,128], index: 4, kind: input, shape index: {}]   ;;  %s6845_s5 = inlined_call_operand.hbm [shape: f32[128,384], index: 5, kind: input, shape index: {}]   ;;  %s6846_s6 = inlined_call_operand.hbm [shape: f32[128,384], index: 6, kind: input, shape index: {}]   ;;  %s6847_s7 = inlined_call_operand.vmem [shape: f32[1,384], index: 7, kind: input, shape index: {}]   ;;  %s6848_s8 = inlined_call_operand.vmem [shape: f32[1,128], index: 8, kind: input, shape index: {}]   ;;  %s6849_s9 = inlined_call_operand.hbm [shape: f32[8,8,128], index: 9, kind: output, shape index: {}]  }
   0x1   :  { %15 = vsyncpa [#allocation8], 0 }
   0x2   :  { %16 = vsyncpa [#allocation11], 0 }
   0x3   :  { %17 = vsyncpa [#allocation6], 0  ;;  %s4926_s30 = smov [#allocation7]  }
   0x4   :  { %s35_s10 = sshll.u32 %s4926_s30, 4  ;;  %s36_s10 = int_to_ptr.vmem [resolvable:$true] %s35_s10 }
   0x5   :  { %s4806_s11 = scalar_lea.vmem %s36_s10, 768  ;;  %p4811_p1 = scmp.lt.s32.totalorder %s36_s10, %s36_s10 }
   0x6   :  { %p4807_p0 = scmp.ne.s32.totalorder %s36_s10, %s4806_s11  ;;  %p4812_p2 = scmp.lt.s32.totalorder %s4806_s11, %s4806_s11 }
   0x8   :  { %p4813_p3 = por %p4812_p2, %p4811_p1 }
   0xa   :  { %p4814_p4 = pnand %p4813_p3, %p4807_p0 }
   0xc   :  { %4817 = shalt.err (!%p4814_p4)
}
   0xd   :  { %s4927_s12 = smov 384   ;;  %s4928_s13 = smov 24  }
   0xe   :  { %41 = dma.hbm_to_vmem [thread:$0]  %s6841_s1, 768, %s36_s10, [#allocation8], %s4927_s12, %s4927_s12, %s4928_s13  }
   0xf   :  { %s4929_s16 = smov [#allocation10]   ;;  %s4930_s18 = smov [#allocation4]  }
  0x10   :  { %s63_s17 = sshll.u32 %s4929_s16, 4  ;;  %s23_s19 = sshll.u32 %s4930_s18, 4  ;;  %s64_s17 = int_to_ptr.vmem [resolvable:$true] %s63_s17  ;;  %s24_s19 = int_to_ptr.vmem [resolvable:$true] %s23_s19 }
  0x11   :  { %s4826_s20 = scalar_lea.vmem %s64_s17, 6144  ;;  %p4831_p6 = scmp.lt.s32.totalorder %s64_s17, %s64_s17 }
  0x12   :  { %p4827_p5 = scmp.ne.s32.totalorder %s64_s17, %s4826_s20  ;;  %p4832_p7 = scmp.lt.s32.totalorder %s4826_s20, %s4826_s20 }
  0x14   :  { %p4833_p8 = por %p4832_p7, %p4831_p6 }
  0x16   :  { %p4834_p9 = pnand %p4833_p8, %p4827_p5 }
  0x18   :  { %4837 = shalt.err (!%p4834_p9)
}
  0x19   :  { %69 = dma.hbm_to_vmem [thread:$0]  %s6845_s5, 6144, %s64_s17, [#allocation11], %s4927_s12, %s4927_s12, %s4928_s13  }
  0x1a   :  { %s4846_s1 = scalar_lea.vmem %s24_s19, 1024  ;;  %p4851_p11 = scmp.lt.s32.totalorder %s24_s19, %s24_s19 }
  0x1b   :  { %p4847_p10 = scmp.ne.s32.totalorder %s24_s19, %s4846_s1  ;;  %p4852_p12 = scmp.lt.s32.totalorder %s4846_s1, %s4846_s1 }
  0x1d   :  { %p4853_p13 = por %p4852_p12, %p4851_p11 }
  0x1f   :  { %p4854_p0 = pnand %p4853_p13, %p4847_p10 }
  0x21   :  { %4857 = shalt.err (!%p4854_p0)
}
  0x22   :  { %s4931_s23 = smov 128   ;;  %s4932_s24 = smov 8  }
  0x23   :  { %29 = dma.hbm_to_vmem [thread:$0]  %s6840_s0, 1024, %s24_s19, [#allocation5], %s4931_s23, %s4931_s23, %s4932_s24  }
  0x24   :  { %s4933_s27 = smov [#allocation9]   ;;  %s4934_s5 = smov [#allocation12]  }
  0x25   :  { %s47_s28 = sshll.u32 %s4933_s27, 4  ;;  %s75_s29 = sshll.u32 %s4934_s5, 4  ;;  %s48_s28 = int_to_ptr.vmem [resolvable:$true] %s47_s28  ;;  %s76_s29 = int_to_ptr.vmem [resolvable:$true] %s75_s29 }
  0x26   :  { %s4866_s30 = scalar_lea.vmem %s48_s28, 6144  ;;  %p4871_p2 = scmp.lt.s32.totalorder %s48_s28, %s48_s28 }
  0x27   :  { %p4867_p1 = scmp.ne.s32.totalorder %s48_s28, %s4866_s30  ;;  %p4872_p3 = scmp.lt.s32.totalorder %s4866_s30, %s4866_s30 }
  0x29   :  { %p4873_p4 = por %p4872_p3, %p4871_p2 }
  0x2b   :  { %p4874_p5 = pnand %p4873_p4, %p4867_p1 }
  0x2d   :  { %4877 = shalt.err (!%p4874_p5)
}
  0x2e   :  { %53 = dma.hbm_to_vmem [thread:$0]  %s6842_s2, 6144, %s48_s28, [#allocation8], %s4927_s12, %s4927_s12, %s4928_s13  }
  0x2f   :  { %s4886_s0 = scalar_lea.vmem %s76_s29, 6144  ;;  %p4891_p7 = scmp.lt.s32.totalorder %s76_s29, %s76_s29 }
  0x30   :  { %p4887_p6 = scmp.ne.s32.totalorder %s76_s29, %s4886_s0  ;;  %p4892_p8 = scmp.lt.s32.totalorder %s4886_s0, %s4886_s0 }
  0x32   :  { %p4893_p9 = por %p4892_p8, %p4891_p7 }
  0x34   :  { %p4894_p10 = pnand %p4893_p9, %p4887_p6 }
  0x36   :  { %4897 = shalt.err (!%p4894_p10)
}
  0x37   :  { %81 = dma.hbm_to_vmem [thread:$0]  %s6846_s6, 6144, %s76_s29, [#allocation11], %s4927_s12, %s4927_s12, %s4928_s13  }
  0x38   :  { %4918 = dma.done.wait [#allocation5], 1024  }
  0x39   :  { %4919 = vsyncadd [#allocation5], 4294966272 }
  0x3a   :  { %4920 = dma.done.wait [#allocation8], 6912  }
  0x3b   :  { %4921 = vsyncadd [#allocation8], 4294960384 }
  0x3c   :  { %4922 = dma.done.wait [#allocation11], 12288  }
  0x3d   :  { %4923 = vsyncadd [#allocation11], 4294955008  ;;  %v6850_v0 = vmov 0.0   ;;  %v113_v1 = vld [vmem:[#allocation7 + $0x20] sm:$0xff]  ;;  %v112_v2 = vld [vmem:[#allocation7 + $0x18] sm:$0xff]  ;;  %vm132_vm0 = vcmask 130048   ;;  %v117_v63 = vlaneseq }
  0x3e   :  { %221 = vmatprep.mubr.f32.mxu0 %v6850_v0  ;;  %v110_v3 = vld [vmem:[#allocation7 + $0x8] sm:$0xff]  ;;  %185 = vmatprep.subr.mxu0 %v113_v1  ;;  %v109_v4 = vld [vmem:[#allocation7] sm:$0xff]  ;;  %v5022_v7 = vld [vmem:[#allocation9 + $0x168] sm:$0xff]  ;;  %vm4936_vm1 = vmmov 0  }
  0x3f   :  { %v101_v5 = vld [vmem:[#allocation4] sm:$0xff]  ;;  %186 = vmatpush1.msra.mxu0 %v112_v2  ;;  %v5024_v8 = vld [vmem:[#allocation9 + $0x158] sm:$0xff]  ;;  %v5032_v11 = vld [vmem:[#allocation9 + $0x140] sm:$0xff]  ;;  %v5292_v1 = vshrl.u32 %v117_v63, 7 }
  0x40   :  { %v5019_v6 = vld [vmem:[#allocation9 + $0x170] sm:$0xff]  ;;  %3912 = vmatprep.mubr.msk.f32.mxu1 %vm132_vm0, %v101_v5  ;;  %187 = vmatprep.subr.mxu0 %v110_v3  ;;  %v102_v10 = vld [vmem:[#allocation4 + $0x8] sm:$0xff]  ;;  %v5038_v13 = vld [vmem:[#allocation9 + $0x128] sm:$0xff] }
  0x41   :  { %6915 = vst [vmem:[#allocation18_spill] sm:$0xff] %v5019_v6  ;;  %188 = vmatpush1.msra.mxu0 %v109_v4  ;;  %v5028_v9 = vld [vmem:[#allocation9 + $0x150] sm:$0xff]  ;;  %v5035_v12 = vld [vmem:[#allocation9 + $0x138] sm:$0xff]  ;;  %v5042_v14 = vld [vmem:[#allocation9 + $0x120] sm:$0xff]  ;;  %v6858_v2 = vsub.s32 0, %v5292_v1 }
  0x42   :  { %3552 = vmatmul.mubr.msk.f32.vlgmr.msra.gmra.mxu0 %vm132_vm0, %v101_v5  ;;  %457 = vmatprep.subr.mxu0 %v5019_v6  ;;  %v5046_v15 = vld [vmem:[#allocation4 + $0x10] sm:$0xff]  ;;  %v5048_v16 = vld [vmem:[#allocation9 + $0x110] sm:$0xff]  ;;  %v5051_v17 = vld [vmem:[#allocation9 + $0x108] sm:$0xff]  ;;  %6920 = vst [vmem:[#allocation23_spill] sm:$0xff] %v5292_v1  ;;  %v6861_v5 = vsub.s32 1, %v5292_v1 }
  0x43   :  { %458 = vmatpush1.msra.mxu0 %v5022_v7  ;;  %227 = vmatprep.mubr.f32.mxu0 %v6850_v0  ;;  %v5054_v18 = vld [vmem:[#allocation9 + $0xf8] sm:$0xff]  ;;  %v5059_v20 = vld [vmem:[#allocation9 + $0xf0] sm:$0xff]  ;;  %v5063_v21 = vld [vmem:[#allocation4 + $0x18] sm:$0xff] }
  0x44   :  { %459 = vmatprep.subr.mxu0 %v5024_v8  ;;  %v114_v19 = vld [vmem:[#allocation7 + $0x28] sm:$0xff]  ;;  %v5065_v22 = vld [vmem:[#allocation9 + $0xe0] sm:$0xff]  ;;  %v5071_v24 = vld [vmem:[#allocation9 + $0xc8] sm:$0xff] }
  0x45   :  { %460 = vmatpush1.msra.mxu0 %v5028_v9  ;;  %v5068_v23 = vld [vmem:[#allocation9 + $0xd8] sm:$0xff]  ;;  %3908 = vmatprep.subr.mxu1 %v114_v19  ;;  %v111_v25 = vld [vmem:[#allocation7 + $0x10] sm:$0xff]  ;;  %v5080_v27 = vld [vmem:[#allocation4 + $0x20] sm:$0xff] }
  0x46   :  { %3553 = vmatmul.mubr.msk.f32.gmra.mxu0 %vm132_vm0, %v102_v10  ;;  %461 = vmatprep.subr.mxu0 %v5032_v11  ;;  %v5076_v26 = vld [vmem:[#allocation9 + $0xc0] sm:$0xff]  ;;  %v5082_v28 = vld [vmem:[#allocation9 + $0xb0] sm:$0xff]  ;;  %v5085_v29 = vld [vmem:[#allocation9 + $0xa8] sm:$0xff] }
  0x47   :  { %462 = vmatpush1.msra.mxu0 %v5035_v12  ;;  %233 = vmatprep.mubr.f32.mxu0 %v6850_v0  ;;  %v5088_v30 = vld [vmem:[#allocation9 + $0x98] sm:$0xff]  ;;  %v5093_v31 = vld [vmem:[#allocation9 + $0x90] sm:$0xff]  ;;  %v5099_v33 = vld [vmem:[#allocation9 + $0x80] sm:$0xff] }
  0x48   :  { %463 = vmatprep.subr.mxu0 %v5038_v13  ;;  %3909 = vmatpush3.msra.mxu1 %v114_v19  ;;  %v5097_v32 = vld [vmem:[#allocation4 + $0x28] sm:$0xff]  ;;  %v5106_v35 = vld [vmem:[#allocation9 + $0x68] sm:$0xff]  ;;  %v5114_v37 = vld [vmem:[#allocation9 + $0x60] sm:$0xff] }
  0x49   :  { %464 = vmatpush1.msra.mxu0 %v5042_v14  ;;  %3910 = vmatprep.subr.mxu1 %v111_v25  ;;  %v5102_v34 = vld [vmem:[#allocation9 + $0x78] sm:$0xff]  ;;  %v107_v38 = vld [vmem:[#allocation4 + $0x30] sm:$0xff]  ;;  %v5118_v39 = vld [vmem:[#allocation9 + $0x50] sm:$0xff] }
  0x4a   :  { %3554 = vmatmul.mubr.msk.f32.gmra.mxu0 %vm132_vm0, %v5046_v15  ;;  %465 = vmatprep.subr.mxu0 %v5048_v16  ;;  %v5109_v36 = vld [vmem:[#allocation9 + $0x178] sm:$0xff]  ;;  %v5121_v40 = vld [vmem:[#allocation9 + $0x48] sm:$0xff]  ;;  %v5128_v42 = vld [vmem:[#allocation9 + $0x160] sm:$0xff] }
  0x4b   :  { %466 = vmatpush1.msra.mxu0 %v5051_v17  ;;  %239 = vmatprep.mubr.f32.mxu0 %v6850_v0  ;;  %v5125_v41 = vld [vmem:[#allocation9 + $0x38] sm:$0xff]  ;;  %v5132_v43 = vld [vmem:[#allocation9 + $0x30] sm:$0xff]  ;;  %v108_v44 = vld [vmem:[#allocation4 + $0x38] sm:$0xff] }
  0x4c   :  { %467 = vmatprep.subr.mxu0 %v5054_v18  ;;  %3911 = vmatpush3.msra.mxu1 %v111_v25  ;;  %v5136_v45 = vld [vmem:[#allocation9 + $0x20] sm:$0xff]  ;;  %v5139_v46 = vld [vmem:[#allocation9 + $0x18] sm:$0xff]  ;;  %v5143_v47 = vld [vmem:[#allocation9 + $0x8] sm:$0xff] }
  0x4d   :  { %468 = vmatpush1.msra.mxu0 %v5059_v20  ;;  %3924 = vmatprep.subr.mxu1 %v6850_v0  ;;  %6916 = vst [vmem:[#allocation19_spill] sm:$0xff] %v5143_v47  ;;  %v5146_v48 = vld [vmem:[#allocation9 + $0x148] sm:$0xff]  ;;  %v5150_v49 = vld [vmem:[#allocation9] sm:$0xff]  ;;  %v5154_v50 = vld [vmem:[#allocation9 + $0x130] sm:$0xff] }
  0x4e   :  { %3555 = vmatmul.mubr.msk.f32.gmra.mxu0 %vm132_vm0, %v5063_v21  ;;  %469 = vmatprep.subr.mxu0 %v5065_v22  ;;  %6917 = vst [vmem:[#allocation20_spill] sm:$0xff] %v5150_v49  ;;  %v5160_v51 = vld [vmem:[#allocation9 + $0x118] sm:$0xff]  ;;  %v5165_v52 = vld [vmem:[#allocation9 + $0x100] sm:$0xff]  ;;  %v5172_v53 = vld [vmem:[#allocation9 + $0xe8] sm:$0xff] }
  0x4f   :  { %470 = vmatpush1.msra.mxu0 %v5068_v23  ;;  %245 = vmatprep.mubr.f32.mxu0 %v6850_v0  ;;  %v5180_v54 = vld [vmem:[#allocation9 + $0xd0] sm:$0xff]  ;;  %v5186_v55 = vld [vmem:[#allocation9 + $0xb8] sm:$0xff]  ;;  %v5193_v56 = vld [vmem:[#allocation9 + $0xa0] sm:$0xff] }
  0x50   :  { %471 = vmatprep.subr.mxu0 %v5071_v24  ;;  %3913 = vmatmul.mubr.msk.f32.vlgmr.msra.gmra.mxu1 %vm132_vm0, %v102_v10  ;;  %v5199_v57 = vld [vmem:[#allocation9 + $0x88] sm:$0xff]  ;;  %v5206_v58 = vld [vmem:[#allocation9 + $0x70] sm:$0xff]  ;;  %v5212_v59 = vld [vmem:[#allocation9 + $0x58] sm:$0xff] }
  0x51   :  { %472 = vmatpush1.msra.mxu0 %v5076_v26  ;;  %3925 = vmatpush3.msra.mxu1 %v5109_v36  ;;  %v5218_v60 = vld [vmem:[#allocation9 + $0x40] sm:$0xff]  ;;  %v5224_v61 = vld [vmem:[#allocation9 + $0x28] sm:$0xff]  ;;  %v5230_v62 = vld [vmem:[#allocation9 + $0x10] sm:$0xff] }
  0x52   :  { %3556 = vmatmul.mubr.msk.f32.gmra.mxu0 %vm132_vm0, %v5080_v27  ;;  %473 = vmatprep.subr.mxu0 %v5082_v28  ;;  %6918 = vst [vmem:[#allocation21_spill] sm:$0xff] %v5224_v61  ;;  %6919 = vst [vmem:[#allocation22_spill] sm:$0xff] %v5230_v62  ;;  %v115_v3 = vld [vmem:[%s6843_s3] sm:$0x7] }
  0x53   :  { %474 = vmatpush1.msra.mxu0 %v5085_v29  ;;  %251 = vmatprep.mubr.f32.mxu0 %v6850_v0 }
  0x54   :  { %475 = vmatprep.subr.mxu0 %v5088_v30  ;;  %3926 = vmatprep.subr.mxu1 %v6850_v0 }
  0x55   :  { %476 = vmatpush1.msra.mxu0 %v5093_v31  ;;  %3927 = vmatpush3.msra.mxu1 %v5128_v42 }
  0x56   :  { %3557 = vmatmul.mubr.msk.f32.gmra.mxu0 %vm132_vm0, %v5097_v32  ;;  %477 = vmatprep.subr.mxu0 %v5099_v33 }
  0x57   :  { %478 = vmatpush1.msra.mxu0 %v5102_v34  ;;  %257 = vmatprep.mubr.f32.mxu0 %v6850_v0 }
  0x58   :  { %479 = vmatprep.subr.mxu0 %v5106_v35  ;;  %3928 = vmatprep.subr.mxu1 %v6850_v0 }
  0x59   :  { %480 = vmatpush1.msra.mxu0 %v5114_v37  ;;  %3929 = vmatpush3.msra.mxu1 %v5146_v48 }
  0x5a   :  { %3558 = vmatmul.mubr.msk.f32.gmra.mxu0 %vm132_vm0, %v107_v38  ;;  %481 = vmatprep.subr.mxu0 %v5118_v39 }
  0x5b   :  { %482 = vmatpush1.msra.mxu0 %v5121_v40  ;;  %263 = vmatprep.mubr.f32.mxu0 %v6850_v0 }
  0x5c   :  { %483 = vmatprep.subr.mxu0 %v5125_v41  ;;  %3930 = vmatprep.subr.mxu1 %v6850_v0 }
  0x5d   :  { %484 = vmatpush1.msra.mxu0 %v5132_v43  ;;  %3931 = vmatpush3.msra.mxu1 %v5154_v50 }
  0x5e   :  { %3559 = vmatmul.mubr.msk.f32.gmra.mxu0 %vm132_vm0, %v108_v44  ;;  %485 = vmatprep.subr.mxu0 %v5136_v45 }
  0x5f   :  { %486 = vmatpush1.msra.mxu0 %v5139_v46  ;;  %521 = vmatprep.mubr.f32.mxu0 %v6850_v0 }
  0x60   :  { %487 = vmatprep.subr.mxu0 %v5143_v47  ;;  %3932 = vmatprep.subr.mxu1 %v6850_v0 }
  0x61   :  { %488 = vmatpush1.msra.mxu0 %v5150_v49  ;;  %3915 = vmatprep.mubr.msk.f32.mxu1 %vm132_vm0, %v5046_v15  ;;  %v120_v15 = vrot.slane %v115_v3, %v6858_v2 }
  0x62   :  { %522 = vmatmul.mubr.f32.vlgmr.msra.gmra.mxu0 %v6850_v0  ;;  %3933 = vmatpush3.msra.mxu1 %v5160_v51 }
  0x63   :  { %625 = vmatprep.subr.mxu0 %v5019_v6  ;;  %3934 = vmatprep.subr.mxu1 %v6850_v0 }
  0x64   :  { %3916 = vmatmul.mubr.msk.f32.gmra.mxu1 %vm132_vm0, %v5063_v21  ;;  %626 = vmatpush1.msra.mxu0 %v5022_v7  ;;  %v124_v21 = vrot.slane %v115_v3, %v6861_v5 }
  0x65   :  { %3935 = vmatpush3.msra.mxu1 %v5165_v52  ;;  %3918 = vmatprep.mubr.msk.f32.mxu1 %vm132_vm0, %v5080_v27 }
  0x66   :  { %3936 = vmatprep.subr.mxu1 %v6850_v0  ;;  %627 = vmatprep.subr.mxu0 %v5024_v8 }
  0x67   :  { %3937 = vmatpush3.msra.mxu1 %v5172_v53  ;;  %628 = vmatpush1.msra.mxu0 %v5028_v9 }
  0x68   :  { %3938 = vmatprep.subr.mxu1 %v6850_v0  ;;  %3919 = vmatmul.mubr.msk.f32.gmra.mxu1 %vm132_vm0, %v5097_v32 }
  0x69   :  { %3939 = vmatpush3.msra.mxu1 %v5180_v54  ;;  %3921 = vmatprep.mubr.msk.f32.mxu1 %vm132_vm0, %v107_v38 }
  0x6a   :  { %3940 = vmatprep.subr.mxu1 %v6850_v0  ;;  %629 = vmatprep.subr.mxu0 %v5032_v11 }
  0x6b   :  { %3941 = vmatpush3.msra.mxu1 %v5186_v55  ;;  %630 = vmatpush1.msra.mxu0 %v5035_v12 }
  0x6c   :  { %3942 = vmatprep.subr.mxu1 %v6850_v0  ;;  %3922 = vmatmul.mubr.msk.f32.gmra.mxu1 %vm132_vm0, %v108_v44 }
  0x6d   :  { %3943 = vmatpush3.msra.mxu1 %v5193_v56  ;;  %3956 = vmatprep.mubr.msk.f32.mxu1 %vm4936_vm1, %v6850_v0 }
  0x6e   :  { %3944 = vmatprep.subr.mxu1 %v6850_v0  ;;  %631 = vmatprep.subr.mxu0 %v5038_v13 }
  0x6f   :  { %3945 = vmatpush3.msra.mxu1 %v5199_v57  ;;  %632 = vmatpush1.msra.mxu0 %v5042_v14 }
  0x70   :  { %3946 = vmatprep.subr.mxu1 %v6850_v0  ;;  %633 = vmatprep.subr.mxu0 %v5048_v16 }
  0x71   :  { %3947 = vmatpush3.msra.mxu1 %v5206_v58  ;;  %634 = vmatpush1.msra.mxu0 %v5051_v17 }
  0x72   :  { %3948 = vmatprep.subr.mxu1 %v6850_v0  ;;  %635 = vmatprep.subr.mxu0 %v5054_v18 }
  0x73   :  { %3949 = vmatpush3.msra.mxu1 %v5212_v59  ;;  %636 = vmatpush1.msra.mxu0 %v5059_v20 }
  0x74   :  { %3950 = vmatprep.subr.mxu1 %v6850_v0  ;;  %637 = vmatprep.subr.mxu0 %v5065_v22 }
  0x75   :  { %3951 = vmatpush3.msra.mxu1 %v5218_v60  ;;  %638 = vmatpush1.msra.mxu0 %v5068_v23 }
  0x76   :  { %3952 = vmatprep.subr.mxu1 %v6850_v0  ;;  %639 = vmatprep.subr.mxu0 %v5071_v24 }
  0x77   :  { %3953 = vmatpush3.msra.mxu1 %v5224_v61  ;;  %640 = vmatpush1.msra.mxu0 %v5076_v26 }
  0x78   :  { %3954 = vmatprep.subr.mxu1 %v6850_v0  ;;  %641 = vmatprep.subr.mxu0 %v5082_v28 }
  0x79   :  { %3955 = vmatpush3.msra.mxu1 %v5230_v62  ;;  %642 = vmatpush1.msra.mxu0 %v5085_v29 }
  0x7a   :  { %3957 = vmatmul.mubr.f32.vlgmr.msra.gmra.mxu1 %v6850_v0  ;;  %3959 = vmatprep.subr.mxu1 %v6850_v0 }
  0x7b   :  { %3960 = vmatpush3.msra.mxu1 %v5109_v36  ;;  %643 = vmatprep.subr.mxu0 %v5088_v30 }
  0x7c   :  { %3961 = vmatprep.subr.mxu1 %v6850_v0  ;;  %644 = vmatpush1.msra.mxu0 %v5093_v31 }
  0x7d   :  { %3962 = vmatpush3.msra.mxu1 %v5128_v42  ;;  %645 = vmatprep.subr.mxu0 %v5099_v33 }
  0x7e   :  { %3963 = vmatprep.subr.mxu1 %v6850_v0  ;;  %646 = vmatpush1.msra.mxu0 %v5102_v34 }
  0x7f   :  { %3964 = vmatpush3.msra.mxu1 %v5146_v48  ;;  %647 = vmatprep.subr.mxu0 %v5106_v35 }
  0x80   :  { %3965 = vmatprep.subr.mxu1 %v6850_v0  ;;  %648 = vmatpush1.msra.mxu0 %v5114_v37 }
  0x81   :  { %3966 = vmatpush3.msra.mxu1 %v5154_v50  ;;  %649 = vmatprep.subr.mxu0 %v5118_v39 }
  0x82   :  { %3967 = vmatprep.subr.mxu1 %v6850_v0  ;;  %650 = vmatpush1.msra.mxu0 %v5121_v40 }
  0x83   :  { %3968 = vmatpush3.msra.mxu1 %v5160_v51  ;;  %651 = vmatprep.subr.mxu0 %v5125_v41 }
  0x84   :  { %3969 = vmatprep.subr.mxu1 %v6850_v0  ;;  %652 = vmatpush1.msra.mxu0 %v5132_v43 }
  0x85   :  { %3970 = vmatpush3.msra.mxu1 %v5165_v52  ;;  %653 = vmatprep.subr.mxu0 %v5136_v45 }
  0x86   :  { %3971 = vmatprep.subr.mxu1 %v6850_v0  ;;  %654 = vmatpush1.msra.mxu0 %v5139_v46 }
  0x87   :  { %3972 = vmatpush3.msra.mxu1 %v5172_v53  ;;  %655 = vmatprep.subr.mxu0 %v5143_v47 }
  0x88   :  { %3973 = vmatprep.subr.mxu1 %v6850_v0  ;;  %656 = vmatpush1.msra.mxu0 %v5150_v49 }
  0x89   :  { %3974 = vmatpush3.msra.mxu1 %v5180_v54  ;;  %689 = vmatprep.mubr.f32.mxu0 %v6850_v0 }
  0x8a   :  { %3975 = vmatprep.subr.mxu1 %v6850_v0  ;;  %3991 = vmatprep.mubr.msk.f32.mxu1 %vm4936_vm1, %v6850_v0 }
  0x8b   :  { %3976 = vmatpush3.msra.mxu1 %v5186_v55  ;;  %794 = vmatprep.subr.mxu0 %v5019_v6 }
  0x8c   :  { %3977 = vmatprep.subr.mxu1 %v6850_v0 }
  0x8d   :  { %3978 = vmatpush3.msra.mxu1 %v5193_v56 }
  0x8e   :  { %3979 = vmatprep.subr.mxu1 %v6850_v0 }
  0x8f   :  { %3980 = vmatpush3.msra.mxu1 %v5199_v57 }
  0x90   :  { %3981 = vmatprep.subr.mxu1 %v6850_v0 }
  0x91   :  { %3982 = vmatpush3.msra.mxu1 %v5206_v58 }
  0x92   :  { %3983 = vmatprep.subr.mxu1 %v6850_v0 }
  0x93   :  { %3984 = vmatpush3.msra.mxu1 %v5212_v59 }
  0x94   :  { %3985 = vmatprep.subr.mxu1 %v6850_v0 }
  0x95   :  { %3986 = vmatpush3.msra.mxu1 %v5218_v60 }
  0x96   :  { %3987 = vmatprep.subr.mxu1 %v6850_v0 }
  0x97   :  { %3988 = vmatpush3.msra.mxu1 %v5224_v61 }
  0x98   :  { %3989 = vmatprep.subr.mxu1 %v6850_v0 }
  0x99   :  { %3990 = vmatpush3.msra.mxu1 %v5230_v62  ;;  %v6866_v62 = vsub.s32 2, %v5292_v1 }
  0x9a   :  { %3994 = vmatprep.subr.mxu1 %v6850_v0 }
 0x102   :  { %v223_v4 = vpop.f32.mrf.mxu0 }
 0x104   :  { %v225_v10 = vpop.f32.mrf.mxu0 }
 0x106   :  { %v229_v19 = vpop.f32.mrf.mxu0 }
 0x107   :  { %v5303_v25 = vadd.f32 %v229_v19, %v120_v15  ;;  %v128_v19 = vrot.slane %v115_v3, %v6866_v62  ;;  %v224_v62 = vadd.f32 %v223_v4, %v120_v15 }
 0x108   :  { %v231_v27 = vpop.f32.mrf.mxu0 }
 0x109   :  { %6921 = vst [vmem:[#allocation24_spill] sm:$0xff] %v5303_v25  ;;  %v5305_v32 = vadd.f32 %v231_v27, %v124_v21 }
 0x10a   :  { %v235_v38 = vpop.f32.mrf.mxu0 }
 0x10b   :  { %6922 = vst [vmem:[#allocation25_spill] sm:$0xff] %v5305_v32  ;;  %v5307_v44 = vadd.f32 %v235_v38, %v120_v15 }
 0x10c   :  { %v237_v63 = vpop.f32.mrf.mxu0 }
 0x10d   :  { %6923 = vst [vmem:[#allocation26_spill] sm:$0xff] %v5307_v44  ;;  %v5309_v0 = vadd.f32 %v237_v63, %v124_v21 }
 0x10e   :  { %v241_v6 = vpop.f32.mrf.mxu0 }
 0x10f   :  { %6924 = vst [vmem:[#allocation27_spill] sm:$0xff] %v5309_v0  ;;  %v5312_v49 = vadd.f32 %v241_v6, %v120_v15 }
 0x110   :  { %v243_v2 = vpop.f32.mrf.mxu0  ;;  %v3914_v44 = vpop.f32.mrf.mxu1 }
 0x111   :  { %6925 = vst [vmem:[#allocation28_spill] sm:$0xff] %v5312_v49  ;;  %v5314_v47 = vadd.f32 %v243_v2, %v124_v21  ;;  %v5322_v0 = vadd.f32 %v3914_v44, %v128_v19 }
 0x112   :  { %v247_v5 = vpop.f32.mrf.mxu0 }
 0x113   :  { %6926 = vst [vmem:[#allocation29_spill] sm:$0xff] %v5314_v47  ;;  %v5318_v27 = vadd.f32 %v247_v5, %v120_v15  ;;  %6929 = vst [vmem:[#allocation32_spill] sm:$0xff] %v5322_v0 }
 0x114   :  { %v249_v32 = vpop.f32.mrf.mxu0 }
 0x115   :  { %6927 = vst [vmem:[#allocation30_spill] sm:$0xff] %v5318_v27  ;;  %v5320_v38 = vadd.f32 %v249_v32, %v124_v21 }
 0x116   :  { %v253_v63 = vpop.f32.mrf.mxu0 }
 0x117   :  { %6928 = vst [vmem:[#allocation31_spill] sm:$0xff] %v5320_v38  ;;  %v5324_v25 = vadd.f32 %v253_v63, %v120_v15  ;;  %v336_v63 = vpop.f32.mrf.mxu1 }
 0x118   :  { %v255_v6 = vpop.f32.mrf.mxu0 }
 0x119   :  { %6930 = vst [vmem:[#allocation33_spill] sm:$0xff] %v5324_v25  ;;  %v5326_v49 = vadd.f32 %v255_v6, %v124_v21 }
 0x11a   :  { %v259_v2 = vpop.f32.mrf.mxu0 }
 0x11b   :  { %6931 = vst [vmem:[#allocation34_spill] sm:$0xff] %v5326_v49  ;;  %v5328_v47 = vadd.f32 %v259_v2, %v120_v15  ;;  %v226_v2 = vadd.f32 %v225_v10, %v124_v21 }
 0x11c   :  { %v261_v61 = vpop.f32.mrf.mxu0 }
 0x11d   :  { %6932 = vst [vmem:[#allocation35_spill] sm:$0xff] %v5328_v47  ;;  %v5330_v1 = vadd.f32 %v261_v61, %v124_v21 }
 0x11e   :  { %v265_v3 = vpop.f32.mrf.mxu0 }
 0x11f   :  { %6933 = vst [vmem:[#allocation36_spill] sm:$0xff] %v5330_v1  ;;  %v5332_v5 = vadd.f32 %v265_v3, %v120_v15 }
 0x120   :  { %v267_v32 = vpop.f32.mrf.mxu0 }
 0x121   :  { %6934 = vst [vmem:[#allocation37_spill] sm:$0xff] %v5332_v5  ;;  %v5334_v38 = vadd.f32 %v267_v32, %v124_v21 }
 0x122   :  { %v523_v44 = vpop.f32.mrf.mxu0 }
 0x123   :  { %6935 = vst [vmem:[#allocation38_spill] sm:$0xff] %v5334_v38  ;;  %v598_v27 = vadd.f32 %v523_v44, %v224_v62 }
 0x124   :  { %v3917_v0 = vpop.f32.mrf.mxu1  ;;  %v525_v6 = vpop.f32.mrf.mxu0 }
 0x125   :  { %v3569_v25 = vmul.f32 -1.442695, %v598_v27  ;;  %v5336_v49 = vadd.f32 %v3917_v0, %v128_v19  ;;  %v605_v1 = vadd.f32 %v525_v6, %v226_v2  ;;  %v5351_v6 = vld [vmem:[%s6844_s4] ss:$0 sm:$0xff] }
 0x126   :  { %v346_v47 = vpop.f32.mrf.mxu1 }
 0x127   :  { %6936 = vst [vmem:[#allocation39_spill] sm:$0xff] %v5336_v49  ;;  %4540 = vpow2.f32 %v3569_v25  ;;  %v5338_v61 = vadd.f32 %v346_v47, %v128_v19  ;;  %v3570_v32 = vmul.f32 -1.442695, %v605_v1 }
 0x128   :  { %v3920_v3 = vpop.f32.mrf.mxu1 }
 0x129   :  { %6937 = vst [vmem:[#allocation40_spill] sm:$0xff] %v5338_v61  ;;  %v5340_v5 = vadd.f32 %v3920_v3, %v128_v19  ;;  %4542 = vpow2.f32 %v3570_v32 }
 0x12a   :  { %v356_v4 = vpop.f32.mrf.mxu1 }
 0x12b   :  { %6938 = vst [vmem:[#allocation41_spill] sm:$0xff] %v5340_v5  ;;  %v5342_v15 = vadd.f32 %v356_v4, %v128_v19  ;;  %v337_v4 = vadd.f32 %v336_v63, %v128_v19  ;;  %v6944_v63 = vld [vmem:[#allocation21_spill] sm:$0xff] }
 0x12c   :  { %v3923_v62 = vpop.f32.mrf.mxu1 }
 0x12d   :  { %6939 = vst [vmem:[#allocation42_spill] sm:$0xff] %v5342_v15  ;;  %v5344_v44 = vadd.f32 %v3923_v62, %v128_v19 }
 0x12e   :  { %v366_v27 = vpop.f32.mrf.mxu1 }
 0x12f   :  { %6940 = vst [vmem:[#allocation43_spill] sm:$0xff] %v5344_v44  ;;  %v5346_v38 = vadd.f32 %v366_v27, %v128_v19  ;;  %v6943_v19 = vmov 0.0  }
 0x131   :  { %6941 = vst [vmem:[#allocation44_spill] sm:$0xff] %v5346_v38 }
 0x134   :  { %v4541_v0 = vpop.eup %4540 }
 0x135   :  { %v602_v10 = vadd.f32 1.0, %v4541_v0 }
 0x136   :  { %v4543_v25 = vpop.eup %4542 }
 0x137   :  { %4544 = vrcp.f32 %v602_v10  ;;  %v609_v2 = vadd.f32 1.0, %v4543_v25  ;;  %v6947_v25 = vld [vmem:[#allocation22_spill] sm:$0xff] }
 0x139   :  { %4546 = vrcp.f32 %v609_v2  ;;  %v6948_v2 = vld [vmem:[#allocation18_spill] sm:$0xff] }
 0x13a   :  { %v594_v47 = vpop.f32.mrf.mxu1 }
 0x13b   :  { %v612_v1 = vadd.f32 %v5351_v6, %v594_v47  ;;  %v6946_v47 = vld [vmem:[#allocation20_spill] sm:$0xff] }
 0x13c   :  { %v3958_v21 = vpop.f32.mrf.mxu1 }
 0x144   :  { %v4545_v3 = vpop.eup %4544 }
 0x145   :  { %v613_v62 = vmul.f32 %v4545_v3, %v612_v1 }
 0x146   :  { %v4547_v32 = vpop.eup %4546 }
 0x147   :  { %v614_v27 = vadd.f32 %v613_v62, %v337_v4  ;;  %v616_v0 = vsub.f32 1.0, %v4547_v32  ;;  %v618_v21 = vmul.f32 0.0, %v4547_v32  ;;  %v6949_v4 = vld [vmem:[#allocation24_spill] sm:$0xff] }
 0x149   :  { %4548 = vtanh.f32 %v614_v27 }
 0x156   :  { %v4549_v10 = vpop.eup %4548 }
 0x157   :  { %v617_v44 = vmul.f32 %v4549_v10, %v616_v0  ;;  %v6950_v10 = vld [vmem:[#allocation25_spill] sm:$0xff] }
 0x159   :  { %v5354_v38 = vadd.f32 %v618_v21, %v617_v44  ;;  %v6945_v44 = vld [vmem:[#allocation19_spill] sm:$0xff] }
 0x15b   :  { %6942 = vst [vmem:[#allocation45_spill] sm:$0xff] %v5354_v38  ;;  %690 = vmatmul.mubr.f32.vlgmr.msra.gmra.mxu0 %v5354_v38  ;;  %3992 = vmatmul.mubr.f32.vlgmr.msra.gmra.mxu1 %v5354_v38 }
 0x15c   :  { %795 = vmatpush1.msra.mxu0 %v5022_v7  ;;  %3995 = vmatpush3.msra.mxu1 %v5109_v36 }
 0x15d   :  { %796 = vmatprep.subr.mxu0 %v5024_v8  ;;  %3996 = vmatprep.subr.mxu1 %v6943_v19 }
 0x15e   :  { %797 = vmatpush1.msra.mxu0 %v5028_v9  ;;  %3997 = vmatpush3.msra.mxu1 %v5128_v42 }
 0x15f   :  { %798 = vmatprep.subr.mxu0 %v5032_v11  ;;  %3998 = vmatprep.subr.mxu1 %v6943_v19 }
 0x160   :  { %799 = vmatpush1.msra.mxu0 %v5035_v12  ;;  %3999 = vmatpush3.msra.mxu1 %v5146_v48 }
 0x161   :  { %800 = vmatprep.subr.mxu0 %v5038_v13  ;;  %4000 = vmatprep.subr.mxu1 %v6943_v19 }
 0x162   :  { %801 = vmatpush1.msra.mxu0 %v5042_v14  ;;  %4001 = vmatpush3.msra.mxu1 %v5154_v50 }
 0x163   :  { %802 = vmatprep.subr.mxu0 %v5048_v16  ;;  %4002 = vmatprep.subr.mxu1 %v6943_v19 }
 0x164   :  { %803 = vmatpush1.msra.mxu0 %v5051_v17  ;;  %4003 = vmatpush3.msra.mxu1 %v5160_v51 }
 0x165   :  { %804 = vmatprep.subr.mxu0 %v5054_v18  ;;  %4004 = vmatprep.subr.mxu1 %v6943_v19 }
 0x166   :  { %805 = vmatpush1.msra.mxu0 %v5059_v20  ;;  %4005 = vmatpush3.msra.mxu1 %v5165_v52 }
 0x167   :  { %806 = vmatprep.subr.mxu0 %v5065_v22  ;;  %4006 = vmatprep.subr.mxu1 %v6943_v19 }
 0x168   :  { %807 = vmatpush1.msra.mxu0 %v5068_v23  ;;  %4007 = vmatpush3.msra.mxu1 %v5172_v53 }
 0x169   :  { %808 = vmatprep.subr.mxu0 %v5071_v24  ;;  %4008 = vmatprep.subr.mxu1 %v6943_v19 }
 0x16a   :  { %809 = vmatpush1.msra.mxu0 %v5076_v26  ;;  %4009 = vmatpush3.msra.mxu1 %v5180_v54 }
 0x16b   :  { %810 = vmatprep.subr.mxu0 %v5082_v28  ;;  %4010 = vmatprep.subr.mxu1 %v6943_v19 }
 0x16c   :  { %811 = vmatpush1.msra.mxu0 %v5085_v29  ;;  %4011 = vmatpush3.msra.mxu1 %v5186_v55 }
 0x16d   :  { %812 = vmatprep.subr.mxu0 %v5088_v30  ;;  %4012 = vmatprep.subr.mxu1 %v6943_v19 }
 0x16e   :  { %813 = vmatpush1.msra.mxu0 %v5093_v31  ;;  %4013 = vmatpush3.msra.mxu1 %v5193_v56 }
 0x16f   :  { %814 = vmatprep.subr.mxu0 %v5099_v33  ;;  %4014 = vmatprep.subr.mxu1 %v6943_v19 }
 0x170   :  { %815 = vmatpush1.msra.mxu0 %v5102_v34  ;;  %4015 = vmatpush3.msra.mxu1 %v5199_v57 }
 0x171   :  { %816 = vmatprep.subr.mxu0 %v5106_v35  ;;  %4016 = vmatprep.subr.mxu1 %v6943_v19 }
 0x172   :  { %817 = vmatpush1.msra.mxu0 %v5114_v37  ;;  %4017 = vmatpush3.msra.mxu1 %v5206_v58 }
 0x173   :  { %818 = vmatprep.subr.mxu0 %v5118_v39  ;;  %4018 = vmatprep.subr.mxu1 %v6943_v19 }
 0x174   :  { %819 = vmatpush1.msra.mxu0 %v5121_v40  ;;  %4019 = vmatpush3.msra.mxu1 %v5212_v59 }
 0x175   :  { %820 = vmatprep.subr.mxu0 %v5125_v41  ;;  %4020 = vmatprep.subr.mxu1 %v6943_v19 }
 0x176   :  { %821 = vmatpush1.msra.mxu0 %v5132_v43  ;;  %4021 = vmatpush3.msra.mxu1 %v5218_v60 }
 0x177   :  { %822 = vmatprep.subr.mxu0 %v5136_v45  ;;  %4022 = vmatprep.subr.mxu1 %v6943_v19 }
 0x178   :  { %823 = vmatpush1.msra.mxu0 %v5139_v46  ;;  %4023 = vmatpush3.msra.mxu1 %v6944_v63  ;;  %v6951_v63 = vld [vmem:[#allocation32_spill] sm:$0xff] }
 0x179   :  { %824 = vmatprep.subr.mxu0 %v6945_v44  ;;  %4024 = vmatprep.subr.mxu1 %v6943_v19 }
 0x17a   :  { %825 = vmatpush1.msra.mxu0 %v6946_v47  ;;  %858 = vmatprep.mubr.f32.mxu0 %v6943_v19 }
 0x17b   :  { %4025 = vmatpush3.msra.mxu1 %v6947_v25  ;;  %4026 = vmatprep.mubr.msk.f32.mxu1 %vm4936_vm1, %v6943_v19 }
 0x17c   :  { %963 = vmatprep.subr.mxu0 %v6948_v2  ;;  %4029 = vmatprep.subr.mxu1 %v6943_v19 }
 0x21b   :  { %v691_v1 = vpop.f32.mrf.mxu0  ;;  %v762_v3 = vpop.f32.mrf.mxu1 }
 0x21c   :  { %v766_v62 = vadd.f32 %v691_v1, %v6949_v4  ;;  %v780_v2 = vadd.f32 %v5351_v6, %v762_v3 }
 0x21d   :  { %v3993_v27 = vpop.f32.mrf.mxu1  ;;  %v693_v0 = vpop.f32.mrf.mxu0 }
 0x21e   :  { %v3571_v32 = vmul.f32 -1.442695, %v766_v62  ;;  %v773_v21 = vadd.f32 %v693_v0, %v6950_v10 }
 0x220   :  { %4550 = vpow2.f32 %v3571_v32  ;;  %v3572_v5 = vmul.f32 -1.442695, %v773_v21 }
 0x222   :  { %4552 = vpow2.f32 %v3572_v5 }
 0x22d   :  { %v4551_v15 = vpop.eup %4550 }
 0x22e   :  { %v770_v49 = vadd.f32 1.0, %v4551_v15  ;;  %v6955_v15 = vld [vmem:[#allocation20_spill] sm:$0xff] }
 0x22f   :  { %v4553_v61 = vpop.eup %4552 }
 0x230   :  { %4554 = vrcp.f32 %v770_v49  ;;  %v777_v25 = vadd.f32 1.0, %v4553_v61  ;;  %v6953_v49 = vld [vmem:[#allocation21_spill] sm:$0xff]  ;;  %v6954_v61 = vld [vmem:[#allocation19_spill] sm:$0xff] }
 0x232   :  { %4556 = vrcp.f32 %v777_v25 }
 0x23d   :  { %v4555_v47 = vpop.eup %4554 }
 0x23e   :  { %v781_v44 = vmul.f32 %v4555_v47, %v780_v2  ;;  %v6958_v2 = vld [vmem:[#allocation26_spill] sm:$0xff] }
 0x23f   :  { %v4557_v4 = vpop.eup %4556 }
 0x240   :  { %v782_v1 = vadd.f32 %v781_v44, %v6951_v63  ;;  %v784_v62 = vsub.f32 1.0, %v4557_v4  ;;  %v786_v0 = vmul.f32 %v4557_v4, %v5354_v38  ;;  %v6956_v63 = vld [vmem:[#allocation22_spill] sm:$0xff]  ;;  %v6959_v4 = vld [vmem:[#allocation27_spill] sm:$0xff] }
 0x241   :  { %v6957_v44 = vld [vmem:[#allocation18_spill] sm:$0xff] }
 0x242   :  { %4558 = vtanh.f32 %v782_v1 }
 0x24f   :  { %v4559_v27 = vpop.eup %4558 }
 0x250   :  { %v785_v32 = vmul.f32 %v4559_v27, %v784_v62 }
 0x252   :  { %v5430_v5 = vadd.f32 %v786_v0, %v785_v32 }
 0x254   :  { %6952 = vst [vmem:[#allocation24_spill] sm:$0xff] %v5430_v5  ;;  %859 = vmatmul.mubr.f32.vlgmr.msra.gmra.mxu0 %v5430_v5  ;;  %4027 = vmatmul.mubr.f32.vlgmr.msra.gmra.mxu1 %v5430_v5 }
 0x255   :  { %964 = vmatpush1.msra.mxu0 %v5022_v7  ;;  %4030 = vmatpush3.msra.mxu1 %v5109_v36 }
 0x256   :  { %965 = vmatprep.subr.mxu0 %v5024_v8  ;;  %4031 = vmatprep.subr.mxu1 %v6943_v19 }
 0x257   :  { %966 = vmatpush1.msra.mxu0 %v5028_v9  ;;  %4032 = vmatpush3.msra.mxu1 %v5128_v42 }
 0x258   :  { %967 = vmatprep.subr.mxu0 %v5032_v11  ;;  %4033 = vmatprep.subr.mxu1 %v6943_v19 }
 0x259   :  { %968 = vmatpush1.msra.mxu0 %v5035_v12  ;;  %4034 = vmatpush3.msra.mxu1 %v5146_v48 }
 0x25a   :  { %969 = vmatprep.subr.mxu0 %v5038_v13  ;;  %4035 = vmatprep.subr.mxu1 %v6943_v19 }
 0x25b   :  { %970 = vmatpush1.msra.mxu0 %v5042_v14  ;;  %4036 = vmatpush3.msra.mxu1 %v5154_v50 }
 0x25c   :  { %971 = vmatprep.subr.mxu0 %v5048_v16  ;;  %4037 = vmatprep.subr.mxu1 %v6943_v19 }
 0x25d   :  { %972 = vmatpush1.msra.mxu0 %v5051_v17  ;;  %4038 = vmatpush3.msra.mxu1 %v5160_v51 }
 0x25e   :  { %973 = vmatprep.subr.mxu0 %v5054_v18  ;;  %4039 = vmatprep.subr.mxu1 %v6943_v19 }
 0x25f   :  { %974 = vmatpush1.msra.mxu0 %v5059_v20  ;;  %4040 = vmatpush3.msra.mxu1 %v5165_v52 }
 0x260   :  { %975 = vmatprep.subr.mxu0 %v5065_v22  ;;  %4041 = vmatprep.subr.mxu1 %v6943_v19 }
 0x261   :  { %976 = vmatpush1.msra.mxu0 %v5068_v23  ;;  %4042 = vmatpush3.msra.mxu1 %v5172_v53 }
 0x262   :  { %977 = vmatprep.subr.mxu0 %v5071_v24  ;;  %4043 = vmatprep.subr.mxu1 %v6943_v19 }
 0x263   :  { %978 = vmatpush1.msra.mxu0 %v5076_v26  ;;  %4044 = vmatpush3.msra.mxu1 %v5180_v54 }
 0x264   :  { %979 = vmatprep.subr.mxu0 %v5082_v28  ;;  %4045 = vmatprep.subr.mxu1 %v6943_v19 }
 0x265   :  { %980 = vmatpush1.msra.mxu0 %v5085_v29  ;;  %4046 = vmatpush3.msra.mxu1 %v5186_v55 }
 0x266   :  { %981 = vmatprep.subr.mxu0 %v5088_v30  ;;  %4047 = vmatprep.subr.mxu1 %v6943_v19 }
 0x267   :  { %982 = vmatpush1.msra.mxu0 %v5093_v31  ;;  %4048 = vmatpush3.msra.mxu1 %v5193_v56 }
 0x268   :  { %983 = vmatprep.subr.mxu0 %v5099_v33  ;;  %4049 = vmatprep.subr.mxu1 %v6943_v19 }
 0x269   :  { %984 = vmatpush1.msra.mxu0 %v5102_v34  ;;  %4050 = vmatpush3.msra.mxu1 %v5199_v57 }
 0x26a   :  { %985 = vmatprep.subr.mxu0 %v5106_v35  ;;  %4051 = vmatprep.subr.mxu1 %v6943_v19 }
 0x26b   :  { %986 = vmatpush1.msra.mxu0 %v5114_v37  ;;  %4052 = vmatpush3.msra.mxu1 %v5206_v58 }
 0x26c   :  { %987 = vmatprep.subr.mxu0 %v5118_v39  ;;  %4053 = vmatprep.subr.mxu1 %v6943_v19 }
 0x26d   :  { %988 = vmatpush1.msra.mxu0 %v5121_v40  ;;  %4054 = vmatpush3.msra.mxu1 %v5212_v59 }
 0x26e   :  { %989 = vmatprep.subr.mxu0 %v5125_v41  ;;  %4055 = vmatprep.subr.mxu1 %v6943_v19 }
 0x26f   :  { %990 = vmatpush1.msra.mxu0 %v5132_v43  ;;  %4056 = vmatpush3.msra.mxu1 %v5218_v60 }
 0x270   :  { %991 = vmatprep.subr.mxu0 %v5136_v45  ;;  %4057 = vmatprep.subr.mxu1 %v6943_v19 }
 0x271   :  { %992 = vmatpush1.msra.mxu0 %v5139_v46  ;;  %4058 = vmatpush3.msra.mxu1 %v6953_v49  ;;  %v6960_v49 = vld [vmem:[#allocation40_spill] sm:$0xff] }
 0x272   :  { %993 = vmatprep.subr.mxu0 %v6954_v61  ;;  %4059 = vmatprep.subr.mxu1 %v6943_v19 }
 0x273   :  { %994 = vmatpush1.msra.mxu0 %v6955_v15  ;;  %1027 = vmatprep.mubr.f32.mxu0 %v6943_v19 }
 0x274   :  { %4060 = vmatpush3.msra.mxu1 %v6956_v63  ;;  %4061 = vmatprep.mubr.msk.f32.mxu1 %vm4936_vm1, %v6943_v19 }
 0x275   :  { %1132 = vmatprep.subr.mxu0 %v6957_v44  ;;  %4064 = vmatprep.subr.mxu1 %v6943_v19 }
 0x314   :  { %v860_v47 = vpop.f32.mrf.mxu0  ;;  %v931_v25 = vpop.f32.mrf.mxu1 }
 0x315   :  { %v935_v3 = vadd.f32 %v860_v47, %v6958_v2  ;;  %v949_v44 = vadd.f32 %v5351_v6, %v931_v25  ;;  %v5608_v25 = vld [vmem:[#allocation9 + $0x138] sm:$0xff] }
 0x316   :  { %v4028_v10 = vpop.f32.mrf.mxu1  ;;  %v862_v1 = vpop.f32.mrf.mxu0 }
 0x317   :  { %v3573_v21 = vmul.f32 -1.442695, %v935_v3  ;;  %v942_v62 = vadd.f32 %v862_v1, %v6959_v4 }
 0x319   :  { %4560 = vpow2.f32 %v3573_v21  ;;  %v3574_v27 = vmul.f32 -1.442695, %v942_v62  ;;  %v5612_v62 = vld [vmem:[#allocation9 + $0x128] sm:$0xff] }
 0x31b   :  { %4562 = vpow2.f32 %v3574_v27  ;;  %v5616_v27 = vld [vmem:[#allocation9 + $0x120] sm:$0xff] }
 0x326   :  { %v4561_v32 = vpop.eup %4560 }
 0x327   :  { %v939_v0 = vadd.f32 1.0, %v4561_v32  ;;  %v5620_v32 = vld [vmem:[#allocation9 + $0x110] sm:$0xff] }
 0x328   :  { %v4563_v38 = vpop.eup %4562 }
 0x329   :  { %4564 = vrcp.f32 %v939_v0  ;;  %v946_v63 = vadd.f32 1.0, %v4563_v38  ;;  %v5591_v38 = vld [vmem:[#allocation9 + $0x178] sm:$0xff]  ;;  %v5624_v0 = vld [vmem:[#allocation9 + $0x108] sm:$0xff] }
 0x32b   :  { %4566 = vrcp.f32 %v946_v63  ;;  %v5604_v63 = vld [vmem:[#allocation9 + $0x140] sm:$0xff] }
 0x336   :  { %v4565_v15 = vpop.eup %4564 }
 0x337   :  { %v950_v61 = vmul.f32 %v4565_v15, %v949_v44  ;;  %v5601_v15 = vld [vmem:[#allocation9 + $0x160] sm:$0xff]  ;;  %v5632_v44 = vld [vmem:[#allocation9 + $0xf0] sm:$0xff] }
 0x338   :  { %v4567_v2 = vpop.eup %4566 }
 0x339   :  { %v951_v47 = vadd.f32 %v950_v61, %v6960_v49  ;;  %v953_v3 = vsub.f32 1.0, %v4567_v2  ;;  %v955_v1 = vmul.f32 %v4567_v2, %v5430_v5  ;;  %v5594_v49 = vld [vmem:[#allocation9 + $0x158] sm:$0xff]  ;;  %v5598_v61 = vld [vmem:[#allocation9 + $0x150] sm:$0xff]  ;;  %v5648_v2 = vld [vmem:[#allocation9 + $0xc0] sm:$0xff] }
 0x33b   :  { %4568 = vtanh.f32 %v951_v47  ;;  %v5640_v47 = vld [vmem:[#allocation9 + $0xd8] sm:$0xff] }
 0x348   :  { %v4569_v10 = vpop.eup %4568 }
 0x349   :  { %v954_v21 = vmul.f32 %v4569_v10, %v953_v3  ;;  %v5656_v3 = vld [vmem:[#allocation9 + $0xa8] sm:$0xff]  ;;  %v5664_v10 = vld [vmem:[#allocation9 + $0x90] sm:$0xff] }
 0x34b   :  { %v5506_v4 = vadd.f32 %v955_v1, %v954_v21  ;;  %v5672_v21 = vld [vmem:[#allocation9 + $0x78] sm:$0xff]  ;;  %v5680_v1 = vld [vmem:[#allocation9 + $0x60] sm:$0xff] }
 0x34d   :  { %6961 = vst [vmem:[#allocation25_spill] sm:$0xff] %v5506_v4  ;;  %1028 = vmatmul.mubr.f32.vlgmr.msra.gmra.mxu0 %v5506_v4  ;;  %4062 = vmatmul.mubr.f32.vlgmr.msra.gmra.mxu1 %v5506_v4 }
 0x34e   :  { %1133 = vmatpush1.msra.mxu0 %v5022_v7  ;;  %4065 = vmatpush3.msra.mxu1 %v5109_v36  ;;  %v6962_v7 = vld [vmem:[#allocation21_spill] sm:$0xff]  ;;  %v6968_v36 = vld [vmem:[#allocation39_spill] sm:$0xff] }
 0x34f   :  { %1134 = vmatprep.subr.mxu0 %v5024_v8  ;;  %4066 = vmatprep.subr.mxu1 %v6943_v19  ;;  %v6963_v8 = vld [vmem:[#allocation19_spill] sm:$0xff] }
 0x350   :  { %1135 = vmatpush1.msra.mxu0 %v5028_v9  ;;  %4067 = vmatpush3.msra.mxu1 %v5128_v42  ;;  %v6964_v9 = vld [vmem:[#allocation20_spill] sm:$0xff] }
 0x351   :  { %1136 = vmatprep.subr.mxu0 %v5032_v11  ;;  %4068 = vmatprep.subr.mxu1 %v6943_v19  ;;  %v6965_v11 = vld [vmem:[#allocation22_spill] sm:$0xff] }
 0x352   :  { %1137 = vmatpush1.msra.mxu0 %v5035_v12  ;;  %4069 = vmatpush3.msra.mxu1 %v5146_v48  ;;  %v5575_v12 = vld [vmem:[#allocation9 + $0x170] sm:$0xff] }
 0x353   :  { %1138 = vmatprep.subr.mxu0 %v5038_v13  ;;  %4070 = vmatprep.subr.mxu1 %v6943_v19 }
 0x354   :  { %1139 = vmatpush1.msra.mxu0 %v5042_v14  ;;  %4071 = vmatpush3.msra.mxu1 %v5154_v50 }
 0x355   :  { %1140 = vmatprep.subr.mxu0 %v5048_v16  ;;  %4072 = vmatprep.subr.mxu1 %v6943_v19  ;;  %v6966_v16 = vld [vmem:[#allocation28_spill] sm:$0xff] }
 0x356   :  { %1141 = vmatpush1.msra.mxu0 %v5051_v17  ;;  %4073 = vmatpush3.msra.mxu1 %v5160_v51 }
 0x357   :  { %1142 = vmatprep.subr.mxu0 %v5054_v18  ;;  %4074 = vmatprep.subr.mxu1 %v6943_v19 }
 0x358   :  { %1143 = vmatpush1.msra.mxu0 %v5059_v20  ;;  %4075 = vmatpush3.msra.mxu1 %v5165_v52 }
 0x359   :  { %1144 = vmatprep.subr.mxu0 %v5065_v22  ;;  %4076 = vmatprep.subr.mxu1 %v6943_v19 }
 0x35a   :  { %1145 = vmatpush1.msra.mxu0 %v5068_v23  ;;  %4077 = vmatpush3.msra.mxu1 %v5172_v53  ;;  %v6967_v23 = vld [vmem:[#allocation29_spill] sm:$0xff] }
 0x35b   :  { %1146 = vmatprep.subr.mxu0 %v5071_v24  ;;  %4078 = vmatprep.subr.mxu1 %v6943_v19 }
 0x35c   :  { %1147 = vmatpush1.msra.mxu0 %v5076_v26  ;;  %4079 = vmatpush3.msra.mxu1 %v5180_v54 }
 0x35d   :  { %1148 = vmatprep.subr.mxu0 %v5082_v28  ;;  %4080 = vmatprep.subr.mxu1 %v6943_v19 }
 0x35e   :  { %1149 = vmatpush1.msra.mxu0 %v5085_v29  ;;  %4081 = vmatpush3.msra.mxu1 %v5186_v55 }
 0x35f   :  { %1150 = vmatprep.subr.mxu0 %v5088_v30  ;;  %4082 = vmatprep.subr.mxu1 %v6943_v19 }
 0x360   :  { %1151 = vmatpush1.msra.mxu0 %v5093_v31  ;;  %4083 = vmatpush3.msra.mxu1 %v5193_v56 }
 0x361   :  { %1152 = vmatprep.subr.mxu0 %v5099_v33  ;;  %4084 = vmatprep.subr.mxu1 %v6943_v19 }
 0x362   :  { %1153 = vmatpush1.msra.mxu0 %v5102_v34  ;;  %4085 = vmatpush3.msra.mxu1 %v5199_v57 }
 0x363   :  { %1154 = vmatprep.subr.mxu0 %v5106_v35  ;;  %4086 = vmatprep.subr.mxu1 %v6943_v19 }
 0x364   :  { %1155 = vmatpush1.msra.mxu0 %v5114_v37  ;;  %4087 = vmatpush3.msra.mxu1 %v5206_v58 }
 0x365   :  { %1156 = vmatprep.subr.mxu0 %v5118_v39  ;;  %4088 = vmatprep.subr.mxu1 %v6943_v19 }
 0x366   :  { %1157 = vmatpush1.msra.mxu0 %v5121_v40  ;;  %4089 = vmatpush3.msra.mxu1 %v5212_v59 }
 0x367   :  { %1158 = vmatprep.subr.mxu0 %v5125_v41  ;;  %4090 = vmatprep.subr.mxu1 %v6943_v19 }
 0x368   :  { %1159 = vmatpush1.msra.mxu0 %v5132_v43  ;;  %4091 = vmatpush3.msra.mxu1 %v5218_v60 }
 0x369   :  { %1160 = vmatprep.subr.mxu0 %v5136_v45  ;;  %4092 = vmatprep.subr.mxu1 %v6943_v19 }
 0x36a   :  { %1161 = vmatpush1.msra.mxu0 %v5139_v46  ;;  %4093 = vmatpush3.msra.mxu1 %v6962_v7  ;;  %v5588_v46 = vld [vmem:[#allocation9 + $0x168] sm:$0xff] }
 0x36b   :  { %1162 = vmatprep.subr.mxu0 %v6963_v8  ;;  %4094 = vmatprep.subr.mxu1 %v6943_v19  ;;  %v5688_v8 = vld [vmem:[#allocation9 + $0x48] sm:$0xff] }
 0x36c   :  { %1163 = vmatpush1.msra.mxu0 %v6964_v9  ;;  %1196 = vmatprep.mubr.f32.mxu0 %v6943_v19  ;;  %v5696_v9 = vld [vmem:[#allocation9 + $0x30] sm:$0xff] }
 0x36d   :  { %4095 = vmatpush3.msra.mxu1 %v6965_v11  ;;  %4096 = vmatprep.mubr.msk.f32.mxu1 %vm4936_vm1, %v6943_v19 }
 0x36e   :  { %1301 = vmatprep.subr.mxu0 %v5575_v12  ;;  %4099 = vmatprep.subr.mxu1 %v6943_v19 }
 0x40d   :  { %v1029_v13 = vpop.f32.mrf.mxu0  ;;  %v1100_v14 = vpop.f32.mrf.mxu1 }
 0x40e   :  { %v1104_v17 = vadd.f32 %v1029_v13, %v6966_v16  ;;  %v1118_v33 = vadd.f32 %v5351_v6, %v1100_v14  ;;  %v5704_v13 = vld [vmem:[#allocation9 + $0x18] sm:$0xff]  ;;  %v5712_v14 = vld [vmem:[#allocation9] sm:$0xff] }
 0x40f   :  { %v4063_v18 = vpop.f32.mrf.mxu1  ;;  %v1031_v22 = vpop.f32.mrf.mxu0  ;;  %6971 = vst [vmem:[#allocation26_spill] sm:$0xff] %v5712_v14  ;;  %v6972_v16 = vld [vmem:[#allocation30_spill] sm:$0xff] }
 0x410   :  { %v3575_v20 = vmul.f32 -1.442695, %v1104_v17  ;;  %v1111_v24 = vadd.f32 %v1031_v22, %v6967_v23  ;;  %v6973_v23 = vld [vmem:[#allocation31_spill] sm:$0xff] }
 0x412   :  { %4570 = vpow2.f32 %v3575_v20  ;;  %v3576_v26 = vmul.f32 -1.442695, %v1111_v24 }
 0x414   :  { %4572 = vpow2.f32 %v3576_v26 }
 0x41f   :  { %v4571_v28 = vpop.eup %4570 }
 0x420   :  { %v1108_v29 = vadd.f32 1.0, %v4571_v28 }
 0x421   :  { %v4573_v30 = vpop.eup %4572 }
 0x422   :  { %4574 = vrcp.f32 %v1108_v29  ;;  %v1115_v31 = vadd.f32 1.0, %v4573_v30 }
 0x424   :  { %4576 = vrcp.f32 %v1115_v31 }
 0x42f   :  { %v4575_v34 = vpop.eup %4574 }
 0x430   :  { %v1119_v35 = vmul.f32 %v4575_v34, %v1118_v33 }
 0x431   :  { %v4577_v39 = vpop.eup %4576 }
 0x432   :  { %v1120_v37 = vadd.f32 %v1119_v35, %v6968_v36  ;;  %v1122_v40 = vsub.f32 1.0, %v4577_v39  ;;  %v1124_v43 = vmul.f32 %v4577_v39, %v5506_v4  ;;  %v6974_v35 = vld [vmem:[#allocation42_spill] sm:$0xff] }
 0x434   :  { %4578 = vtanh.f32 %v1120_v37 }
 0x441   :  { %v4579_v41 = vpop.eup %4578 }
 0x442   :  { %v1123_v42 = vmul.f32 %v4579_v41, %v1122_v40 }
 0x444   :  { %v5584_v45 = vadd.f32 %v1124_v43, %v1123_v42 }
 0x446   :  { %6969 = vst [vmem:[#allocation32_spill] sm:$0xff] %v5584_v45  ;;  %1197 = vmatmul.mubr.f32.vlgmr.msra.gmra.mxu0 %v5584_v45  ;;  %4097 = vmatmul.mubr.f32.vlgmr.msra.gmra.mxu1 %v5584_v45 }
 0x447   :  { %1302 = vmatpush1.msra.mxu0 %v5588_v46  ;;  %4100 = vmatpush3.msra.mxu1 %v5591_v38 }
 0x448   :  { %1303 = vmatprep.subr.mxu0 %v5594_v49  ;;  %4101 = vmatprep.subr.mxu1 %v6943_v19 }
 0x449   :  { %1304 = vmatpush1.msra.mxu0 %v5598_v61  ;;  %4102 = vmatpush3.msra.mxu1 %v5601_v15 }
 0x44a   :  { %1305 = vmatprep.subr.mxu0 %v5604_v63  ;;  %4103 = vmatprep.subr.mxu1 %v6943_v19 }
 0x44b   :  { %1306 = vmatpush1.msra.mxu0 %v5608_v25  ;;  %4104 = vmatpush3.msra.mxu1 %v5146_v48  ;;  %v5628_v48 = vld [vmem:[#allocation9 + $0xf8] sm:$0xff] }
 0x44c   :  { %1307 = vmatprep.subr.mxu0 %v5612_v62  ;;  %4105 = vmatprep.subr.mxu1 %v6943_v19 }
 0x44d   :  { %1308 = vmatpush1.msra.mxu0 %v5616_v27  ;;  %4106 = vmatpush3.msra.mxu1 %v5154_v50  ;;  %v5636_v50 = vld [vmem:[#allocation9 + $0xe0] sm:$0xff] }
 0x44e   :  { %1309 = vmatprep.subr.mxu0 %v5620_v32  ;;  %4107 = vmatprep.subr.mxu1 %v6943_v19 }
 0x44f   :  { %1310 = vmatpush1.msra.mxu0 %v5624_v0  ;;  %4108 = vmatpush3.msra.mxu1 %v5160_v51  ;;  %v5644_v51 = vld [vmem:[#allocation9 + $0xc8] sm:$0xff] }
 0x450   :  { %1311 = vmatprep.subr.mxu0 %v5628_v48  ;;  %4109 = vmatprep.subr.mxu1 %v6943_v19 }
 0x451   :  { %1312 = vmatpush1.msra.mxu0 %v5632_v44  ;;  %4110 = vmatpush3.msra.mxu1 %v5165_v52  ;;  %v5652_v52 = vld [vmem:[#allocation9 + $0xb0] sm:$0xff] }
 0x452   :  { %1313 = vmatprep.subr.mxu0 %v5636_v50  ;;  %4111 = vmatprep.subr.mxu1 %v6943_v19 }
 0x453   :  { %1314 = vmatpush1.msra.mxu0 %v5640_v47  ;;  %4112 = vmatpush3.msra.mxu1 %v5172_v53  ;;  %v5660_v53 = vld [vmem:[#allocation9 + $0x98] sm:$0xff] }
 0x454   :  { %1315 = vmatprep.subr.mxu0 %v5644_v51  ;;  %4113 = vmatprep.subr.mxu1 %v6943_v19 }
 0x455   :  { %1316 = vmatpush1.msra.mxu0 %v5648_v2  ;;  %4114 = vmatpush3.msra.mxu1 %v5180_v54  ;;  %v5668_v54 = vld [vmem:[#allocation9 + $0x80] sm:$0xff] }
 0x456   :  { %1317 = vmatprep.subr.mxu0 %v5652_v52  ;;  %4115 = vmatprep.subr.mxu1 %v6943_v19 }
 0x457   :  { %1318 = vmatpush1.msra.mxu0 %v5656_v3  ;;  %4116 = vmatpush3.msra.mxu1 %v5186_v55  ;;  %v5676_v55 = vld [vmem:[#allocation9 + $0x68] sm:$0xff] }
 0x458   :  { %1319 = vmatprep.subr.mxu0 %v5660_v53  ;;  %4117 = vmatprep.subr.mxu1 %v6943_v19 }
 0x459   :  { %1320 = vmatpush1.msra.mxu0 %v5664_v10  ;;  %4118 = vmatpush3.msra.mxu1 %v5193_v56  ;;  %v5684_v56 = vld [vmem:[#allocation9 + $0x50] sm:$0xff] }
 0x45a   :  { %1321 = vmatprep.subr.mxu0 %v5668_v54  ;;  %4119 = vmatprep.subr.mxu1 %v6943_v19 }
 0x45b   :  { %1322 = vmatpush1.msra.mxu0 %v5672_v21  ;;  %4120 = vmatpush3.msra.mxu1 %v5199_v57  ;;  %v5692_v57 = vld [vmem:[#allocation9 + $0x38] sm:$0xff] }
 0x45c   :  { %1323 = vmatprep.subr.mxu0 %v5676_v55  ;;  %4121 = vmatprep.subr.mxu1 %v6943_v19 }
 0x45d   :  { %1324 = vmatpush1.msra.mxu0 %v5680_v1  ;;  %4122 = vmatpush3.msra.mxu1 %v5206_v58  ;;  %v5700_v58 = vld [vmem:[#allocation9 + $0x20] sm:$0xff] }
 0x45e   :  { %1325 = vmatprep.subr.mxu0 %v5684_v56  ;;  %4123 = vmatprep.subr.mxu1 %v6943_v19 }
 0x45f   :  { %1326 = vmatpush1.msra.mxu0 %v5688_v8  ;;  %4124 = vmatpush3.msra.mxu1 %v5212_v59  ;;  %v5708_v59 = vld [vmem:[#allocation9 + $0x8] sm:$0xff] }
 0x460   :  { %1327 = vmatprep.subr.mxu0 %v5692_v57  ;;  %4125 = vmatprep.subr.mxu1 %v6943_v19  ;;  %6970 = vst [vmem:[#allocation18_spill] sm:$0xff] %v5708_v59 }
 0x461   :  { %1328 = vmatpush1.msra.mxu0 %v5696_v9  ;;  %4126 = vmatpush3.msra.mxu1 %v5218_v60 }
 0x462   :  { %1329 = vmatprep.subr.mxu0 %v5700_v58  ;;  %4127 = vmatprep.subr.mxu1 %v6943_v19 }
 0x463   :  { %1330 = vmatpush1.msra.mxu0 %v5704_v13  ;;  %4128 = vmatpush3.msra.mxu1 %v6962_v7 }
 0x464   :  { %1331 = vmatprep.subr.mxu0 %v5708_v59  ;;  %4129 = vmatprep.subr.mxu1 %v6943_v19 }
 0x465   :  { %1332 = vmatpush1.msra.mxu0 %v5712_v14  ;;  %1365 = vmatprep.mubr.f32.mxu0 %v6943_v19 }
 0x466   :  { %4130 = vmatpush3.msra.mxu1 %v6965_v11  ;;  %4131 = vmatprep.mubr.msk.f32.mxu1 %vm4936_vm1, %v6943_v19 }
 0x467   :  { %1470 = vmatprep.subr.mxu0 %v5575_v12  ;;  %4134 = vmatprep.subr.mxu1 %v6943_v19 }
 0x506   :  { %v1198_v60 = vpop.f32.mrf.mxu0  ;;  %v1269_v7 = vpop.f32.mrf.mxu1 }
 0x507   :  { %v1273_v17 = vadd.f32 %v1198_v60, %v6972_v16  ;;  %v1287_v31 = vadd.f32 %v5351_v6, %v1269_v7  ;;  %v5739_v60 = vld [vmem:[#allocation9 + $0x148] sm:$0xff]  ;;  %v5745_v7 = vld [vmem:[#allocation9 + $0x130] sm:$0xff]  ;;  %v5751_v16 = vld [vmem:[#allocation9 + $0x118] sm:$0xff] }
 0x508   :  { %v4098_v18 = vpop.f32.mrf.mxu1  ;;  %v1200_v22 = vpop.f32.mrf.mxu0 }
 0x509   :  { %v3577_v20 = vmul.f32 -1.442695, %v1273_v17  ;;  %v1280_v24 = vadd.f32 %v1200_v22, %v6973_v23  ;;  %v5757_v17 = vld [vmem:[#allocation9 + $0x100] sm:$0xff]  ;;  %v5763_v18 = vld [vmem:[#allocation9 + $0xe8] sm:$0xff]  ;;  %v5775_v22 = vld [vmem:[#allocation9 + $0xb8] sm:$0xff] }
 0x50a   :  { %v5781_v23 = vld [vmem:[#allocation9 + $0xa0] sm:$0xff] }
 0x50b   :  { %4580 = vpow2.f32 %v3577_v20  ;;  %v3578_v26 = vmul.f32 -1.442695, %v1280_v24  ;;  %v5769_v20 = vld [vmem:[#allocation9 + $0xd0] sm:$0xff]  ;;  %v5787_v24 = vld [vmem:[#allocation9 + $0x88] sm:$0xff] }
 0x50d   :  { %4582 = vpow2.f32 %v3578_v26  ;;  %v5793_v26 = vld [vmem:[#allocation9 + $0x70] sm:$0xff] }
 0x518   :  { %v4581_v11 = vpop.eup %4580 }
 0x519   :  { %v1277_v28 = vadd.f32 1.0, %v4581_v11  ;;  %v5799_v11 = vld [vmem:[#allocation9 + $0x58] sm:$0xff] }
 0x51a   :  { %v4583_v29 = vpop.eup %4582 }
 0x51b   :  { %4584 = vrcp.f32 %v1277_v28  ;;  %v1284_v30 = vadd.f32 1.0, %v4583_v29  ;;  %v5805_v28 = vld [vmem:[#allocation9 + $0x40] sm:$0xff]  ;;  %v5811_v29 = vld [vmem:[#allocation9 + $0x28] sm:$0xff] }
 0x51c   :  { %6976 = vst [vmem:[#allocation40_spill] sm:$0xff] %v5811_v29 }
 0x51d   :  { %4586 = vrcp.f32 %v1284_v30  ;;  %v5818_v30 = vld [vmem:[#allocation9 + $0x10] sm:$0xff] }
 0x51e   :  { %6977 = vst [vmem:[#allocation21_spill] sm:$0xff] %v5818_v30 }
 0x528   :  { %v4585_v33 = vpop.eup %4584 }
 0x529   :  { %v1288_v34 = vmul.f32 %v4585_v33, %v1287_v31 }
 0x52a   :  { %v4587_v37 = vpop.eup %4586 }
 0x52b   :  { %v1289_v36 = vadd.f32 %v1288_v34, %v6974_v35  ;;  %v1291_v39 = vsub.f32 1.0, %v4587_v37  ;;  %v1293_v42 = vmul.f32 %v4587_v37, %v5584_v45  ;;  %v6978_v34 = vld [vmem:[#allocation33_spill] sm:$0xff] }
 0x52d   :  { %4588 = vtanh.f32 %v1289_v36 }
 0x53a   :  { %v4589_v40 = vpop.eup %4588 }
 0x53b   :  { %v1292_v41 = vmul.f32 %v4589_v40, %v1291_v39  ;;  %v6979_v40 = vld [vmem:[#allocation34_spill] sm:$0xff] }
 0x53d   :  { %v5726_v43 = vadd.f32 %v1293_v42, %v1292_v41 }
 0x53f   :  { %6975 = vst [vmem:[#allocation27_spill] sm:$0xff] %v5726_v43  ;;  %1366 = vmatmul.mubr.f32.vlgmr.msra.gmra.mxu0 %v5726_v43  ;;  %4132 = vmatmul.mubr.f32.vlgmr.msra.gmra.mxu1 %v5726_v43 }
 0x540   :  { %1471 = vmatpush1.msra.mxu0 %v5588_v46  ;;  %4135 = vmatpush3.msra.mxu1 %v5591_v38 }
 0x541   :  { %1472 = vmatprep.subr.mxu0 %v5594_v49  ;;  %4136 = vmatprep.subr.mxu1 %v6943_v19 }
 0x542   :  { %1473 = vmatpush1.msra.mxu0 %v5598_v61  ;;  %4137 = vmatpush3.msra.mxu1 %v5601_v15 }
 0x543   :  { %1474 = vmatprep.subr.mxu0 %v5604_v63  ;;  %4138 = vmatprep.subr.mxu1 %v6943_v19 }
 0x544   :  { %1475 = vmatpush1.msra.mxu0 %v5608_v25  ;;  %4139 = vmatpush3.msra.mxu1 %v5739_v60 }
 0x545   :  { %1476 = vmatprep.subr.mxu0 %v5612_v62  ;;  %4140 = vmatprep.subr.mxu1 %v6943_v19 }
 0x546   :  { %1477 = vmatpush1.msra.mxu0 %v5616_v27  ;;  %4141 = vmatpush3.msra.mxu1 %v5745_v7 }
 0x547   :  { %1478 = vmatprep.subr.mxu0 %v5620_v32  ;;  %4142 = vmatprep.subr.mxu1 %v6943_v19 }
 0x548   :  { %1479 = vmatpush1.msra.mxu0 %v5624_v0  ;;  %4143 = vmatpush3.msra.mxu1 %v5751_v16 }
 0x549   :  { %1480 = vmatprep.subr.mxu0 %v5628_v48  ;;  %4144 = vmatprep.subr.mxu1 %v6943_v19 }
 0x54a   :  { %1481 = vmatpush1.msra.mxu0 %v5632_v44  ;;  %4145 = vmatpush3.msra.mxu1 %v5757_v17 }
 0x54b   :  { %1482 = vmatprep.subr.mxu0 %v5636_v50  ;;  %4146 = vmatprep.subr.mxu1 %v6943_v19 }
 0x54c   :  { %1483 = vmatpush1.msra.mxu0 %v5640_v47  ;;  %4147 = vmatpush3.msra.mxu1 %v5763_v18 }
 0x54d   :  { %1484 = vmatprep.subr.mxu0 %v5644_v51  ;;  %4148 = vmatprep.subr.mxu1 %v6943_v19 }
 0x54e   :  { %1485 = vmatpush1.msra.mxu0 %v5648_v2  ;;  %4149 = vmatpush3.msra.mxu1 %v5769_v20 }
 0x54f   :  { %1486 = vmatprep.subr.mxu0 %v5652_v52  ;;  %4150 = vmatprep.subr.mxu1 %v6943_v19 }
 0x550   :  { %1487 = vmatpush1.msra.mxu0 %v5656_v3  ;;  %4151 = vmatpush3.msra.mxu1 %v5775_v22 }
 0x551   :  { %1488 = vmatprep.subr.mxu0 %v5660_v53  ;;  %4152 = vmatprep.subr.mxu1 %v6943_v19 }
 0x552   :  { %1489 = vmatpush1.msra.mxu0 %v5664_v10  ;;  %4153 = vmatpush3.msra.mxu1 %v5781_v23 }
 0x553   :  { %1490 = vmatprep.subr.mxu0 %v5668_v54  ;;  %4154 = vmatprep.subr.mxu1 %v6943_v19 }
 0x554   :  { %1491 = vmatpush1.msra.mxu0 %v5672_v21  ;;  %4155 = vmatpush3.msra.mxu1 %v5787_v24 }
 0x555   :  { %1492 = vmatprep.subr.mxu0 %v5676_v55  ;;  %4156 = vmatprep.subr.mxu1 %v6943_v19 }
 0x556   :  { %1493 = vmatpush1.msra.mxu0 %v5680_v1  ;;  %4157 = vmatpush3.msra.mxu1 %v5793_v26 }
 0x557   :  { %1494 = vmatprep.subr.mxu0 %v5684_v56  ;;  %4158 = vmatprep.subr.mxu1 %v6943_v19 }
 0x558   :  { %1495 = vmatpush1.msra.mxu0 %v5688_v8  ;;  %4159 = vmatpush3.msra.mxu1 %v5799_v11 }
 0x559   :  { %1496 = vmatprep.subr.mxu0 %v5692_v57  ;;  %4160 = vmatprep.subr.mxu1 %v6943_v19 }
 0x55a   :  { %1497 = vmatpush1.msra.mxu0 %v5696_v9  ;;  %4161 = vmatpush3.msra.mxu1 %v5805_v28 }
 0x55b   :  { %1498 = vmatprep.subr.mxu0 %v5700_v58  ;;  %4162 = vmatprep.subr.mxu1 %v6943_v19 }
 0x55c   :  { %1499 = vmatpush1.msra.mxu0 %v5704_v13  ;;  %4163 = vmatpush3.msra.mxu1 %v5811_v29  ;;  %v6980_v29 = vld [vmem:[#allocation41_spill] sm:$0xff] }
 0x55d   :  { %1500 = vmatprep.subr.mxu0 %v5708_v59  ;;  %4164 = vmatprep.subr.mxu1 %v6943_v19 }
 0x55e   :  { %1501 = vmatpush1.msra.mxu0 %v5712_v14  ;;  %1534 = vmatprep.mubr.f32.mxu0 %v6943_v19 }
 0x55f   :  { %4165 = vmatpush3.msra.mxu1 %v5818_v30  ;;  %4166 = vmatprep.mubr.msk.f32.mxu1 %vm4936_vm1, %v6943_v19 }
 0x560   :  { %1639 = vmatprep.subr.mxu0 %v5575_v12  ;;  %4169 = vmatprep.subr.mxu1 %v6943_v19 }
 0x5ff   :  { %v1367_v31 = vpop.f32.mrf.mxu0  ;;  %v1438_v33 = vpop.f32.mrf.mxu1 }
 0x600   :  { %v1442_v35 = vadd.f32 %v1367_v31, %v6978_v34  ;;  %v1456_v12 = vadd.f32 %v5351_v6, %v1438_v33  ;;  %v6982_v6 = vld [vmem:[#allocation40_spill] sm:$0xff]  ;;  %v1839_v33 = vld [vmem:[#allocation10 + $0xd8] sm:$0xff] }
 0x601   :  { %v4133_v36 = vpop.f32.mrf.mxu1  ;;  %v1369_v39 = vpop.f32.mrf.mxu0 }
 0x602   :  { %v3579_v37 = vmul.f32 -1.442695, %v1442_v35  ;;  %v1449_v41 = vadd.f32 %v1369_v39, %v6979_v40 }
 0x604   :  { %4590 = vpow2.f32 %v3579_v37  ;;  %v3580_v42 = vmul.f32 -1.442695, %v1449_v41  ;;  %v1837_v41 = vld [vmem:[#allocation10 + $0xc8] sm:$0xff] }
 0x606   :  { %4592 = vpow2.f32 %v3580_v42  ;;  %v1838_v42 = vld [vmem:[#allocation10 + $0xd0] sm:$0xff] }
 0x611   :  { %v4591_v45 = vpop.eup %4590 }
 0x612   :  { %v1446_v4 = vadd.f32 1.0, %v4591_v45  ;;  %v6985_v45 = vld [vmem:[#allocation21_spill] sm:$0xff] }
 0x613   :  { %v4593_v5 = vpop.eup %4592 }
 0x614   :  { %4594 = vrcp.f32 %v1446_v4  ;;  %v1453_v30 = vadd.f32 1.0, %v4593_v5  ;;  %v6983_v5 = vld [vmem:[#allocation18_spill] sm:$0xff] }
 0x615   :  { %v6984_v4 = vld [vmem:[#allocation26_spill] sm:$0xff] }
 0x616   :  { %4596 = vrcp.f32 %v1453_v30  ;;  %v1841_v30 = vld [vmem:[#allocation10 + $0xe8] sm:$0xff] }
 0x621   :  { %v4595_v14 = vpop.eup %4594 }
 0x622   :  { %v1457_v59 = vmul.f32 %v4595_v14, %v1456_v12  ;;  %v1852_v14 = vld [vmem:[#allocation10 + $0x140] sm:$0xff] }
 0x623   :  { %v4597_v34 = vpop.eup %4596  ;;  %v1836_v12 = vld [vmem:[#allocation10 + $0xc0] sm:$0xff] }
 0x624   :  { %v1458_v31 = vadd.f32 %v1457_v59, %v6980_v29  ;;  %v1460_v35 = vsub.f32 1.0, %v4597_v34  ;;  %v1462_v39 = vmul.f32 %v4597_v34, %v5726_v43  ;;  %v1854_v59 = vld [vmem:[#allocation10 + $0x150] sm:$0xff]  ;;  %v1840_v29 = vld [vmem:[#allocation10 + $0xe0] sm:$0xff]  ;;  %v1835_v34 = vld [vmem:[#allocation10 + $0xb8] sm:$0xff] }
 0x626   :  { %4598 = vtanh.f32 %v1458_v31  ;;  %v1834_v31 = vld [vmem:[#allocation10 + $0xb0] sm:$0xff] }
 0x633   :  { %v4599_v36 = vpop.eup %4598 }
 0x634   :  { %v1461_v37 = vmul.f32 %v4599_v36, %v1460_v35  ;;  %v1833_v35 = vld [vmem:[#allocation10 + $0xa8] sm:$0xff]  ;;  %v1831_v36 = vld [vmem:[#allocation10 + $0x98] sm:$0xff] }
 0x636   :  { %v5830_v40 = vadd.f32 %v1462_v39, %v1461_v37  ;;  %v1832_v37 = vld [vmem:[#allocation10 + $0xa0] sm:$0xff]  ;;  %v1830_v39 = vld [vmem:[#allocation10 + $0x90] sm:$0xff] }
 0x638   :  { %6981 = vst [vmem:[#allocation19_spill] sm:$0xff] %v5830_v40  ;;  %1535 = vmatmul.mubr.f32.vlgmr.msra.gmra.mxu0 %v5830_v40  ;;  %4167 = vmatmul.mubr.f32.vlgmr.msra.gmra.mxu1 %v5830_v40 }
 0x639   :  { %1640 = vmatpush1.msra.mxu0 %v5588_v46  ;;  %4170 = vmatpush3.msra.mxu1 %v5591_v38  ;;  %v1858_v46 = vld [vmem:[#allocation10 + $0x170] sm:$0xff]  ;;  %v1859_v38 = vld [vmem:[#allocation10 + $0x178] sm:$0xff] }
 0x63a   :  { %1641 = vmatprep.subr.mxu0 %v5594_v49  ;;  %4171 = vmatprep.subr.mxu1 %v6943_v19 }
 0x63b   :  { %1642 = vmatpush1.msra.mxu0 %v5598_v61  ;;  %4172 = vmatpush3.msra.mxu1 %v5601_v15  ;;  %v6986_v15 = vld [vmem:[#allocation35_spill] sm:$0xff] }
 0x63c   :  { %1643 = vmatprep.subr.mxu0 %v5604_v63  ;;  %4173 = vmatprep.subr.mxu1 %v6943_v19 }
 0x63d   :  { %1644 = vmatpush1.msra.mxu0 %v5608_v25  ;;  %4174 = vmatpush3.msra.mxu1 %v5739_v60  ;;  %v1853_v60 = vld [vmem:[#allocation10 + $0x148] sm:$0xff] }
 0x63e   :  { %1645 = vmatprep.subr.mxu0 %v5612_v62  ;;  %4175 = vmatprep.subr.mxu1 %v6943_v19 }
 0x63f   :  { %1646 = vmatpush1.msra.mxu0 %v5616_v27  ;;  %4176 = vmatpush3.msra.mxu1 %v5745_v7  ;;  %v1851_v7 = vld [vmem:[#allocation10 + $0x138] sm:$0xff] }
 0x640   :  { %1647 = vmatprep.subr.mxu0 %v5620_v32  ;;  %4177 = vmatprep.subr.mxu1 %v6943_v19  ;;  %v6987_v32 = vld [vmem:[#allocation36_spill] sm:$0xff] }
 0x641   :  { %1648 = vmatpush1.msra.mxu0 %v5624_v0  ;;  %4178 = vmatpush3.msra.mxu1 %v5751_v16  ;;  %v6990_v16 = vld [vmem:[#allocation45_spill] sm:$0xff] }
 0x642   :  { %1649 = vmatprep.subr.mxu0 %v5628_v48  ;;  %4179 = vmatprep.subr.mxu1 %v6943_v19 }
 0x643   :  { %1650 = vmatpush1.msra.mxu0 %v5632_v44  ;;  %4180 = vmatpush3.msra.mxu1 %v5757_v17  ;;  %v1849_v17 = vld [vmem:[#allocation10 + $0x128] sm:$0xff] }
 0x644   :  { %1651 = vmatprep.subr.mxu0 %v5636_v50  ;;  %4181 = vmatprep.subr.mxu1 %v6943_v19 }
 0x645   :  { %1652 = vmatpush1.msra.mxu0 %v5640_v47  ;;  %4182 = vmatpush3.msra.mxu1 %v5763_v18  ;;  %v1850_v18 = vld [vmem:[#allocation10 + $0x130] sm:$0xff] }
 0x646   :  { %1653 = vmatprep.subr.mxu0 %v5644_v51  ;;  %4183 = vmatprep.subr.mxu1 %v6943_v19 }
 0x647   :  { %1654 = vmatpush1.msra.mxu0 %v5648_v2  ;;  %4184 = vmatpush3.msra.mxu1 %v5769_v20  ;;  %v5904_v2 = vld [vmem:[%s6844_s4] ss:$0 sm:$0xff]  ;;  %v1848_v20 = vld [vmem:[#allocation10 + $0x120] sm:$0xff] }
 0x648   :  { %1655 = vmatprep.subr.mxu0 %v5652_v52  ;;  %4185 = vmatprep.subr.mxu1 %v6943_v19 }
 0x649   :  { %1656 = vmatpush1.msra.mxu0 %v5656_v3  ;;  %4186 = vmatpush3.msra.mxu1 %v5775_v22  ;;  %v1846_v22 = vld [vmem:[#allocation10 + $0x110] sm:$0xff] }
 0x64a   :  { %1657 = vmatprep.subr.mxu0 %v5660_v53  ;;  %4187 = vmatprep.subr.mxu1 %v6943_v19 }
 0x64b   :  { %1658 = vmatpush1.msra.mxu0 %v5664_v10  ;;  %4188 = vmatpush3.msra.mxu1 %v5781_v23  ;;  %v6988_v10 = vld [vmem:[#allocation44_spill] sm:$0xff]  ;;  %v1847_v23 = vld [vmem:[#allocation10 + $0x118] sm:$0xff] }
 0x64c   :  { %1659 = vmatprep.subr.mxu0 %v5668_v54  ;;  %4189 = vmatprep.subr.mxu1 %v6943_v19 }
 0x64d   :  { %1660 = vmatpush1.msra.mxu0 %v5672_v21  ;;  %4190 = vmatpush3.msra.mxu1 %v5787_v24  ;;  %v1845_v24 = vld [vmem:[#allocation10 + $0x108] sm:$0xff] }
 0x64e   :  { %1661 = vmatprep.subr.mxu0 %v5676_v55  ;;  %4191 = vmatprep.subr.mxu1 %v6943_v19 }
 0x64f   :  { %1662 = vmatpush1.msra.mxu0 %v5680_v1  ;;  %4192 = vmatpush3.msra.mxu1 %v5793_v26  ;;  %v1843_v26 = vld [vmem:[#allocation10 + $0xf8] sm:$0xff] }
 0x650   :  { %1663 = vmatprep.subr.mxu0 %v5684_v56  ;;  %4193 = vmatprep.subr.mxu1 %v6943_v19 }
 0x651   :  { %1664 = vmatpush1.msra.mxu0 %v5688_v8  ;;  %4194 = vmatpush3.msra.mxu1 %v5799_v11  ;;  %v1844_v11 = vld [vmem:[#allocation10 + $0x100] sm:$0xff] }
 0x652   :  { %1665 = vmatprep.subr.mxu0 %v5692_v57  ;;  %4195 = vmatprep.subr.mxu1 %v6943_v19 }
 0x653   :  { %1666 = vmatpush1.msra.mxu0 %v5696_v9  ;;  %4196 = vmatpush3.msra.mxu1 %v5805_v28  ;;  %v1857_v9 = vld [vmem:[#allocation10 + $0x168] sm:$0xff]  ;;  %v1842_v28 = vld [vmem:[#allocation10 + $0xf0] sm:$0xff] }
 0x654   :  { %1667 = vmatprep.subr.mxu0 %v5700_v58  ;;  %4197 = vmatprep.subr.mxu1 %v6943_v19  ;;  %v1855_v58 = vld [vmem:[#allocation10 + $0x158] sm:$0xff] }
 0x655   :  { %1668 = vmatpush1.msra.mxu0 %v5704_v13  ;;  %4198 = vmatpush3.msra.mxu1 %v6982_v6  ;;  %v1856_v13 = vld [vmem:[#allocation10 + $0x160] sm:$0xff] }
 0x656   :  { %1669 = vmatprep.subr.mxu0 %v6983_v5  ;;  %4199 = vmatprep.subr.mxu1 %v6943_v19  ;;  %v1828_v6 = vld [vmem:[#allocation10 + $0x80] sm:$0xff]  ;;  %v1829_v5 = vld [vmem:[#allocation10 + $0x88] sm:$0xff] }
 0x657   :  { %1670 = vmatpush1.msra.mxu0 %v6984_v4  ;;  %4200 = vmatpush3.msra.mxu1 %v6985_v45  ;;  %v1827_v4 = vld [vmem:[#allocation10 + $0x78] sm:$0xff]  ;;  %v1825_v45 = vld [vmem:[#allocation10 + $0x68] sm:$0xff] }
 0x658   :  { %1703 = vmatprep.mubr.f32.mxu0 %v6943_v19  ;;  %4201 = vmatprep.mubr.msk.f32.mxu1 %vm4936_vm1, %v6943_v19 }
 0x659   :  { %1877 = vmatprep.subr.mxu0 %v1858_v46  ;;  %4204 = vmatprep.subr.mxu1 %v1859_v38  ;;  %v1826_v46 = vld [vmem:[#allocation10 + $0x70] sm:$0xff] }
 0x6f8   :  { %v1536_v49 = vpop.f32.mrf.mxu0  ;;  %v1607_v61 = vpop.f32.mrf.mxu1 }
 0x6f9   :  { %v1611_v63 = vadd.f32 %v1536_v49, %v6986_v15  ;;  %v1625_v52 = vadd.f32 %v5904_v2, %v1607_v61  ;;  %v1822_v49 = vld [vmem:[#allocation10 + $0x50] sm:$0xff]  ;;  %v1823_v61 = vld [vmem:[#allocation10 + $0x58] sm:$0xff]  ;;  %v1821_v15 = vld [vmem:[#allocation10 + $0x48] sm:$0xff] }
 0x6fa   :  { %v4168_v25 = vpop.f32.mrf.mxu1  ;;  %v1538_v27 = vpop.f32.mrf.mxu0 }
 0x6fb   :  { %v3581_v62 = vmul.f32 -1.442695, %v1611_v63  ;;  %v1618_v0 = vadd.f32 %v1538_v27, %v6987_v32  ;;  %v1819_v63 = vld [vmem:[#allocation10 + $0x38] sm:$0xff]  ;;  %v1820_v25 = vld [vmem:[#allocation10 + $0x40] sm:$0xff]  ;;  %v1817_v32 = vld [vmem:[#allocation10 + $0x28] sm:$0xff] }
 0x6fc   :  { %v1816_v27 = vld [vmem:[#allocation10 + $0x20] sm:$0xff] }
 0x6fd   :  { %4600 = vpow2.f32 %v3581_v62  ;;  %v3582_v48 = vmul.f32 -1.442695, %v1618_v0  ;;  %v1818_v62 = vld [vmem:[#allocation10 + $0x30] sm:$0xff]  ;;  %v1815_v0 = vld [vmem:[#allocation10 + $0x18] sm:$0xff] }
 0x6ff   :  { %4602 = vpow2.f32 %v3582_v48  ;;  %v1813_v48 = vld [vmem:[#allocation10 + $0x8] sm:$0xff] }
 0x70a   :  { %v4601_v44 = vpop.eup %4600 }
 0x70b   :  { %v1615_v50 = vadd.f32 1.0, %v4601_v44  ;;  %v1814_v44 = vld [vmem:[#allocation10 + $0x10] sm:$0xff] }
 0x70c   :  { %v4603_v47 = vpop.eup %4602 }
 0x70d   :  { %4604 = vrcp.f32 %v1615_v50  ;;  %v1622_v51 = vadd.f32 1.0, %v4603_v47  ;;  %v1812_v50 = vld [vmem:[#allocation10] sm:$0xff]  ;;  %v6991_v47 = vld [vmem:[#allocation24_spill] sm:$0xff] }
 0x70f   :  { %4606 = vrcp.f32 %v1622_v51  ;;  %v6992_v51 = vld [vmem:[#allocation25_spill] sm:$0xff] }
 0x71a   :  { %v4605_v3 = vpop.eup %4604 }
 0x71b   :  { %v1626_v53 = vmul.f32 %v4605_v3, %v1625_v52  ;;  %v6993_v52 = vld [vmem:[#allocation32_spill] sm:$0xff] }
 0x71c   :  { %v4607_v21 = vpop.eup %4606  ;;  %v5936_v3 = vld [vmem:[#allocation12 + $0x170] sm:$0xff] }
 0x71d   :  { %v1627_v54 = vadd.f32 %v1626_v53, %v6988_v10  ;;  %v1629_v55 = vsub.f32 1.0, %v4607_v21  ;;  %v1631_v8 = vmul.f32 %v4607_v21, %v5830_v40  ;;  %6994 = vst [vmem:[#allocation22_spill] sm:$0xff] %v5936_v3  ;;  %v5939_v53 = vld [vmem:[#allocation12 + $0x168] sm:$0xff]  ;;  %v5942_v10 = vld [vmem:[#allocation12 + $0x158] sm:$0xff]  ;;  %v5948_v21 = vld [vmem:[#allocation12 + $0x140] sm:$0xff] }
 0x71f   :  { %4608 = vtanh.f32 %v1627_v54  ;;  %v5945_v54 = vld [vmem:[#allocation12 + $0x150] sm:$0xff] }
 0x72c   :  { %v4609_v1 = vpop.eup %4608 }
 0x72d   :  { %v1630_v56 = vmul.f32 %v4609_v1, %v1629_v55  ;;  %v5951_v55 = vld [vmem:[#allocation12 + $0x138] sm:$0xff]  ;;  %v5954_v1 = vld [vmem:[#allocation12 + $0x128] sm:$0xff] }
 0x72f   :  { %v5909_v57 = vadd.f32 %v1631_v8, %v1630_v56  ;;  %v5957_v56 = vld [vmem:[#allocation12 + $0x120] sm:$0xff]  ;;  %v5960_v8 = vld [vmem:[#allocation12 + $0x110] sm:$0xff] }
 0x731   :  { %6989 = vst [vmem:[#allocation20_spill] sm:$0xff] %v5909_v57  ;;  %1704 = vmatmul.mubr.f32.vlgmr.msra.gmra.mxu0 %v5909_v57  ;;  %4202 = vmatmul.mubr.f32.vlgmr.msra.gmra.mxu1 %v5909_v57 }
 0x732   :  { %1878 = vmatpush1.msra.mxu0 %v1857_v9  ;;  %4205 = vmatpush3.msra.mxu1 %v1859_v38  ;;  %v1824_v38 = vld [vmem:[#allocation10 + $0x60] sm:$0xff]  ;;  %v5963_v9 = vld [vmem:[#allocation12 + $0x108] sm:$0xff] }
 0x733   :  { %1879 = vmatprep.subr.mxu0 %v1855_v58  ;;  %4206 = vmatprep.subr.mxu1 %v1856_v13  ;;  %v5966_v58 = vld [vmem:[#allocation12 + $0xf8] sm:$0xff] }
 0x734   :  { %4236 = vmatprep.mubr.f32.mxu1 %v6990_v16  ;;  %1880 = vmatpush1.msra.mxu0 %v1854_v59  ;;  %v5972_v59 = vld [vmem:[#allocation12 + $0xe0] sm:$0xff] }
 0x735   :  { %4207 = vmatpush3.msra.mxu1 %v1856_v13  ;;  %1881 = vmatprep.subr.mxu0 %v1852_v14  ;;  %v5969_v13 = vld [vmem:[#allocation12 + $0xf0] sm:$0xff]  ;;  %v5975_v14 = vld [vmem:[#allocation12 + $0xd8] sm:$0xff] }
 0x736   :  { %4208 = vmatprep.subr.mxu1 %v1853_v60  ;;  %1882 = vmatpush1.msra.mxu0 %v1851_v7  ;;  %v5981_v7 = vld [vmem:[#allocation12 + $0xc0] sm:$0xff] }
 0x737   :  { %4209 = vmatpush3.msra.mxu1 %v1853_v60  ;;  %1883 = vmatprep.subr.mxu0 %v1849_v17  ;;  %v5978_v60 = vld [vmem:[#allocation12 + $0xc8] sm:$0xff]  ;;  %v5984_v17 = vld [vmem:[#allocation12 + $0xb0] sm:$0xff] }
 0x738   :  { %4210 = vmatprep.subr.mxu1 %v1850_v18  ;;  %1884 = vmatpush1.msra.mxu0 %v1848_v20  ;;  %v5990_v20 = vld [vmem:[#allocation12 + $0x98] sm:$0xff] }
 0x739   :  { %4211 = vmatpush3.msra.mxu1 %v1850_v18  ;;  %1885 = vmatprep.subr.mxu0 %v1846_v22  ;;  %v5987_v18 = vld [vmem:[#allocation12 + $0xa8] sm:$0xff]  ;;  %v5993_v22 = vld [vmem:[#allocation12 + $0x90] sm:$0xff] }
 0x73a   :  { %4212 = vmatprep.subr.mxu1 %v1847_v23  ;;  %1886 = vmatpush1.msra.mxu0 %v1845_v24  ;;  %v5999_v24 = vld [vmem:[#allocation12 + $0x78] sm:$0xff] }
 0x73b   :  { %4213 = vmatpush3.msra.mxu1 %v1847_v23  ;;  %1887 = vmatprep.subr.mxu0 %v1843_v26  ;;  %v5996_v23 = vld [vmem:[#allocation12 + $0x80] sm:$0xff]  ;;  %v6002_v26 = vld [vmem:[#allocation12 + $0x68] sm:$0xff] }
 0x73c   :  { %4214 = vmatprep.subr.mxu1 %v1844_v11  ;;  %1888 = vmatpush1.msra.mxu0 %v1842_v28  ;;  %v6008_v28 = vld [vmem:[#allocation12 + $0x50] sm:$0xff] }
 0x73d   :  { %4215 = vmatpush3.msra.mxu1 %v1844_v11  ;;  %1889 = vmatprep.subr.mxu0 %v1840_v29  ;;  %v6005_v11 = vld [vmem:[#allocation12 + $0x60] sm:$0xff]  ;;  %v6011_v29 = vld [vmem:[#allocation12 + $0x48] sm:$0xff] }
 0x73e   :  { %4216 = vmatprep.subr.mxu1 %v1841_v30  ;;  %1890 = vmatpush1.msra.mxu0 %v1839_v33  ;;  %v6017_v33 = vld [vmem:[#allocation12 + $0x30] sm:$0xff] }
 0x73f   :  { %4217 = vmatpush3.msra.mxu1 %v1841_v30  ;;  %1891 = vmatprep.subr.mxu0 %v1837_v41  ;;  %v6014_v30 = vld [vmem:[#allocation12 + $0x38] sm:$0xff]  ;;  %v6020_v41 = vld [vmem:[#allocation12 + $0x20] sm:$0xff] }
 0x740   :  { %4218 = vmatprep.subr.mxu1 %v1838_v42  ;;  %1892 = vmatpush1.msra.mxu0 %v1836_v12  ;;  %v6026_v12 = vld [vmem:[#allocation12 + $0x8] sm:$0xff] }
 0x741   :  { %4219 = vmatpush3.msra.mxu1 %v1838_v42  ;;  %1893 = vmatprep.subr.mxu0 %v1834_v31  ;;  %v6023_v42 = vld [vmem:[#allocation12 + $0x18] sm:$0xff]  ;;  %6996 = vst [vmem:[#allocation29_spill] sm:$0xff] %v6026_v12  ;;  %v6028_v31 = vld [vmem:[#allocation12] sm:$0xff] }
 0x742   :  { %4220 = vmatprep.subr.mxu1 %v1835_v34  ;;  %1894 = vmatpush1.msra.mxu0 %v1833_v35  ;;  %6995 = vst [vmem:[#allocation28_spill] sm:$0xff] %v6023_v42  ;;  %6997 = vst [vmem:[#allocation39_spill] sm:$0xff] %v6028_v31  ;;  %v6033_v35 = vld [vmem:[#allocation12 + $0x160] sm:$0xff] }
 0x743   :  { %4221 = vmatpush3.msra.mxu1 %v1835_v34  ;;  %1895 = vmatprep.subr.mxu0 %v1831_v36  ;;  %v6031_v34 = vld [vmem:[#allocation12 + $0x178] sm:$0xff]  ;;  %v6038_v36 = vld [vmem:[#allocation12 + $0x148] sm:$0xff] }
 0x744   :  { %4222 = vmatprep.subr.mxu1 %v1832_v37  ;;  %1896 = vmatpush1.msra.mxu0 %v1830_v39  ;;  %v6047_v39 = vld [vmem:[#allocation12 + $0x118] sm:$0xff] }
 0x745   :  { %4223 = vmatpush3.msra.mxu1 %v1832_v37  ;;  %1897 = vmatprep.subr.mxu0 %v1828_v6  ;;  %v6043_v37 = vld [vmem:[#allocation12 + $0x130] sm:$0xff]  ;;  %v6051_v6 = vld [vmem:[#allocation12 + $0x100] sm:$0xff] }
 0x746   :  { %4224 = vmatprep.subr.mxu1 %v1829_v5  ;;  %1898 = vmatpush1.msra.mxu0 %v1827_v4  ;;  %v6059_v4 = vld [vmem:[#allocation12 + $0xd0] sm:$0xff] }
 0x747   :  { %4225 = vmatpush3.msra.mxu1 %v1829_v5  ;;  %1899 = vmatprep.subr.mxu0 %v1825_v45  ;;  %v6055_v5 = vld [vmem:[#allocation12 + $0xe8] sm:$0xff]  ;;  %v6063_v45 = vld [vmem:[#allocation12 + $0xb8] sm:$0xff] }
 0x748   :  { %4226 = vmatprep.subr.mxu1 %v1826_v46  ;;  %1900 = vmatpush1.msra.mxu0 %v1824_v38  ;;  %v6071_v38 = vld [vmem:[#allocation12 + $0x88] sm:$0xff] }
 0x749   :  { %4227 = vmatpush3.msra.mxu1 %v1826_v46  ;;  %1901 = vmatprep.subr.mxu0 %v1822_v49  ;;  %v6067_v46 = vld [vmem:[#allocation12 + $0xa0] sm:$0xff]  ;;  %v6075_v49 = vld [vmem:[#allocation12 + $0x70] sm:$0xff] }
 0x74a   :  { %4228 = vmatprep.subr.mxu1 %v1823_v61  ;;  %1902 = vmatpush1.msra.mxu0 %v1821_v15  ;;  %v6083_v15 = vld [vmem:[#allocation12 + $0x40] sm:$0xff] }
 0x74b   :  { %4229 = vmatpush3.msra.mxu1 %v1823_v61  ;;  %1903 = vmatprep.subr.mxu0 %v1819_v63  ;;  %v6079_v61 = vld [vmem:[#allocation12 + $0x58] sm:$0xff]  ;;  %v6087_v63 = vld [vmem:[#allocation12 + $0x28] sm:$0xff] }
 0x74c   :  { %4230 = vmatprep.subr.mxu1 %v1820_v25  ;;  %1904 = vmatpush1.msra.mxu0 %v1818_v62  ;;  %6998 = vst [vmem:[#allocation30_spill] sm:$0xff] %v6087_v63 }
 0x74d   :  { %4231 = vmatpush3.msra.mxu1 %v1820_v25  ;;  %1905 = vmatprep.subr.mxu0 %v1816_v27  ;;  %v6091_v25 = vld [vmem:[#allocation12 + $0x10] sm:$0xff] }
 0x74e   :  { %4232 = vmatprep.subr.mxu1 %v1817_v32  ;;  %1906 = vmatpush1.msra.mxu0 %v1815_v0  ;;  %6999 = vst [vmem:[#allocation31_spill] sm:$0xff] %v6091_v25 }
 0x74f   :  { %4233 = vmatpush3.msra.mxu1 %v1817_v32  ;;  %1907 = vmatprep.subr.mxu0 %v1813_v48  ;;  %v7000_v32 = vld [vmem:[#allocation37_spill] sm:$0xff] }
 0x750   :  { %4234 = vmatprep.subr.mxu1 %v1814_v44  ;;  %1908 = vmatpush1.msra.mxu0 %v1812_v50 }
 0x751   :  { %1941 = vmatprep.mubr.f32.mxu0 %v6943_v19  ;;  %4235 = vmatpush3.msra.mxu1 %v1814_v44 }
 0x752   :  { %1942 = vmatmul.mubr.f32.vlgmr.msra.gmra.mxu0 %v6990_v16  ;;  %4237 = vmatmul.mubr.f32.vlgmr.msra.gmra.mxu1 %v6991_v47 }
 0x753   :  { %4239 = vmatprep.mubr.f32.mxu1 %v6992_v51  ;;  %1947 = vmatprep.mubr.f32.mxu0 %v6943_v19 }
 0x754   :  { %4248 = vmatprep.subr.mxu1 %v6943_v19  ;;  %2177 = vmatprep.subr.mxu0 %v5936_v3 }
 0x755   :  { %2178 = vmatpush1.msra.mxu0 %v5939_v53  ;;  %4249 = vmatpush3.msra.mxu1 %v6031_v34 }
 0x756   :  { %1948 = vmatmul.mubr.f32.gmra.mxu0 %v6991_v47  ;;  %4240 = vmatmul.mubr.f32.gmra.mxu1 %v6993_v52 }
 0x757   :  { %4242 = vmatprep.mubr.f32.mxu1 %v5726_v43  ;;  %1953 = vmatprep.mubr.f32.mxu0 %v6943_v19 }
 0x758   :  { %2179 = vmatprep.subr.mxu0 %v5942_v10  ;;  %4250 = vmatprep.subr.mxu1 %v6943_v19 }
 0x759   :  { %2180 = vmatpush1.msra.mxu0 %v5945_v54  ;;  %4251 = vmatpush3.msra.mxu1 %v6033_v35 }
 0x75a   :  { %1954 = vmatmul.mubr.f32.gmra.mxu0 %v6992_v51  ;;  %4243 = vmatmul.mubr.f32.gmra.mxu1 %v5830_v40 }
 0x75b   :  { %4245 = vmatprep.mubr.f32.mxu1 %v5909_v57  ;;  %1959 = vmatprep.mubr.f32.mxu0 %v6943_v19 }
 0x75c   :  { %2181 = vmatprep.subr.mxu0 %v5948_v21  ;;  %4252 = vmatprep.subr.mxu1 %v6943_v19 }
 0x75d   :  { %2182 = vmatpush1.msra.mxu0 %v5951_v55  ;;  %4253 = vmatpush3.msra.mxu1 %v6038_v36 }
 0x75e   :  { %1960 = vmatmul.mubr.f32.gmra.mxu0 %v6993_v52  ;;  %2183 = vmatprep.subr.mxu0 %v5954_v1 }
 0x75f   :  { %1965 = vmatprep.mubr.f32.mxu0 %v6943_v19  ;;  %2184 = vmatpush1.msra.mxu0 %v5957_v56 }
 0x760   :  { %2185 = vmatprep.subr.mxu0 %v5960_v8  ;;  %4254 = vmatprep.subr.mxu1 %v6943_v19 }
 0x761   :  { %2186 = vmatpush1.msra.mxu0 %v5963_v9  ;;  %4255 = vmatpush3.msra.mxu1 %v6043_v37 }
 0x762   :  { %1966 = vmatmul.mubr.f32.gmra.mxu0 %v5726_v43  ;;  %2187 = vmatprep.subr.mxu0 %v5966_v58 }
 0x763   :  { %1971 = vmatprep.mubr.f32.mxu0 %v6943_v19  ;;  %2188 = vmatpush1.msra.mxu0 %v5969_v13 }
 0x764   :  { %2189 = vmatprep.subr.mxu0 %v5972_v59  ;;  %4256 = vmatprep.subr.mxu1 %v6943_v19 }
 0x765   :  { %2190 = vmatpush1.msra.mxu0 %v5975_v14  ;;  %4257 = vmatpush3.msra.mxu1 %v6047_v39 }
 0x766   :  { %1972 = vmatmul.mubr.f32.gmra.mxu0 %v5830_v40  ;;  %2191 = vmatprep.subr.mxu0 %v5978_v60  ;;  %v7001_v40 = vld [vmem:[#allocation38_spill] sm:$0xff] }
 0x767   :  { %1977 = vmatprep.mubr.f32.mxu0 %v6943_v19  ;;  %2192 = vmatpush1.msra.mxu0 %v5981_v7 }
 0x768   :  { %2193 = vmatprep.subr.mxu0 %v5984_v17  ;;  %4258 = vmatprep.subr.mxu1 %v6943_v19 }
 0x769   :  { %2194 = vmatpush1.msra.mxu0 %v5987_v18  ;;  %4259 = vmatpush3.msra.mxu1 %v6051_v6 }
 0x76a   :  { %1978 = vmatmul.mubr.f32.gmra.mxu0 %v5909_v57  ;;  %2195 = vmatprep.subr.mxu0 %v5990_v20 }
 0x76b   :  { %1983 = vmatprep.mubr.f32.mxu0 %v6943_v19  ;;  %2196 = vmatpush1.msra.mxu0 %v5993_v22 }
 0x76c   :  { %2197 = vmatprep.subr.mxu0 %v5996_v23  ;;  %4260 = vmatprep.subr.mxu1 %v6943_v19 }
 0x76d   :  { %2198 = vmatpush1.msra.mxu0 %v5999_v24  ;;  %4261 = vmatpush3.msra.mxu1 %v6055_v5 }
 0x76e   :  { %2199 = vmatprep.subr.mxu0 %v6002_v26  ;;  %4262 = vmatprep.subr.mxu1 %v6943_v19 }
 0x76f   :  { %2200 = vmatpush1.msra.mxu0 %v6005_v11  ;;  %4263 = vmatpush3.msra.mxu1 %v6059_v4 }
 0x770   :  { %2201 = vmatprep.subr.mxu0 %v6008_v28  ;;  %4264 = vmatprep.subr.mxu1 %v6943_v19 }
 0x771   :  { %2202 = vmatpush1.msra.mxu0 %v6011_v29  ;;  %4265 = vmatpush3.msra.mxu1 %v6063_v45 }
 0x772   :  { %2203 = vmatprep.subr.mxu0 %v6014_v30  ;;  %4266 = vmatprep.subr.mxu1 %v6943_v19 }
 0x773   :  { %2204 = vmatpush1.msra.mxu0 %v6017_v33  ;;  %4267 = vmatpush3.msra.mxu1 %v6067_v46 }
 0x774   :  { %2205 = vmatprep.subr.mxu0 %v6020_v41  ;;  %4268 = vmatprep.subr.mxu1 %v6943_v19 }
 0x775   :  { %2206 = vmatpush1.msra.mxu0 %v6023_v42  ;;  %4269 = vmatpush3.msra.mxu1 %v6071_v38 }
 0x776   :  { %2207 = vmatprep.subr.mxu0 %v6026_v12  ;;  %4270 = vmatprep.subr.mxu1 %v6943_v19 }
 0x777   :  { %2208 = vmatpush1.msra.mxu0 %v6028_v31  ;;  %4271 = vmatpush3.msra.mxu1 %v6075_v49 }
 0x778   :  { %2346 = vmatprep.subr.mxu0 %v5936_v3  ;;  %4272 = vmatprep.subr.mxu1 %v6943_v19 }
 0x779   :  { %4273 = vmatpush3.msra.mxu1 %v6079_v61 }
 0x77a   :  { %4274 = vmatprep.subr.mxu1 %v6943_v19 }
 0x77b   :  { %4275 = vmatpush3.msra.mxu1 %v6083_v15 }
 0x77c   :  { %4276 = vmatprep.subr.mxu1 %v6943_v19 }
 0x77d   :  { %4277 = vmatpush3.msra.mxu1 %v6087_v63  ;;  %v7002_v63 = vld [vmem:[#allocation43_spill] sm:$0xff] }
 0x77e   :  { %4278 = vmatprep.subr.mxu1 %v6943_v19 }
 0x77f   :  { %4279 = vmatpush3.msra.mxu1 %v6091_v25 }
 0x780   :  { %4283 = vmatprep.subr.mxu1 %v6943_v19 }
 0x7f1   :  { %v1705_v62 = vpop.f32.mrf.mxu0  ;;  %v1776_v27 = vpop.f32.mrf.mxu1 }
 0x7f2   :  { %v1780_v0 = vadd.f32 %v1705_v62, %v7000_v32  ;;  %v1794_v25 = vadd.f32 %v5904_v2, %v1776_v27  ;;  %v7004_v2 = vld [vmem:[#allocation30_spill] sm:$0xff] }
 0x7f3   :  { %v4203_v48 = vpop.f32.mrf.mxu1  ;;  %v1707_v50 = vpop.f32.mrf.mxu0 }
 0x7f4   :  { %v3583_v44 = vmul.f32 -1.442695, %v1780_v0  ;;  %v1787_v43 = vadd.f32 %v1707_v50, %v7001_v40 }
 0x7f6   :  { %4610 = vpow2.f32 %v3583_v44  ;;  %v3584_v52 = vmul.f32 -1.442695, %v1787_v43 }
 0x7f8   :  { %4612 = vpow2.f32 %v3584_v52  ;;  %v7008_v52 = vld [vmem:[#allocation22_spill] sm:$0xff] }
 0x803   :  { %v4611_v51 = vpop.eup %4610 }
 0x804   :  { %v1784_v47 = vadd.f32 1.0, %v4611_v51  ;;  %v7007_v51 = vld [vmem:[#allocation31_spill] sm:$0xff] }
 0x805   :  { %v4613_v16 = vpop.eup %4612 }
 0x806   :  { %4614 = vrcp.f32 %v1784_v47  ;;  %v1791_v3 = vadd.f32 1.0, %v4613_v16  ;;  %v7005_v16 = vld [vmem:[#allocation29_spill] sm:$0xff]  ;;  %v7006_v47 = vld [vmem:[#allocation39_spill] sm:$0xff] }
 0x808   :  { %4616 = vrcp.f32 %v1791_v3 }
 0x812   :  { %v1943_v3 = vpop.f32.mrf.mxu0 }
 0x813   :  { %v4615_v31 = vpop.eup %4614 }
 0x814   :  { %v1795_v12 = vmul.f32 %v4615_v31, %v1794_v25 }
 0x815   :  { %v4617_v32 = vpop.eup %4616 }
 0x816   :  { %v1796_v62 = vadd.f32 %v1795_v12, %v7002_v63  ;;  %v1798_v0 = vsub.f32 1.0, %v4617_v32  ;;  %v1800_v43 = vmul.f32 %v4617_v32, %v5909_v57  ;;  %v1945_v12 = vpop.f32.mrf.mxu0  ;;  %v6190_v32 = vpop.f32.mrf.mxu1 }
 0x817   :  { %7015 = vst [vmem:[#allocation21_spill] sm:$0xff] %v6190_v32 }
 0x818   :  { %4618 = vtanh.f32 %v1796_v62  ;;  %v6178_v31 = vpop.f32.mrf.mxu0 }
 0x819   :  { %7009 = vst [vmem:[#allocation33_spill] sm:$0xff] %v6178_v31 }
 0x81a   :  { %v6180_v63 = vpop.f32.mrf.mxu0 }
 0x81b   :  { %7010 = vst [vmem:[#allocation34_spill] sm:$0xff] %v6180_v63 }
 0x81c   :  { %v6182_v25 = vpop.f32.mrf.mxu0 }
 0x81d   :  { %7011 = vst [vmem:[#allocation41_spill] sm:$0xff] %v6182_v25 }
 0x81e   :  { %v6184_v27 = vpop.f32.mrf.mxu0 }
 0x81f   :  { %7012 = vst [vmem:[#allocation40_spill] sm:$0xff] %v6184_v27 }
 0x820   :  { %v6186_v50 = vpop.f32.mrf.mxu0 }
 0x821   :  { %7013 = vst [vmem:[#allocation18_spill] sm:$0xff] %v6186_v50 }
 0x822   :  { %v6188_v62 = vpop.f32.mrf.mxu0 }
 0x823   :  { %7014 = vst [vmem:[#allocation26_spill] sm:$0xff] %v6188_v62  ;;  %v1860_v62 = vld [vmem:[%s6847_s7] sm:$0x7] }
 0x825   :  { %v4619_v48 = vpop.eup %4618 }
 0x826   :  { %v1799_v44 = vmul.f32 %v4619_v48, %v1798_v0  ;;  %v6192_v0 = vpop.f32.mrf.mxu0  ;;  %v2056_v48 = vpop.f32.mrf.mxu1 }
 0x827   :  { %7016 = vst [vmem:[#allocation35_spill] sm:$0xff] %v6192_v0 }
 0x828   :  { %v6102_v40 = vadd.f32 %v1800_v43, %v1799_v44  ;;  %v6194_v44 = vpop.f32.mrf.mxu0  ;;  %v6196_v43 = vpop.f32.mrf.mxu1 }
 0x829   :  { %7017 = vst [vmem:[#allocation36_spill] sm:$0xff] %v6194_v44  ;;  %7018 = vst [vmem:[#allocation44_spill] sm:$0xff] %v6196_v43  ;;  %v7026_v44 = vld [vmem:[#allocation23_spill] sm:$0xff] }
 0x82a   :  { %7003 = vst [vmem:[#allocation42_spill] sm:$0xff] %v6102_v40  ;;  %1984 = vmatmul.mubr.f32.gmra.mxu0 %v6102_v40  ;;  %4246 = vmatmul.mubr.f32.gmra.mxu1 %v6102_v40  ;;  %v6198_v40 = vpop.f32.mrf.mxu0  ;;  %v6200_v57 = vpop.f32.mrf.mxu1  ;;  %v7027_v43 = vsub.s32 0, %v7026_v44 }
 0x82b   :  { %2241 = vmatprep.mubr.f32.mxu0 %v6943_v19  ;;  %4280 = vmatprep.mubr.msk.f32.mxu1 %vm4936_vm1, %v6943_v19  ;;  %7019 = vst [vmem:[#allocation37_spill] sm:$0xff] %v6198_v40  ;;  %7020 = vst [vmem:[#allocation38_spill] sm:$0xff] %v6200_v57 }
 0x82c   :  { %v6202_v25 = vpop.f32.mrf.mxu0  ;;  %v6204_v27 = vpop.f32.mrf.mxu1  ;;  %v6217_v63 = vrot.slane %v1860_v62, %v7027_v43 }
 0x82d   :  { %7021 = vst [vmem:[#allocation43_spill] sm:$0xff] %v6202_v25  ;;  %7022 = vst [vmem:[#allocation46_spill] sm:$0xff] %v6204_v27 }
 0x82e   :  { %2242 = vmatmul.mubr.f32.vlgmr.msra.gmra.mxu0 %v6943_v19  ;;  %4281 = vmatmul.mubr.f32.vlgmr.msra.gmra.mxu1 %v6943_v19  ;;  %v6206_v50 = vpop.f32.mrf.mxu0  ;;  %v6211_v0 = vpop.f32.mrf.mxu1  ;;  %7028 = vst [vmem:[#allocation23_spill] sm:$0xff] %v6217_v63 }
 0x82f   :  { %2347 = vmatpush1.msra.mxu0 %v5939_v53  ;;  %4284 = vmatpush3.msra.mxu1 %v6031_v34  ;;  %7023 = vst [vmem:[#allocation47_spill] sm:$0xff] %v6206_v50  ;;  %7024 = vst [vmem:[#allocation48_spill] sm:$0xff] %v6211_v0  ;;  %v1944_v50 = vadd.f32 %v1943_v3, %v6217_v63  ;;  %v7033_v0 = vsub.s32 1, %v7026_v44  ;;  %v6236_v63 = vld [vmem:[%s6848_s8] ss:$0 sm:$0xff] }
 0x830   :  { %2348 = vmatprep.subr.mxu0 %v5942_v10  ;;  %4285 = vmatprep.subr.mxu1 %v6943_v19  ;;  %v6213_v32 = vpop.f32.mrf.mxu0 }
 0x831   :  { %2349 = vmatpush1.msra.mxu0 %v5945_v54  ;;  %4286 = vmatpush3.msra.mxu1 %v6033_v35  ;;  %7025 = vst [vmem:[#allocation49_spill] sm:$0xff] %v6213_v32 }
 0x832   :  { %2350 = vmatprep.subr.mxu0 %v5948_v21  ;;  %4287 = vmatprep.subr.mxu1 %v6943_v19 }
 0x833   :  { %2351 = vmatpush1.msra.mxu0 %v5951_v55  ;;  %4288 = vmatpush3.msra.mxu1 %v6038_v36 }
 0x834   :  { %2352 = vmatprep.subr.mxu0 %v5954_v1  ;;  %4289 = vmatprep.subr.mxu1 %v6943_v19 }
 0x835   :  { %2353 = vmatpush1.msra.mxu0 %v5957_v56  ;;  %4290 = vmatpush3.msra.mxu1 %v6043_v37 }
 0x836   :  { %2354 = vmatprep.subr.mxu0 %v5960_v8  ;;  %4291 = vmatprep.subr.mxu1 %v6943_v19 }
 0x837   :  { %2355 = vmatpush1.msra.mxu0 %v5963_v9  ;;  %4292 = vmatpush3.msra.mxu1 %v6047_v39 }
 0x838   :  { %2356 = vmatprep.subr.mxu0 %v5966_v58  ;;  %4293 = vmatprep.subr.mxu1 %v6943_v19 }
 0x839   :  { %2357 = vmatpush1.msra.mxu0 %v5969_v13  ;;  %4294 = vmatpush3.msra.mxu1 %v6051_v6 }
 0x83a   :  { %2358 = vmatprep.subr.mxu0 %v5972_v59  ;;  %4295 = vmatprep.subr.mxu1 %v6943_v19 }
 0x83b   :  { %2359 = vmatpush1.msra.mxu0 %v5975_v14  ;;  %4296 = vmatpush3.msra.mxu1 %v6055_v5 }
 0x83c   :  { %2360 = vmatprep.subr.mxu0 %v5978_v60  ;;  %4297 = vmatprep.subr.mxu1 %v6943_v19 }
 0x83d   :  { %2361 = vmatpush1.msra.mxu0 %v5981_v7  ;;  %4298 = vmatpush3.msra.mxu1 %v6059_v4 }
 0x83e   :  { %2362 = vmatprep.subr.mxu0 %v5984_v17  ;;  %4299 = vmatprep.subr.mxu1 %v6943_v19 }
 0x83f   :  { %2363 = vmatpush1.msra.mxu0 %v5987_v18  ;;  %4300 = vmatpush3.msra.mxu1 %v6063_v45 }
 0x840   :  { %2364 = vmatprep.subr.mxu0 %v5990_v20  ;;  %4301 = vmatprep.subr.mxu1 %v6943_v19 }
 0x841   :  { %2365 = vmatpush1.msra.mxu0 %v5993_v22  ;;  %4302 = vmatpush3.msra.mxu1 %v6067_v46 }
 0x842   :  { %2366 = vmatprep.subr.mxu0 %v5996_v23  ;;  %4303 = vmatprep.subr.mxu1 %v6943_v19 }
 0x843   :  { %2367 = vmatpush1.msra.mxu0 %v5999_v24  ;;  %4304 = vmatpush3.msra.mxu1 %v6071_v38 }
 0x844   :  { %2368 = vmatprep.subr.mxu0 %v6002_v26  ;;  %4305 = vmatprep.subr.mxu1 %v6943_v19 }
 0x845   :  { %2369 = vmatpush1.msra.mxu0 %v6005_v11  ;;  %4306 = vmatpush3.msra.mxu1 %v6075_v49 }
 0x846   :  { %2370 = vmatprep.subr.mxu0 %v6008_v28  ;;  %4307 = vmatprep.subr.mxu1 %v6943_v19 }
 0x847   :  { %2371 = vmatpush1.msra.mxu0 %v6011_v29  ;;  %4308 = vmatpush3.msra.mxu1 %v6079_v61 }
 0x848   :  { %2372 = vmatprep.subr.mxu0 %v6014_v30  ;;  %4309 = vmatprep.subr.mxu1 %v6943_v19 }
 0x849   :  { %2373 = vmatpush1.msra.mxu0 %v6017_v33  ;;  %4310 = vmatpush3.msra.mxu1 %v6083_v15 }
 0x84a   :  { %2374 = vmatprep.subr.mxu0 %v6020_v41  ;;  %4311 = vmatprep.subr.mxu1 %v6943_v19 }
 0x84b   :  { %2375 = vmatpush1.msra.mxu0 %v6023_v42  ;;  %4312 = vmatpush3.msra.mxu1 %v7004_v2 }
 0x84c   :  { %2376 = vmatprep.subr.mxu0 %v7005_v16  ;;  %4313 = vmatprep.subr.mxu1 %v6943_v19 }
 0x84d   :  { %2377 = vmatpush1.msra.mxu0 %v7006_v47  ;;  %2410 = vmatprep.mubr.f32.mxu0 %v6943_v19 }
 0x84e   :  { %4314 = vmatpush3.msra.mxu1 %v7007_v51  ;;  %4315 = vmatprep.mubr.msk.f32.mxu1 %vm4936_vm1, %v6943_v19  ;;  %v6230_v51 = vrot.slane %v1860_v62, %v7033_v0 }
 0x84f   :  { %2516 = vmatprep.subr.mxu0 %v7008_v52  ;;  %4318 = vmatprep.subr.mxu1 %v6943_v19 }
 0x850   :  { %7034 = vst [vmem:[#allocation54_spill] sm:$0xff] %v6230_v51 }
 0x8ea   :  { %v6219_v40 = vpop.f32.mrf.mxu0  ;;  %v6221_v57 = vpop.f32.mrf.mxu1 }
 0x8eb   :  { %7029 = vst [vmem:[#allocation50_spill] sm:$0xff] %v6219_v40  ;;  %7030 = vst [vmem:[#allocation51_spill] sm:$0xff] %v6221_v57  ;;  %v1946_v40 = vadd.f32 %v1945_v12, %v6230_v51 }
 0x8ec   :  { %v6223_v25 = vpop.f32.mrf.mxu0  ;;  %v6225_v27 = vpop.f32.mrf.mxu1 }
 0x8ed   :  { %7031 = vst [vmem:[#allocation52_spill] sm:$0xff] %v6223_v25  ;;  %7032 = vst [vmem:[#allocation53_spill] sm:$0xff] %v6225_v27 }
 0x8ee   :  { %v2243_v31 = vpop.f32.mrf.mxu0  ;;  %v2314_v52 = vpop.f32.mrf.mxu1 }
 0x8ef   :  { %v2318_v32 = vadd.f32 %v2243_v31, %v1944_v50  ;;  %v7035_v31 = vsub.s32 2, %v7026_v44  ;;  %v7039_v44 = vld [vmem:[#allocation39_spill] sm:$0xff] }
 0x8f0   :  { %v4282_v47 = vpop.f32.mrf.mxu1  ;;  %v2245_v16 = vpop.f32.mrf.mxu0 }
 0x8f1   :  { %v3586_v43 = vmul.f32 -1.442695, %v2318_v32  ;;  %v2325_v57 = vadd.f32 %v2245_v16, %v1946_v40  ;;  %v2332_v47 = vadd.f32 %v6236_v63, %v2314_v52  ;;  %v6241_v50 = vrot.slane %v1860_v62, %v7035_v31  ;;  %v7037_v62 = vld [vmem:[#allocation30_spill] sm:$0xff]  ;;  %v7042_v31 = vld [vmem:[#allocation23_spill] sm:$0xff] }
 0x8f3   :  { %4620 = vpow2.f32 %v3586_v43  ;;  %v3587_v2 = vmul.f32 -1.442695, %v2325_v57  ;;  %v2057_v57 = vadd.f32 %v2056_v48, %v6241_v50  ;;  %v7038_v48 = vld [vmem:[#allocation29_spill] sm:$0xff] }
 0x8f5   :  { %4622 = vpow2.f32 %v3587_v2 }
 0x900   :  { %v4621_v25 = vpop.eup %4620 }
 0x901   :  { %v2322_v27 = vadd.f32 1.0, %v4621_v25 }
 0x902   :  { %v4623_v3 = vpop.eup %4622 }
 0x903   :  { %4624 = vrcp.f32 %v2322_v27  ;;  %v2329_v0 = vadd.f32 1.0, %v4623_v3  ;;  %v7036_v3 = vld [vmem:[#allocation45_spill] sm:$0xff] }
 0x905   :  { %4626 = vrcp.f32 %v2329_v0  ;;  %v7040_v0 = vld [vmem:[#allocation31_spill] sm:$0xff] }
 0x910   :  { %v4625_v12 = vpop.eup %4624 }
 0x911   :  { %v2333_v40 = vmul.f32 %v4625_v12, %v2332_v47  ;;  %v7041_v47 = vld [vmem:[#allocation22_spill] sm:$0xff]  ;;  %v7043_v12 = vld [vmem:[#allocation33_spill] sm:$0xff] }
 0x912   :  { %v4627_v16 = vpop.eup %4626 }
 0x913   :  { %v2334_v2 = vadd.f32 %v2333_v40, %v2057_v57  ;;  %v2336_v25 = vsub.f32 1.0, %v4627_v16  ;;  %v2338_v43 = vmul.f32 0.0, %v4627_v16  ;;  %v1950_v57 = vadd.f32 %v7043_v12, %v7042_v31 }
 0x915   :  { %4628 = vtanh.f32 %v2334_v2 }
 0x922   :  { %v4629_v27 = vpop.eup %4628 }
 0x923   :  { %v2337_v32 = vmul.f32 %v4629_v27, %v2336_v25 }
 0x925   :  { %v6244_v51 = vadd.f32 %v2338_v43, %v2337_v32  ;;  %v7044_v43 = vld [vmem:[#allocation54_spill] sm:$0xff] }
 0x927   :  { %v2341_v52 = vadd.f32 %v6244_v51, %v7036_v3  ;;  %2411 = vmatmul.mubr.f32.vlgmr.msra.gmra.mxu0 %v6244_v51  ;;  %4316 = vmatmul.mubr.f32.vlgmr.msra.gmra.mxu1 %v6244_v51  ;;  %v7045_v3 = vld [vmem:[#allocation34_spill] sm:$0xff] }
 0x928   :  { %2517 = vmatpush1.msra.mxu0 %v5939_v53  ;;  %4319 = vmatpush3.msra.mxu1 %v6031_v34 }
 0x929   :  { %2342 = vst [vmem:[#allocation13] sm:$0xff] %v2341_v52  ;;  %2518 = vmatprep.subr.mxu0 %v5942_v10  ;;  %4320 = vmatprep.subr.mxu1 %v6943_v19  ;;  %v1952_v52 = vadd.f32 %v7045_v3, %v7044_v43 }
 0x92a   :  { %2519 = vmatpush1.msra.mxu0 %v5945_v54  ;;  %4321 = vmatpush3.msra.mxu1 %v6033_v35 }
 0x92b   :  { %2520 = vmatprep.subr.mxu0 %v5948_v21  ;;  %4322 = vmatprep.subr.mxu1 %v6943_v19 }
 0x92c   :  { %2521 = vmatpush1.msra.mxu0 %v5951_v55  ;;  %4323 = vmatpush3.msra.mxu1 %v6038_v36 }
 0x92d   :  { %2522 = vmatprep.subr.mxu0 %v5954_v1  ;;  %4324 = vmatprep.subr.mxu1 %v6943_v19 }
 0x92e   :  { %2523 = vmatpush1.msra.mxu0 %v5957_v56  ;;  %4325 = vmatpush3.msra.mxu1 %v6043_v37 }
 0x92f   :  { %2524 = vmatprep.subr.mxu0 %v5960_v8  ;;  %4326 = vmatprep.subr.mxu1 %v6943_v19 }
 0x930   :  { %2525 = vmatpush1.msra.mxu0 %v5963_v9  ;;  %4327 = vmatpush3.msra.mxu1 %v6047_v39 }
 0x931   :  { %2526 = vmatprep.subr.mxu0 %v5966_v58  ;;  %4328 = vmatprep.subr.mxu1 %v6943_v19 }
 0x932   :  { %2527 = vmatpush1.msra.mxu0 %v5969_v13  ;;  %4329 = vmatpush3.msra.mxu1 %v6051_v6 }
 0x933   :  { %2528 = vmatprep.subr.mxu0 %v5972_v59  ;;  %4330 = vmatprep.subr.mxu1 %v6943_v19 }
 0x934   :  { %2529 = vmatpush1.msra.mxu0 %v5975_v14  ;;  %4331 = vmatpush3.msra.mxu1 %v6055_v5 }
 0x935   :  { %2530 = vmatprep.subr.mxu0 %v5978_v60  ;;  %4332 = vmatprep.subr.mxu1 %v6943_v19 }
 0x936   :  { %2531 = vmatpush1.msra.mxu0 %v5981_v7  ;;  %4333 = vmatpush3.msra.mxu1 %v6059_v4 }
 0x937   :  { %2532 = vmatprep.subr.mxu0 %v5984_v17  ;;  %4334 = vmatprep.subr.mxu1 %v6943_v19 }
 0x938   :  { %2533 = vmatpush1.msra.mxu0 %v5987_v18  ;;  %4335 = vmatpush3.msra.mxu1 %v6063_v45 }
 0x939   :  { %2534 = vmatprep.subr.mxu0 %v5990_v20  ;;  %4336 = vmatprep.subr.mxu1 %v6943_v19 }
 0x93a   :  { %2535 = vmatpush1.msra.mxu0 %v5993_v22  ;;  %4337 = vmatpush3.msra.mxu1 %v6067_v46 }
 0x93b   :  { %2536 = vmatprep.subr.mxu0 %v5996_v23  ;;  %4338 = vmatprep.subr.mxu1 %v6943_v19 }
 0x93c   :  { %2537 = vmatpush1.msra.mxu0 %v5999_v24  ;;  %4339 = vmatpush3.msra.mxu1 %v6071_v38 }
 0x93d   :  { %2538 = vmatprep.subr.mxu0 %v6002_v26  ;;  %4340 = vmatprep.subr.mxu1 %v6943_v19 }
 0x93e   :  { %2539 = vmatpush1.msra.mxu0 %v6005_v11  ;;  %4341 = vmatpush3.msra.mxu1 %v6075_v49 }
 0x93f   :  { %2540 = vmatprep.subr.mxu0 %v6008_v28  ;;  %4342 = vmatprep.subr.mxu1 %v6943_v19 }
 0x940   :  { %2541 = vmatpush1.msra.mxu0 %v6011_v29  ;;  %4343 = vmatpush3.msra.mxu1 %v6079_v61 }
 0x941   :  { %2542 = vmatprep.subr.mxu0 %v6014_v30  ;;  %4344 = vmatprep.subr.mxu1 %v6943_v19 }
 0x942   :  { %2543 = vmatpush1.msra.mxu0 %v6017_v33  ;;  %4345 = vmatpush3.msra.mxu1 %v6083_v15 }
 0x943   :  { %2544 = vmatprep.subr.mxu0 %v6020_v41  ;;  %4346 = vmatprep.subr.mxu1 %v6943_v19 }
 0x944   :  { %2545 = vmatpush1.msra.mxu0 %v6023_v42  ;;  %4347 = vmatpush3.msra.mxu1 %v7037_v62 }
 0x945   :  { %2546 = vmatprep.subr.mxu0 %v7038_v48  ;;  %4348 = vmatprep.subr.mxu1 %v6943_v19 }
 0x946   :  { %2547 = vmatpush1.msra.mxu0 %v7039_v44  ;;  %2580 = vmatprep.mubr.f32.mxu0 %v6943_v19 }
 0x947   :  { %4349 = vmatpush3.msra.mxu1 %v7040_v0  ;;  %4350 = vmatprep.mubr.msk.f32.mxu1 %vm4936_vm1, %v6943_v19 }
 0x948   :  { %2686 = vmatprep.subr.mxu0 %v7041_v47  ;;  %4353 = vmatprep.subr.mxu1 %v6943_v19 }
 0x9e7   :  { %v2412_v40 = vpop.f32.mrf.mxu0  ;;  %v2483_v2 = vpop.f32.mrf.mxu1 }
 0x9e8   :  { %v2487_v16 = vadd.f32 %v2412_v40, %v1950_v57  ;;  %v2501_v12 = vadd.f32 %v6236_v63, %v2483_v2  ;;  %v7046_v57 = vld [vmem:[#allocation21_spill] sm:$0xff]  ;;  %v7051_v2 = vld [vmem:[#allocation39_spill] sm:$0xff] }
 0x9e9   :  { %v4317_v25 = vpop.f32.mrf.mxu1  ;;  %v2414_v32 = vpop.f32.mrf.mxu0  ;;  %v2062_v40 = vadd.f32 %v7046_v57, %v6241_v50  ;;  %v7054_v57 = vld [vmem:[#allocation23_spill] sm:$0xff] }
 0x9ea   :  { %v3588_v27 = vmul.f32 -1.442695, %v2487_v16  ;;  %v2494_v0 = vadd.f32 %v2414_v32, %v1952_v52  ;;  %v7052_v52 = vld [vmem:[#allocation31_spill] sm:$0xff] }
 0x9ec   :  { %4630 = vpow2.f32 %v3588_v27  ;;  %v3589_v44 = vmul.f32 -1.442695, %v2494_v0 }
 0x9ee   :  { %4632 = vpow2.f32 %v3589_v44 }
 0x9f9   :  { %v4631_v48 = vpop.eup %4630 }
 0x9fa   :  { %v2491_v47 = vadd.f32 1.0, %v4631_v48 }
 0x9fb   :  { %v4633_v62 = vpop.eup %4632 }
 0x9fc   :  { %4634 = vrcp.f32 %v2491_v47  ;;  %v2498_v42 = vadd.f32 1.0, %v4633_v62  ;;  %v7047_v47 = vld [vmem:[#allocation24_spill] sm:$0xff] }
 0x9fe   :  { %4636 = vrcp.f32 %v2498_v42  ;;  %v7048_v42 = vld [vmem:[#allocation28_spill] sm:$0xff] }
 0xa09   :  { %v4635_v31 = vpop.eup %4634 }
 0xa0a   :  { %v2502_v16 = vmul.f32 %v4635_v31, %v2501_v12  ;;  %v7050_v31 = vld [vmem:[#allocation29_spill] sm:$0xff]  ;;  %v7053_v12 = vld [vmem:[#allocation22_spill] sm:$0xff] }
 0xa0b   :  { %v4637_v3 = vpop.eup %4636 }
 0xa0c   :  { %v2503_v25 = vadd.f32 %v2502_v16, %v2062_v40  ;;  %v2505_v27 = vsub.f32 1.0, %v4637_v3  ;;  %v2507_v44 = vmul.f32 %v4637_v3, %v6244_v51  ;;  %v7049_v51 = vld [vmem:[#allocation30_spill] sm:$0xff]  ;;  %v7055_v40 = vld [vmem:[#allocation41_spill] sm:$0xff] }
 0xa0d   :  { %v1956_v16 = vadd.f32 %v7055_v40, %v7054_v57 }
 0xa0e   :  { %4638 = vtanh.f32 %v2503_v25 }
 0xa1b   :  { %v4639_v32 = vpop.eup %4638 }
 0xa1c   :  { %v2506_v0 = vmul.f32 %v4639_v32, %v2505_v27 }
 0xa1e   :  { %v6325_v48 = vadd.f32 %v2507_v44, %v2506_v0 }
 0xa20   :  { %v2510_v62 = vadd.f32 %v6325_v48, %v7047_v47  ;;  %2581 = vmatmul.mubr.f32.vlgmr.msra.gmra.mxu0 %v6325_v48  ;;  %4351 = vmatmul.mubr.f32.vlgmr.msra.gmra.mxu1 %v6325_v48  ;;  %v7056_v47 = vld [vmem:[#allocation40_spill] sm:$0xff] }
 0xa21   :  { %2687 = vmatpush1.msra.mxu0 %v5939_v53  ;;  %4354 = vmatpush3.msra.mxu1 %v6031_v34 }
 0xa22   :  { %2512 = vst [vmem:[#allocation13 + $0x8] sm:$0xff] %v2510_v62  ;;  %2688 = vmatprep.subr.mxu0 %v5942_v10  ;;  %4355 = vmatprep.subr.mxu1 %v6943_v19  ;;  %v1958_v62 = vadd.f32 %v7056_v47, %v7044_v43 }
 0xa23   :  { %2689 = vmatpush1.msra.mxu0 %v5945_v54  ;;  %4356 = vmatpush3.msra.mxu1 %v6033_v35 }
 0xa24   :  { %2690 = vmatprep.subr.mxu0 %v5948_v21  ;;  %4357 = vmatprep.subr.mxu1 %v6943_v19 }
 0xa25   :  { %2691 = vmatpush1.msra.mxu0 %v5951_v55  ;;  %4358 = vmatpush3.msra.mxu1 %v6038_v36 }
 0xa26   :  { %2692 = vmatprep.subr.mxu0 %v5954_v1  ;;  %4359 = vmatprep.subr.mxu1 %v6943_v19 }
 0xa27   :  { %2693 = vmatpush1.msra.mxu0 %v5957_v56  ;;  %4360 = vmatpush3.msra.mxu1 %v6043_v37 }
 0xa28   :  { %2694 = vmatprep.subr.mxu0 %v5960_v8  ;;  %4361 = vmatprep.subr.mxu1 %v6943_v19 }
 0xa29   :  { %2695 = vmatpush1.msra.mxu0 %v5963_v9  ;;  %4362 = vmatpush3.msra.mxu1 %v6047_v39 }
 0xa2a   :  { %2696 = vmatprep.subr.mxu0 %v5966_v58  ;;  %4363 = vmatprep.subr.mxu1 %v6943_v19 }
 0xa2b   :  { %2697 = vmatpush1.msra.mxu0 %v5969_v13  ;;  %4364 = vmatpush3.msra.mxu1 %v6051_v6 }
 0xa2c   :  { %2698 = vmatprep.subr.mxu0 %v5972_v59  ;;  %4365 = vmatprep.subr.mxu1 %v6943_v19 }
 0xa2d   :  { %2699 = vmatpush1.msra.mxu0 %v5975_v14  ;;  %4366 = vmatpush3.msra.mxu1 %v6055_v5 }
 0xa2e   :  { %2700 = vmatprep.subr.mxu0 %v5978_v60  ;;  %4367 = vmatprep.subr.mxu1 %v6943_v19 }
 0xa2f   :  { %2701 = vmatpush1.msra.mxu0 %v5981_v7  ;;  %4368 = vmatpush3.msra.mxu1 %v6059_v4 }
 0xa30   :  { %2702 = vmatprep.subr.mxu0 %v5984_v17  ;;  %4369 = vmatprep.subr.mxu1 %v6943_v19 }
 0xa31   :  { %2703 = vmatpush1.msra.mxu0 %v5987_v18  ;;  %4370 = vmatpush3.msra.mxu1 %v6063_v45 }
 0xa32   :  { %2704 = vmatprep.subr.mxu0 %v5990_v20  ;;  %4371 = vmatprep.subr.mxu1 %v6943_v19 }
 0xa33   :  { %2705 = vmatpush1.msra.mxu0 %v5993_v22  ;;  %4372 = vmatpush3.msra.mxu1 %v6067_v46 }
 0xa34   :  { %2706 = vmatprep.subr.mxu0 %v5996_v23  ;;  %4373 = vmatprep.subr.mxu1 %v6943_v19 }
 0xa35   :  { %2707 = vmatpush1.msra.mxu0 %v5999_v24  ;;  %4374 = vmatpush3.msra.mxu1 %v6071_v38 }
 0xa36   :  { %2708 = vmatprep.subr.mxu0 %v6002_v26  ;;  %4375 = vmatprep.subr.mxu1 %v6943_v19 }
 0xa37   :  { %2709 = vmatpush1.msra.mxu0 %v6005_v11  ;;  %4376 = vmatpush3.msra.mxu1 %v6075_v49 }
 0xa38   :  { %2710 = vmatprep.subr.mxu0 %v6008_v28  ;;  %4377 = vmatprep.subr.mxu1 %v6943_v19 }
 0xa39   :  { %2711 = vmatpush1.msra.mxu0 %v6011_v29  ;;  %4378 = vmatpush3.msra.mxu1 %v6079_v61 }
 0xa3a   :  { %2712 = vmatprep.subr.mxu0 %v6014_v30  ;;  %4379 = vmatprep.subr.mxu1 %v6943_v19 }
 0xa3b   :  { %2713 = vmatpush1.msra.mxu0 %v6017_v33  ;;  %4380 = vmatpush3.msra.mxu1 %v6083_v15 }
 0xa3c   :  { %2714 = vmatprep.subr.mxu0 %v6020_v41  ;;  %4381 = vmatprep.subr.mxu1 %v6943_v19 }
 0xa3d   :  { %2715 = vmatpush1.msra.mxu0 %v7048_v42  ;;  %4382 = vmatpush3.msra.mxu1 %v7049_v51 }
 0xa3e   :  { %2716 = vmatprep.subr.mxu0 %v7050_v31  ;;  %4383 = vmatprep.subr.mxu1 %v6943_v19 }
 0xa3f   :  { %2717 = vmatpush1.msra.mxu0 %v7051_v2  ;;  %2750 = vmatprep.mubr.f32.mxu0 %v6943_v19 }
 0xa40   :  { %4384 = vmatpush3.msra.mxu1 %v7052_v52  ;;  %4385 = vmatprep.mubr.msk.f32.mxu1 %vm4936_vm1, %v6943_v19 }
 0xa41   :  { %2856 = vmatprep.subr.mxu0 %v7053_v12  ;;  %4388 = vmatprep.subr.mxu1 %v6943_v19 }
 0xae0   :  { %v2582_v25 = vpop.f32.mrf.mxu0  ;;  %v2653_v3 = vpop.f32.mrf.mxu1 }
 0xae1   :  { %v2657_v27 = vadd.f32 %v2582_v25, %v1956_v16  ;;  %v2671_v40 = vadd.f32 %v6236_v63, %v2653_v3  ;;  %v7057_v16 = vld [vmem:[#allocation38_spill] sm:$0xff]  ;;  %v6521_v3 = vld [vmem:[#allocation12 + $0x128] sm:$0xff] }
 0xae2   :  { %v4352_v32 = vpop.f32.mrf.mxu1  ;;  %v2584_v44 = vpop.f32.mrf.mxu0  ;;  %v2067_v25 = vadd.f32 %v7057_v16, %v6241_v50  ;;  %v6531_v16 = vld [vmem:[#allocation12 + $0x110] sm:$0xff] }
 0xae3   :  { %v3590_v0 = vmul.f32 -1.442695, %v2657_v27  ;;  %v2664_v52 = vadd.f32 %v2584_v44, %v1958_v62  ;;  %v7058_v62 = vld [vmem:[#allocation25_spill] sm:$0xff] }
 0xae5   :  { %4640 = vpow2.f32 %v3590_v0  ;;  %v3591_v2 = vmul.f32 -1.442695, %v2664_v52 }
 0xae7   :  { %4642 = vpow2.f32 %v3591_v2 }
 0xaf2   :  { %v4641_v31 = vpop.eup %4640 }
 0xaf3   :  { %v2661_v12 = vadd.f32 1.0, %v4641_v31 }
 0xaf4   :  { %v4643_v51 = vpop.eup %4642 }
 0xaf5   :  { %4644 = vrcp.f32 %v2661_v12  ;;  %v2668_v42 = vadd.f32 1.0, %v4643_v51  ;;  %v6525_v12 = vld [vmem:[#allocation12 + $0x120] sm:$0xff] }
 0xaf7   :  { %4646 = vrcp.f32 %v2668_v42  ;;  %v6515_v42 = vld [vmem:[#allocation12 + $0x138] sm:$0xff] }
 0xb02   :  { %v4645_v57 = vpop.eup %4644 }
 0xb03   :  { %v2672_v27 = vmul.f32 %v4645_v57, %v2671_v40  ;;  %v6518_v57 = vld [vmem:[#allocation12 + $0x148] sm:$0xff]  ;;  %v6528_v40 = vld [vmem:[#allocation12 + $0x130] sm:$0xff] }
 0xb04   :  { %v4647_v47 = vpop.eup %4646 }
 0xb05   :  { %v2673_v32 = vadd.f32 %v2672_v27, %v2067_v25  ;;  %v2675_v0 = vsub.f32 1.0, %v4647_v47  ;;  %v2677_v2 = vmul.f32 %v4647_v47, %v6325_v48  ;;  %v6511_v48 = vld [vmem:[#allocation12 + $0x140] sm:$0xff]  ;;  %v6535_v25 = vld [vmem:[#allocation12 + $0x108] sm:$0xff]  ;;  %v6538_v27 = vld [vmem:[#allocation12 + $0x118] sm:$0xff] }
 0xb06   :  { %v6545_v47 = vld [vmem:[#allocation12 + $0xf0] sm:$0xff] }
 0xb07   :  { %4648 = vtanh.f32 %v2673_v32  ;;  %v6541_v32 = vld [vmem:[#allocation12 + $0xf8] sm:$0xff] }
 0xb14   :  { %v4649_v44 = vpop.eup %4648 }
 0xb15   :  { %v2676_v52 = vmul.f32 %v4649_v44, %v2675_v0  ;;  %v6548_v0 = vld [vmem:[#allocation12 + $0x100] sm:$0xff] }
 0xb16   :  { %v6551_v44 = vld [vmem:[#allocation12 + $0xe0] sm:$0xff] }
 0xb17   :  { %v6406_v31 = vadd.f32 %v2677_v2, %v2676_v52  ;;  %v6555_v52 = vld [vmem:[#allocation12 + $0xd8] sm:$0xff]  ;;  %v6558_v2 = vld [vmem:[#allocation12 + $0xe8] sm:$0xff] }
 0xb19   :  { %v2680_v51 = vadd.f32 %v6406_v31, %v7058_v62  ;;  %2751 = vmatmul.mubr.f32.vlgmr.msra.gmra.mxu0 %v6406_v31  ;;  %4386 = vmatmul.mubr.f32.vlgmr.msra.gmra.mxu1 %v6406_v31  ;;  %v6565_v62 = vld [vmem:[#allocation12 + $0xc0] sm:$0xff] }
 0xb1a   :  { %2857 = vmatpush1.msra.mxu0 %v5939_v53  ;;  %4389 = vmatpush3.msra.mxu1 %v6031_v34  ;;  %v7059_v53 = vld [vmem:[#allocation28_spill] sm:$0xff] }
 0xb1b   :  { %2682 = vst [vmem:[#allocation13 + $0x10] sm:$0xff] %v2680_v51  ;;  %2858 = vmatprep.subr.mxu0 %v5942_v10  ;;  %4390 = vmatprep.subr.mxu1 %v6943_v19  ;;  %v7060_v10 = vld [vmem:[#allocation30_spill] sm:$0xff]  ;;  %v6568_v51 = vld [vmem:[#allocation12 + $0xd0] sm:$0xff] }
 0xb1c   :  { %2859 = vmatpush1.msra.mxu0 %v5945_v54  ;;  %4391 = vmatpush3.msra.mxu1 %v6033_v35  ;;  %v7061_v54 = vld [vmem:[#allocation29_spill] sm:$0xff] }
 0xb1d   :  { %2860 = vmatprep.subr.mxu0 %v5948_v21  ;;  %4392 = vmatprep.subr.mxu1 %v6943_v19  ;;  %v7062_v21 = vld [vmem:[#allocation39_spill] sm:$0xff] }
 0xb1e   :  { %2861 = vmatpush1.msra.mxu0 %v5951_v55  ;;  %4393 = vmatpush3.msra.mxu1 %v6038_v36  ;;  %v7063_v55 = vld [vmem:[#allocation31_spill] sm:$0xff] }
 0xb1f   :  { %2862 = vmatprep.subr.mxu0 %v5954_v1  ;;  %4394 = vmatprep.subr.mxu1 %v6943_v19  ;;  %v6477_v1 = vld [vmem:[#allocation12 + $0x170] sm:$0xff] }
 0xb20   :  { %2863 = vmatpush1.msra.mxu0 %v5957_v56  ;;  %4395 = vmatpush3.msra.mxu1 %v6043_v37  ;;  %7064 = vst [vmem:[#allocation45_spill] sm:$0xff] %v6477_v1  ;;  %v7065_v56 = vld [vmem:[#allocation23_spill] sm:$0xff] }
 0xb21   :  { %2864 = vmatprep.subr.mxu0 %v5960_v8  ;;  %4396 = vmatprep.subr.mxu1 %v6943_v19  ;;  %v7066_v8 = vld [vmem:[#allocation18_spill] sm:$0xff] }
 0xb22   :  { %2865 = vmatpush1.msra.mxu0 %v5963_v9  ;;  %4397 = vmatpush3.msra.mxu1 %v6047_v39  ;;  %v1962_v9 = vadd.f32 %v7066_v8, %v7065_v56  ;;  %v6588_v8 = vld [vmem:[#allocation12 + $0xa0] sm:$0xff] }
 0xb23   :  { %2866 = vmatprep.subr.mxu0 %v5966_v58  ;;  %4398 = vmatprep.subr.mxu1 %v6943_v19 }
 0xb24   :  { %2867 = vmatpush1.msra.mxu0 %v5969_v13  ;;  %4399 = vmatpush3.msra.mxu1 %v6051_v6 }
 0xb25   :  { %2868 = vmatprep.subr.mxu0 %v5972_v59  ;;  %4400 = vmatprep.subr.mxu1 %v6943_v19 }
 0xb26   :  { %2869 = vmatpush1.msra.mxu0 %v5975_v14  ;;  %4401 = vmatpush3.msra.mxu1 %v6055_v5 }
 0xb27   :  { %2870 = vmatprep.subr.mxu0 %v5978_v60  ;;  %4402 = vmatprep.subr.mxu1 %v6943_v19 }
 0xb28   :  { %2871 = vmatpush1.msra.mxu0 %v5981_v7  ;;  %4403 = vmatpush3.msra.mxu1 %v6059_v4  ;;  %v7069_v4 = vld [vmem:[#allocation32_spill] sm:$0xff] }
 0xb29   :  { %2872 = vmatprep.subr.mxu0 %v5984_v17  ;;  %4404 = vmatprep.subr.mxu1 %v6943_v19  ;;  %v7067_v17 = vld [vmem:[#allocation26_spill] sm:$0xff] }
 0xb2a   :  { %2873 = vmatpush1.msra.mxu0 %v5987_v18  ;;  %4405 = vmatpush3.msra.mxu1 %v6063_v45  ;;  %v1964_v18 = vadd.f32 %v7067_v17, %v7044_v43  ;;  %v6615_v17 = vld [vmem:[#allocation12 + $0x48] sm:$0xff] }
 0xb2b   :  { %2874 = vmatprep.subr.mxu0 %v5990_v20  ;;  %4406 = vmatprep.subr.mxu1 %v6943_v19 }
 0xb2c   :  { %2875 = vmatpush1.msra.mxu0 %v5993_v22  ;;  %4407 = vmatpush3.msra.mxu1 %v6067_v46  ;;  %v6495_v46 = vld [vmem:[#allocation12 + $0x168] sm:$0xff] }
 0xb2d   :  { %2876 = vmatprep.subr.mxu0 %v5996_v23  ;;  %4408 = vmatprep.subr.mxu1 %v6943_v19 }
 0xb2e   :  { %2877 = vmatpush1.msra.mxu0 %v5999_v24  ;;  %4409 = vmatpush3.msra.mxu1 %v6071_v38  ;;  %v6498_v38 = vld [vmem:[#allocation12 + $0x178] sm:$0xff] }
 0xb2f   :  { %2878 = vmatprep.subr.mxu0 %v6002_v26  ;;  %4410 = vmatprep.subr.mxu1 %v6943_v19 }
 0xb30   :  { %2879 = vmatpush1.msra.mxu0 %v6005_v11  ;;  %4411 = vmatpush3.msra.mxu1 %v6075_v49  ;;  %v6501_v49 = vld [vmem:[#allocation12 + $0x158] sm:$0xff] }
 0xb31   :  { %2880 = vmatprep.subr.mxu0 %v6008_v28  ;;  %4412 = vmatprep.subr.mxu1 %v6943_v19 }
 0xb32   :  { %2881 = vmatpush1.msra.mxu0 %v6011_v29  ;;  %4413 = vmatpush3.msra.mxu1 %v6079_v61  ;;  %v6505_v61 = vld [vmem:[#allocation12 + $0x150] sm:$0xff] }
 0xb33   :  { %2882 = vmatprep.subr.mxu0 %v6014_v30  ;;  %4414 = vmatprep.subr.mxu1 %v6943_v19  ;;  %v7068_v30 = vld [vmem:[#allocation44_spill] sm:$0xff] }
 0xb34   :  { %2883 = vmatpush1.msra.mxu0 %v6017_v33  ;;  %4415 = vmatpush3.msra.mxu1 %v6083_v15  ;;  %v2072_v33 = vadd.f32 %v7068_v30, %v6241_v50  ;;  %v6508_v15 = vld [vmem:[#allocation12 + $0x160] sm:$0xff]  ;;  %v6649_v30 = vld [vmem:[#allocation12 + $0x10] sm:$0xff] }
 0xb35   :  { %2884 = vmatprep.subr.mxu0 %v6020_v41  ;;  %4416 = vmatprep.subr.mxu1 %v6943_v19  ;;  %7074 = vst [vmem:[#allocation24_spill] sm:$0xff] %v6649_v30 }
 0xb36   :  { %2885 = vmatpush1.msra.mxu0 %v7059_v53  ;;  %4417 = vmatpush3.msra.mxu1 %v7060_v10  ;;  %v6571_v53 = vld [vmem:[#allocation12 + $0xb0] sm:$0xff]  ;;  %v6575_v10 = vld [vmem:[#allocation12 + $0xa8] sm:$0xff] }
 0xb37   :  { %2886 = vmatprep.subr.mxu0 %v7061_v54  ;;  %4418 = vmatprep.subr.mxu1 %v6943_v19  ;;  %v6578_v54 = vld [vmem:[#allocation12 + $0xb8] sm:$0xff] }
 0xb38   :  { %2887 = vmatpush1.msra.mxu0 %v7062_v21  ;;  %2920 = vmatprep.mubr.f32.mxu0 %v6943_v19  ;;  %v6581_v21 = vld [vmem:[#allocation12 + $0x98] sm:$0xff] }
 0xb39   :  { %4419 = vmatpush3.msra.mxu1 %v7063_v55  ;;  %4420 = vmatprep.mubr.msk.f32.mxu1 %vm4936_vm1, %v6943_v19  ;;  %v6585_v55 = vld [vmem:[#allocation12 + $0x90] sm:$0xff] }
 0xb3a   :  { %3026 = vmatprep.subr.mxu0 %v6477_v1  ;;  %4423 = vmatprep.subr.mxu1 %v6943_v19 }
 0xbd9   :  { %v2752_v58 = vpop.f32.mrf.mxu0  ;;  %v2823_v13 = vpop.f32.mrf.mxu1 }
 0xbda   :  { %v2827_v59 = vadd.f32 %v2752_v58, %v1962_v9  ;;  %v2841_v28 = vadd.f32 %v6236_v63, %v2823_v13  ;;  %v6591_v9 = vld [vmem:[#allocation12 + $0x80] sm:$0xff]  ;;  %v6595_v58 = vld [vmem:[#allocation12 + $0x78] sm:$0xff]  ;;  %v6598_v13 = vld [vmem:[#allocation12 + $0x88] sm:$0xff] }
 0xbdb   :  { %v4387_v14 = vpop.f32.mrf.mxu1  ;;  %v2754_v7 = vpop.f32.mrf.mxu0 }
 0xbdc   :  { %v3592_v60 = vmul.f32 -1.442695, %v2827_v59  ;;  %v2834_v20 = vadd.f32 %v2754_v7, %v1964_v18  ;;  %v6601_v59 = vld [vmem:[#allocation12 + $0x68] sm:$0xff]  ;;  %v6605_v14 = vld [vmem:[#allocation12 + $0x60] sm:$0xff]  ;;  %v6611_v7 = vld [vmem:[#allocation12 + $0x50] sm:$0xff] }
 0xbdd   :  { %v6618_v18 = vld [vmem:[#allocation12 + $0x58] sm:$0xff] }
 0xbde   :  { %4650 = vpow2.f32 %v3592_v60  ;;  %v3593_v22 = vmul.f32 -1.442695, %v2834_v20  ;;  %v6608_v60 = vld [vmem:[#allocation12 + $0x70] sm:$0xff]  ;;  %v6621_v20 = vld [vmem:[#allocation12 + $0x38] sm:$0xff] }
 0xbe0   :  { %4652 = vpow2.f32 %v3593_v22  ;;  %v6625_v22 = vld [vmem:[#allocation12 + $0x30] sm:$0xff] }
 0xbeb   :  { %v4651_v23 = vpop.eup %4650 }
 0xbec   :  { %v2831_v24 = vadd.f32 1.0, %v4651_v23  ;;  %v6628_v23 = vld [vmem:[#allocation12 + $0x40] sm:$0xff] }
 0xbed   :  { %v4653_v26 = vpop.eup %4652 }
 0xbee   :  { %4654 = vrcp.f32 %v2831_v24  ;;  %v2838_v11 = vadd.f32 1.0, %v4653_v26  ;;  %v6631_v24 = vld [vmem:[#allocation12 + $0x20] sm:$0xff]  ;;  %v6635_v26 = vld [vmem:[#allocation12 + $0x18] sm:$0xff] }
 0xbef   :  { %7070 = vst [vmem:[#allocation33_spill] sm:$0xff] %v6635_v26 }
 0xbf0   :  { %4656 = vrcp.f32 %v2838_v11  ;;  %v6638_v11 = vld [vmem:[#allocation12 + $0x28] sm:$0xff] }
 0xbf1   :  { %7071 = vst [vmem:[#allocation54_spill] sm:$0xff] %v6638_v11 }
 0xbfb   :  { %v4655_v29 = vpop.eup %4654 }
 0xbfc   :  { %v2842_v41 = vmul.f32 %v4655_v29, %v2841_v28  ;;  %v6641_v28 = vld [vmem:[#allocation12 + $0x8] sm:$0xff]  ;;  %v6645_v29 = vld [vmem:[#allocation12] sm:$0xff] }
 0xbfd   :  { %v4657_v35 = vpop.eup %4656  ;;  %7072 = vst [vmem:[#allocation34_spill] sm:$0xff] %v6641_v28  ;;  %7073 = vst [vmem:[#allocation21_spill] sm:$0xff] %v6645_v29 }
 0xbfe   :  { %v2843_v34 = vadd.f32 %v2842_v41, %v2072_v33  ;;  %v2845_v36 = vsub.f32 1.0, %v4657_v35  ;;  %v2847_v6 = vmul.f32 %v4657_v35, %v6406_v31  ;;  %v6561_v31 = vld [vmem:[#allocation12 + $0xc8] sm:$0xff] }
 0xbff   :  { %v7075_v33 = vld [vmem:[#allocation35_spill] sm:$0xff] }
 0xc00   :  { %4658 = vtanh.f32 %v2843_v34  ;;  %v1968_v41 = vadd.f32 %v7075_v33, %v7065_v56 }
 0xc0d   :  { %v4659_v37 = vpop.eup %4658 }
 0xc0e   :  { %v2846_v39 = vmul.f32 %v4659_v37, %v2845_v36 }
 0xc10   :  { %v6489_v5 = vadd.f32 %v2847_v6, %v2846_v39 }
 0xc12   :  { %v2850_v45 = vadd.f32 %v6489_v5, %v7069_v4  ;;  %2921 = vmatmul.mubr.f32.vlgmr.msra.gmra.mxu0 %v6489_v5  ;;  %4421 = vmatmul.mubr.f32.vlgmr.msra.gmra.mxu1 %v6489_v5  ;;  %v7076_v4 = vld [vmem:[#allocation36_spill] sm:$0xff] }
 0xc13   :  { %3027 = vmatpush1.msra.mxu0 %v6495_v46  ;;  %4424 = vmatpush3.msra.mxu1 %v6498_v38 }
 0xc14   :  { %2852 = vst [vmem:[#allocation13 + $0x18] sm:$0xff] %v2850_v45  ;;  %3028 = vmatprep.subr.mxu0 %v6501_v49  ;;  %4425 = vmatprep.subr.mxu1 %v6943_v19  ;;  %v1970_v45 = vadd.f32 %v7076_v4, %v7044_v43 }
 0xc15   :  { %3029 = vmatpush1.msra.mxu0 %v6505_v61  ;;  %4426 = vmatpush3.msra.mxu1 %v6508_v15 }
 0xc16   :  { %3030 = vmatprep.subr.mxu0 %v6511_v48  ;;  %4427 = vmatprep.subr.mxu1 %v6943_v19 }
 0xc17   :  { %3031 = vmatpush1.msra.mxu0 %v6515_v42  ;;  %4428 = vmatpush3.msra.mxu1 %v6518_v57 }
 0xc18   :  { %3032 = vmatprep.subr.mxu0 %v6521_v3  ;;  %4429 = vmatprep.subr.mxu1 %v6943_v19 }
 0xc19   :  { %3033 = vmatpush1.msra.mxu0 %v6525_v12  ;;  %4430 = vmatpush3.msra.mxu1 %v6528_v40 }
 0xc1a   :  { %3034 = vmatprep.subr.mxu0 %v6531_v16  ;;  %4431 = vmatprep.subr.mxu1 %v6943_v19 }
 0xc1b   :  { %3035 = vmatpush1.msra.mxu0 %v6535_v25  ;;  %4432 = vmatpush3.msra.mxu1 %v6538_v27 }
 0xc1c   :  { %3036 = vmatprep.subr.mxu0 %v6541_v32  ;;  %4433 = vmatprep.subr.mxu1 %v6943_v19 }
 0xc1d   :  { %3037 = vmatpush1.msra.mxu0 %v6545_v47  ;;  %4434 = vmatpush3.msra.mxu1 %v6548_v0 }
 0xc1e   :  { %3038 = vmatprep.subr.mxu0 %v6551_v44  ;;  %4435 = vmatprep.subr.mxu1 %v6943_v19 }
 0xc1f   :  { %3039 = vmatpush1.msra.mxu0 %v6555_v52  ;;  %4436 = vmatpush3.msra.mxu1 %v6558_v2 }
 0xc20   :  { %3040 = vmatprep.subr.mxu0 %v6561_v31  ;;  %4437 = vmatprep.subr.mxu1 %v6943_v19 }
 0xc21   :  { %3041 = vmatpush1.msra.mxu0 %v6565_v62  ;;  %4438 = vmatpush3.msra.mxu1 %v6568_v51 }
 0xc22   :  { %3042 = vmatprep.subr.mxu0 %v6571_v53  ;;  %4439 = vmatprep.subr.mxu1 %v6943_v19 }
 0xc23   :  { %3043 = vmatpush1.msra.mxu0 %v6575_v10  ;;  %4440 = vmatpush3.msra.mxu1 %v6578_v54 }
 0xc24   :  { %3044 = vmatprep.subr.mxu0 %v6581_v21  ;;  %4441 = vmatprep.subr.mxu1 %v6943_v19 }
 0xc25   :  { %3045 = vmatpush1.msra.mxu0 %v6585_v55  ;;  %4442 = vmatpush3.msra.mxu1 %v6588_v8 }
 0xc26   :  { %3046 = vmatprep.subr.mxu0 %v6591_v9  ;;  %4443 = vmatprep.subr.mxu1 %v6943_v19 }
 0xc27   :  { %3047 = vmatpush1.msra.mxu0 %v6595_v58  ;;  %4444 = vmatpush3.msra.mxu1 %v6598_v13 }
 0xc28   :  { %3048 = vmatprep.subr.mxu0 %v6601_v59  ;;  %4445 = vmatprep.subr.mxu1 %v6943_v19 }
 0xc29   :  { %3049 = vmatpush1.msra.mxu0 %v6605_v14  ;;  %4446 = vmatpush3.msra.mxu1 %v6608_v60 }
 0xc2a   :  { %3050 = vmatprep.subr.mxu0 %v6611_v7  ;;  %4447 = vmatprep.subr.mxu1 %v6943_v19 }
 0xc2b   :  { %3051 = vmatpush1.msra.mxu0 %v6615_v17  ;;  %4448 = vmatpush3.msra.mxu1 %v6618_v18 }
 0xc2c   :  { %3052 = vmatprep.subr.mxu0 %v6621_v20  ;;  %4449 = vmatprep.subr.mxu1 %v6943_v19 }
 0xc2d   :  { %3053 = vmatpush1.msra.mxu0 %v6625_v22  ;;  %4450 = vmatpush3.msra.mxu1 %v6628_v23 }
 0xc2e   :  { %3054 = vmatprep.subr.mxu0 %v6631_v24  ;;  %4451 = vmatprep.subr.mxu1 %v6943_v19 }
 0xc2f   :  { %3055 = vmatpush1.msra.mxu0 %v6635_v26  ;;  %4452 = vmatpush3.msra.mxu1 %v6638_v11 }
 0xc30   :  { %3056 = vmatprep.subr.mxu0 %v6641_v28  ;;  %4453 = vmatprep.subr.mxu1 %v6943_v19 }
 0xc31   :  { %3057 = vmatpush1.msra.mxu0 %v6645_v29  ;;  %3090 = vmatprep.mubr.f32.mxu0 %v6943_v19 }
 0xc32   :  { %4454 = vmatpush3.msra.mxu1 %v6649_v30  ;;  %4455 = vmatprep.mubr.msk.f32.mxu1 %vm4936_vm1, %v6943_v19 }
 0xc33   :  { %3196 = vmatprep.subr.mxu0 %v6477_v1  ;;  %4458 = vmatprep.subr.mxu1 %v6943_v19 }
 0xcd2   :  { %v2922_v34 = vpop.f32.mrf.mxu0  ;;  %v2993_v35 = vpop.f32.mrf.mxu1 }
 0xcd3   :  { %v2997_v36 = vadd.f32 %v2922_v34, %v1968_v41  ;;  %v3011_v33 = vadd.f32 %v6236_v63, %v2993_v35  ;;  %v7077_v41 = vld [vmem:[#allocation48_spill] sm:$0xff]  ;;  %v7082_v35 = vld [vmem:[#allocation21_spill] sm:$0xff] }
 0xcd4   :  { %v4422_v37 = vpop.f32.mrf.mxu1  ;;  %v2924_v6 = vpop.f32.mrf.mxu0  ;;  %v2077_v34 = vadd.f32 %v7077_v41, %v6241_v50  ;;  %v7085_v41 = vld [vmem:[#allocation23_spill] sm:$0xff] }
 0xcd5   :  { %v3594_v39 = vmul.f32 -1.442695, %v2997_v36  ;;  %v3004_v30 = vadd.f32 %v2924_v6, %v1970_v45  ;;  %v7083_v45 = vld [vmem:[#allocation24_spill] sm:$0xff] }
 0xcd7   :  { %4660 = vpow2.f32 %v3594_v39  ;;  %v3595_v29 = vmul.f32 -1.442695, %v3004_v30 }
 0xcd9   :  { %4662 = vpow2.f32 %v3595_v29 }
 0xce4   :  { %v4661_v28 = vpop.eup %4660 }
 0xce5   :  { %v3001_v1 = vadd.f32 1.0, %v4661_v28 }
 0xce6   :  { %v4663_v11 = vpop.eup %4662 }
 0xce7   :  { %4664 = vrcp.f32 %v3001_v1  ;;  %v3008_v26 = vadd.f32 1.0, %v4663_v11  ;;  %v7078_v1 = vld [vmem:[#allocation27_spill] sm:$0xff] }
 0xce9   :  { %4666 = vrcp.f32 %v3008_v26  ;;  %v7081_v26 = vld [vmem:[#allocation34_spill] sm:$0xff] }
 0xcf4   :  { %v4665_v56 = vpop.eup %4664 }
 0xcf5   :  { %v3012_v36 = vmul.f32 %v4665_v56, %v3011_v33  ;;  %v7079_v56 = vld [vmem:[#allocation33_spill] sm:$0xff] }
 0xcf6   :  { %v4667_v4 = vpop.eup %4666  ;;  %v7084_v33 = vld [vmem:[#allocation45_spill] sm:$0xff] }
 0xcf7   :  { %v3013_v37 = vadd.f32 %v3012_v36, %v2077_v34  ;;  %v3015_v39 = vsub.f32 1.0, %v4667_v4  ;;  %v3017_v29 = vmul.f32 %v4667_v4, %v6489_v5  ;;  %v7080_v5 = vld [vmem:[#allocation54_spill] sm:$0xff]  ;;  %v7086_v34 = vld [vmem:[#allocation37_spill] sm:$0xff] }
 0xcf8   :  { %v1974_v36 = vadd.f32 %v7086_v34, %v7085_v41 }
 0xcf9   :  { %4668 = vtanh.f32 %v3013_v37 }
 0xd06   :  { %v4669_v6 = vpop.eup %4668 }
 0xd07   :  { %v3016_v30 = vmul.f32 %v4669_v6, %v3015_v39 }
 0xd09   :  { %v6664_v28 = vadd.f32 %v3017_v29, %v3016_v30 }
 0xd0b   :  { %v3020_v11 = vadd.f32 %v6664_v28, %v7078_v1  ;;  %3091 = vmatmul.mubr.f32.vlgmr.msra.gmra.mxu0 %v6664_v28  ;;  %4456 = vmatmul.mubr.f32.vlgmr.msra.gmra.mxu1 %v6664_v28  ;;  %v7087_v1 = vld [vmem:[#allocation43_spill] sm:$0xff] }
 0xd0c   :  { %3197 = vmatpush1.msra.mxu0 %v6495_v46  ;;  %4459 = vmatpush3.msra.mxu1 %v6498_v38 }
 0xd0d   :  { %3022 = vst [vmem:[#allocation13 + $0x20] sm:$0xff] %v3020_v11  ;;  %3198 = vmatprep.subr.mxu0 %v6501_v49  ;;  %4460 = vmatprep.subr.mxu1 %v6943_v19  ;;  %v1976_v11 = vadd.f32 %v7087_v1, %v7044_v43 }
 0xd0e   :  { %3199 = vmatpush1.msra.mxu0 %v6505_v61  ;;  %4461 = vmatpush3.msra.mxu1 %v6508_v15 }
 0xd0f   :  { %3200 = vmatprep.subr.mxu0 %v6511_v48  ;;  %4462 = vmatprep.subr.mxu1 %v6943_v19 }
 0xd10   :  { %3201 = vmatpush1.msra.mxu0 %v6515_v42  ;;  %4463 = vmatpush3.msra.mxu1 %v6518_v57 }
 0xd11   :  { %3202 = vmatprep.subr.mxu0 %v6521_v3  ;;  %4464 = vmatprep.subr.mxu1 %v6943_v19 }
 0xd12   :  { %3203 = vmatpush1.msra.mxu0 %v6525_v12  ;;  %4465 = vmatpush3.msra.mxu1 %v6528_v40 }
 0xd13   :  { %3204 = vmatprep.subr.mxu0 %v6531_v16  ;;  %4466 = vmatprep.subr.mxu1 %v6943_v19 }
 0xd14   :  { %3205 = vmatpush1.msra.mxu0 %v6535_v25  ;;  %4467 = vmatpush3.msra.mxu1 %v6538_v27 }
 0xd15   :  { %3206 = vmatprep.subr.mxu0 %v6541_v32  ;;  %4468 = vmatprep.subr.mxu1 %v6943_v19 }
 0xd16   :  { %3207 = vmatpush1.msra.mxu0 %v6545_v47  ;;  %4469 = vmatpush3.msra.mxu1 %v6548_v0 }
 0xd17   :  { %3208 = vmatprep.subr.mxu0 %v6551_v44  ;;  %4470 = vmatprep.subr.mxu1 %v6943_v19 }
 0xd18   :  { %3209 = vmatpush1.msra.mxu0 %v6555_v52  ;;  %4471 = vmatpush3.msra.mxu1 %v6558_v2 }
 0xd19   :  { %3210 = vmatprep.subr.mxu0 %v6561_v31  ;;  %4472 = vmatprep.subr.mxu1 %v6943_v19 }
 0xd1a   :  { %3211 = vmatpush1.msra.mxu0 %v6565_v62  ;;  %4473 = vmatpush3.msra.mxu1 %v6568_v51 }
 0xd1b   :  { %3212 = vmatprep.subr.mxu0 %v6571_v53  ;;  %4474 = vmatprep.subr.mxu1 %v6943_v19 }
 0xd1c   :  { %3213 = vmatpush1.msra.mxu0 %v6575_v10  ;;  %4475 = vmatpush3.msra.mxu1 %v6578_v54 }
 0xd1d   :  { %3214 = vmatprep.subr.mxu0 %v6581_v21  ;;  %4476 = vmatprep.subr.mxu1 %v6943_v19 }
 0xd1e   :  { %3215 = vmatpush1.msra.mxu0 %v6585_v55  ;;  %4477 = vmatpush3.msra.mxu1 %v6588_v8 }
 0xd1f   :  { %3216 = vmatprep.subr.mxu0 %v6591_v9  ;;  %4478 = vmatprep.subr.mxu1 %v6943_v19 }
 0xd20   :  { %3217 = vmatpush1.msra.mxu0 %v6595_v58  ;;  %4479 = vmatpush3.msra.mxu1 %v6598_v13 }
 0xd21   :  { %3218 = vmatprep.subr.mxu0 %v6601_v59  ;;  %4480 = vmatprep.subr.mxu1 %v6943_v19 }
 0xd22   :  { %3219 = vmatpush1.msra.mxu0 %v6605_v14  ;;  %4481 = vmatpush3.msra.mxu1 %v6608_v60 }
 0xd23   :  { %3220 = vmatprep.subr.mxu0 %v6611_v7  ;;  %4482 = vmatprep.subr.mxu1 %v6943_v19 }
 0xd24   :  { %3221 = vmatpush1.msra.mxu0 %v6615_v17  ;;  %4483 = vmatpush3.msra.mxu1 %v6618_v18 }
 0xd25   :  { %3222 = vmatprep.subr.mxu0 %v6621_v20  ;;  %4484 = vmatprep.subr.mxu1 %v6943_v19 }
 0xd26   :  { %3223 = vmatpush1.msra.mxu0 %v6625_v22  ;;  %4485 = vmatpush3.msra.mxu1 %v6628_v23 }
 0xd27   :  { %3224 = vmatprep.subr.mxu0 %v6631_v24  ;;  %4486 = vmatprep.subr.mxu1 %v6943_v19 }
 0xd28   :  { %3225 = vmatpush1.msra.mxu0 %v7079_v56  ;;  %4487 = vmatpush3.msra.mxu1 %v7080_v5 }
 0xd29   :  { %3226 = vmatprep.subr.mxu0 %v7081_v26  ;;  %4488 = vmatprep.subr.mxu1 %v6943_v19 }
 0xd2a   :  { %3227 = vmatpush1.msra.mxu0 %v7082_v35  ;;  %3260 = vmatprep.mubr.f32.mxu0 %v6943_v19 }
 0xd2b   :  { %4489 = vmatpush3.msra.mxu1 %v7083_v45  ;;  %4490 = vmatprep.mubr.msk.f32.mxu1 %vm4936_vm1, %v6943_v19 }
 0xd2c   :  { %3366 = vmatprep.subr.mxu0 %v7084_v33  ;;  %4493 = vmatprep.subr.mxu1 %v6943_v19 }
 0xdcb   :  { %v3092_v37 = vpop.f32.mrf.mxu0  ;;  %v3163_v4 = vpop.f32.mrf.mxu1 }
 0xdcc   :  { %v3167_v39 = vadd.f32 %v3092_v37, %v1974_v36  ;;  %v3181_v34 = vadd.f32 %v6236_v63, %v3163_v4  ;;  %v7088_v36 = vld [vmem:[#allocation46_spill] sm:$0xff]  ;;  %v7090_v63 = vld [vmem:[#allocation33_spill] sm:$0xff] }
 0xdcd   :  { %v4457_v6 = vpop.f32.mrf.mxu1  ;;  %v3094_v29 = vpop.f32.mrf.mxu0  ;;  %v2082_v37 = vadd.f32 %v7088_v36, %v6241_v50 }
 0xdce   :  { %v3596_v30 = vmul.f32 -1.442695, %v3167_v39  ;;  %v3174_v45 = vadd.f32 %v3094_v29, %v1976_v11  ;;  %v7089_v11 = vld [vmem:[#allocation19_spill] sm:$0xff] }
 0xdd0   :  { %4670 = vpow2.f32 %v3596_v30  ;;  %v3597_v35 = vmul.f32 -1.442695, %v3174_v45 }
 0xdd2   :  { %4672 = vpow2.f32 %v3597_v35 }
 0xddd   :  { %v4671_v26 = vpop.eup %4670 }
 0xdde   :  { %v3171_v33 = vadd.f32 1.0, %v4671_v26 }
 0xddf   :  { %v4673_v5 = vpop.eup %4672 }
 0xde0   :  { %4674 = vrcp.f32 %v3171_v33  ;;  %v3178_v56 = vadd.f32 1.0, %v4673_v5 }
 0xde2   :  { %4676 = vrcp.f32 %v3178_v56  ;;  %v7101_v56 = vld [vmem:[#allocation52_spill] sm:$0xff] }
 0xded   :  { %v4675_v41 = vpop.eup %4674 }
 0xdee   :  { %v3182_v39 = vmul.f32 %v4675_v41, %v3181_v34  ;;  %v1988_v41 = vadd.f32 %v7101_v56, %v7044_v43 }
 0xdef   :  { %v4677_v1 = vpop.eup %4676 }
 0xdf0   :  { %v3183_v6 = vadd.f32 %v3182_v39, %v2082_v37  ;;  %v3185_v30 = vsub.f32 1.0, %v4677_v1  ;;  %v3187_v35 = vmul.f32 %v4677_v1, %v6664_v28 }
 0xdf2   :  { %4678 = vtanh.f32 %v3183_v6 }
 0xdff   :  { %v4679_v29 = vpop.eup %4678 }
 0xe00   :  { %v3186_v45 = vmul.f32 %v4679_v29, %v3185_v30  ;;  %v7102_v30 = vld [vmem:[#allocation51_spill] sm:$0xff] }
 0xe01   :  { %v2092_v29 = vadd.f32 %v7102_v30, %v6241_v50 }
 0xe02   :  { %v6745_v26 = vadd.f32 %v3187_v35, %v3186_v45 }
 0xe04   :  { %v3190_v5 = vadd.f32 %v6745_v26, %v7089_v11  ;;  %3261 = vmatmul.mubr.f32.vlgmr.msra.gmra.mxu0 %v6745_v26  ;;  %4491 = vmatmul.mubr.f32.vlgmr.msra.gmra.mxu1 %v6745_v26 }
 0xe05   :  { %3367 = vmatpush1.msra.mxu0 %v6495_v46  ;;  %4494 = vmatpush3.msra.mxu1 %v6498_v38  ;;  %v7091_v46 = vld [vmem:[#allocation54_spill] sm:$0xff] }
 0xe06   :  { %3192 = vst [vmem:[#allocation13 + $0x28] sm:$0xff] %v3190_v5  ;;  %3368 = vmatprep.subr.mxu0 %v6501_v49  ;;  %4495 = vmatprep.subr.mxu1 %v6943_v19  ;;  %v7092_v38 = vld [vmem:[#allocation34_spill] sm:$0xff]  ;;  %v7093_v49 = vld [vmem:[#allocation21_spill] sm:$0xff] }
 0xe07   :  { %3369 = vmatpush1.msra.mxu0 %v6505_v61  ;;  %4496 = vmatpush3.msra.mxu1 %v6508_v15  ;;  %v7094_v61 = vld [vmem:[#allocation24_spill] sm:$0xff]  ;;  %v7095_v15 = vld [vmem:[#allocation23_spill] sm:$0xff] }
 0xe08   :  { %3370 = vmatprep.subr.mxu0 %v6511_v48  ;;  %4497 = vmatprep.subr.mxu1 %v6943_v19  ;;  %v7096_v48 = vld [vmem:[#allocation47_spill] sm:$0xff] }
 0xe09   :  { %3371 = vmatpush1.msra.mxu0 %v6515_v42  ;;  %4498 = vmatpush3.msra.mxu1 %v6518_v57  ;;  %v1980_v42 = vadd.f32 %v7096_v48, %v7095_v15 }
 0xe0a   :  { %3372 = vmatprep.subr.mxu0 %v6521_v3  ;;  %4499 = vmatprep.subr.mxu1 %v6943_v19 }
 0xe0b   :  { %3373 = vmatpush1.msra.mxu0 %v6525_v12  ;;  %4500 = vmatpush3.msra.mxu1 %v6528_v40 }
 0xe0c   :  { %3374 = vmatprep.subr.mxu0 %v6531_v16  ;;  %4501 = vmatprep.subr.mxu1 %v6943_v19 }
 0xe0d   :  { %3375 = vmatpush1.msra.mxu0 %v6535_v25  ;;  %4502 = vmatpush3.msra.mxu1 %v6538_v27  ;;  %v7097_v27 = vld [vmem:[#allocation49_spill] sm:$0xff] }
 0xe0e   :  { %3376 = vmatprep.subr.mxu0 %v6541_v32  ;;  %4503 = vmatprep.subr.mxu1 %v6943_v19  ;;  %v1982_v32 = vadd.f32 %v7097_v27, %v7044_v43 }
 0xe0f   :  { %3377 = vmatpush1.msra.mxu0 %v6545_v47  ;;  %4504 = vmatpush3.msra.mxu1 %v6548_v0 }
 0xe10   :  { %3378 = vmatprep.subr.mxu0 %v6551_v44  ;;  %4505 = vmatprep.subr.mxu1 %v6943_v19 }
 0xe11   :  { %3379 = vmatpush1.msra.mxu0 %v6555_v52  ;;  %4506 = vmatpush3.msra.mxu1 %v6558_v2 }
 0xe12   :  { %3380 = vmatprep.subr.mxu0 %v6561_v31  ;;  %4507 = vmatprep.subr.mxu1 %v6943_v19  ;;  %v4797_v31 = vld [vmem:[%s6848_s8] ss:$0 sm:$0xff]  ;;  %s4937_s8 = smov [#allocation13]  }
 0xe13   :  { %3381 = vmatpush1.msra.mxu0 %v6565_v62  ;;  %4508 = vmatpush3.msra.mxu1 %v6568_v51  ;;  %s3538_s21 = sshll.u32 %s4937_s8, 4  ;;  %s3539_s21 = int_to_ptr.vmem [resolvable:$true] %s3538_s21 }
 0xe14   :  { %3382 = vmatprep.subr.mxu0 %v6571_v53  ;;  %4509 = vmatprep.subr.mxu1 %v6943_v19  ;;  %v7098_v53 = vld [vmem:[#allocation53_spill] sm:$0xff]  ;;  %s4898_s22 = scalar_lea.vmem %s3539_s21, 1024  ;;  %p4903_p12 = scmp.lt.s32.totalorder %s3539_s21, %s3539_s21 }
 0xe15   :  { %3383 = vmatpush1.msra.mxu0 %v6575_v10  ;;  %4510 = vmatpush3.msra.mxu1 %v6578_v54  ;;  %v2087_v10 = vadd.f32 %v7098_v53, %v6241_v50  ;;  %p4899_p11 = scmp.ne.s32.totalorder %s3539_s21, %s4898_s22  ;;  %p4904_p13 = scmp.lt.s32.totalorder %s4898_s22, %s4898_s22 }
 0xe16   :  { %3384 = vmatprep.subr.mxu0 %v6581_v21  ;;  %4511 = vmatprep.subr.mxu1 %v6943_v19 }
 0xe17   :  { %3385 = vmatpush1.msra.mxu0 %v6585_v55  ;;  %4512 = vmatpush3.msra.mxu1 %v6588_v8  ;;  %p4905_p0 = por %p4904_p13, %p4903_p12 }
 0xe18   :  { %3386 = vmatprep.subr.mxu0 %v6591_v9  ;;  %4513 = vmatprep.subr.mxu1 %v6943_v19 }
 0xe19   :  { %3387 = vmatpush1.msra.mxu0 %v6595_v58  ;;  %4514 = vmatpush3.msra.mxu1 %v6598_v13  ;;  %p4906_p1 = pnand %p4905_p0, %p4899_p11 }
 0xe1a   :  { %3388 = vmatprep.subr.mxu0 %v6601_v59  ;;  %4515 = vmatprep.subr.mxu1 %v6943_v19 }
 0xe1b   :  { %3389 = vmatpush1.msra.mxu0 %v6605_v14  ;;  %4516 = vmatpush3.msra.mxu1 %v6608_v60  ;;  %v7099_v14 = vld [vmem:[#allocation20_spill] sm:$0xff] }
 0xe1c   :  { %3390 = vmatprep.subr.mxu0 %v6611_v7  ;;  %4517 = vmatprep.subr.mxu1 %v6943_v19  ;;  %v7100_v7 = vld [vmem:[#allocation50_spill] sm:$0xff] }
 0xe1d   :  { %3391 = vmatpush1.msra.mxu0 %v6615_v17  ;;  %4518 = vmatpush3.msra.mxu1 %v6618_v18  ;;  %v1986_v17 = vadd.f32 %v7100_v7, %v7095_v15 }
 0xe1e   :  { %3392 = vmatprep.subr.mxu0 %v6621_v20  ;;  %4519 = vmatprep.subr.mxu1 %v6943_v19 }
 0xe1f   :  { %3393 = vmatpush1.msra.mxu0 %v6625_v22  ;;  %4520 = vmatpush3.msra.mxu1 %v6628_v23 }
 0xe20   :  { %3394 = vmatprep.subr.mxu0 %v6631_v24  ;;  %4521 = vmatprep.subr.mxu1 %v6943_v19 }
 0xe21   :  { %3395 = vmatpush1.msra.mxu0 %v7090_v63  ;;  %4522 = vmatpush3.msra.mxu1 %v7091_v46 }
 0xe22   :  { %3396 = vmatprep.subr.mxu0 %v7092_v38  ;;  %4523 = vmatprep.subr.mxu1 %v6943_v19  ;;  %v7103_v38 = vld [vmem:[#allocation42_spill] sm:$0xff] }
 0xe23   :  { %3397 = vmatpush1.msra.mxu0 %v7093_v49  ;;  %3430 = vmatprep.mubr.f32.mxu0 %v6943_v19 }
 0xe24   :  { %4524 = vmatpush3.msra.mxu1 %v7094_v61  ;;  %4525 = vmatprep.mubr.msk.f32.mxu1 %vm4936_vm1, %v6943_v19 }
 0xec4   :  { %v3262_v57 = vpop.f32.mrf.mxu0  ;;  %v3333_v3 = vpop.f32.mrf.mxu1 }
 0xec5   :  { %v3337_v12 = vadd.f32 %v3262_v57, %v1980_v42  ;;  %v3351_v62 = vadd.f32 %v4797_v31, %v3333_v3 }
 0xec6   :  { %v4492_v40 = vpop.f32.mrf.mxu1  ;;  %v3264_v25 = vpop.f32.mrf.mxu0 }
 0xec7   :  { %v3598_v16 = vmul.f32 -1.442695, %v3337_v12  ;;  %v3344_v47 = vadd.f32 %v3264_v25, %v1982_v32 }
 0xec9   :  { %4680 = vpow2.f32 %v3598_v16  ;;  %v3599_v0 = vmul.f32 -1.442695, %v3344_v47 }
 0xecb   :  { %4682 = vpow2.f32 %v3599_v0 }
 0xed6   :  { %v4681_v44 = vpop.eup %4680 }
 0xed7   :  { %v3341_v52 = vadd.f32 1.0, %v4681_v44 }
 0xed8   :  { %v4683_v19 = vpop.eup %4682 }
 0xed9   :  { %4684 = vrcp.f32 %v3341_v52  ;;  %v3348_v2 = vadd.f32 1.0, %v4683_v19 }
 0xedb   :  { %4686 = vrcp.f32 %v3348_v2 }
 0xee6   :  { %v4685_v51 = vpop.eup %4684 }
 0xee7   :  { %v3352_v54 = vmul.f32 %v4685_v51, %v3351_v62 }
 0xee8   :  { %v4687_v55 = vpop.eup %4686 }
 0xee9   :  { %v3353_v21 = vadd.f32 %v3352_v54, %v2087_v10  ;;  %v3355_v8 = vsub.f32 1.0, %v4687_v55  ;;  %v3357_v13 = vmul.f32 %v4687_v55, %v6745_v26 }
 0xeeb   :  { %4688 = vtanh.f32 %v3353_v21 }
 0xef8   :  { %v4689_v9 = vpop.eup %4688 }
 0xef9   :  { %v3356_v58 = vmul.f32 %v4689_v9, %v3355_v8 }
 0xefb   :  { %v3358_v59 = vadd.f32 %v3357_v13, %v3356_v58 }
 0xefd   :  { %v3360_v60 = vadd.f32 %v3358_v59, %v7099_v14  ;;  %3431 = vmatmul.mubr.f32.vlgmr.msra.gmra.mxu0 %v3358_v59  ;;  %4526 = vmatmul.mubr.f32.vlgmr.msra.gmra.mxu1 %v3358_v59 }
 0xeff   :  { %3362 = vst [vmem:[#allocation13 + $0x30] sm:$0xff] %v3360_v60 }
 0xfbd   :  { %v3432_v18 = vpop.f32.mrf.mxu0  ;;  %v3503_v20 = vpop.f32.mrf.mxu1 }
 0xfbe   :  { %v3507_v22 = vadd.f32 %v3432_v18, %v1986_v17  ;;  %v3521_v6 = vadd.f32 %v4797_v31, %v3503_v20 }
 0xfbf   :  { %v4527_v23 = vpop.f32.mrf.mxu1  ;;  %v3434_v28 = vpop.f32.mrf.mxu0 }
 0xfc0   :  { %v3600_v24 = vmul.f32 -1.442695, %v3507_v22  ;;  %v3514_v4 = vadd.f32 %v3434_v28, %v1988_v41 }
 0xfc2   :  { %4690 = vpow2.f32 %v3600_v24  ;;  %v3601_v33 = vmul.f32 -1.442695, %v3514_v4 }
 0xfc4   :  { %4692 = vpow2.f32 %v3601_v33 }
 0xfcf   :  { %v4691_v34 = vpop.eup %4690 }
 0xfd0   :  { %v3511_v36 = vadd.f32 1.0, %v4691_v34 }
 0xfd1   :  { %v4693_v37 = vpop.eup %4692 }
 0xfd2   :  { %4694 = vrcp.f32 %v3511_v36  ;;  %v3518_v39 = vadd.f32 1.0, %v4693_v37 }
 0xfd4   :  { %4696 = vrcp.f32 %v3518_v39 }
 0xfdf   :  { %v4695_v1 = vpop.eup %4694 }
 0xfe0   :  { %v3522_v45 = vmul.f32 %v4695_v1, %v3521_v6 }
 0xfe1   :  { %v4697_v26 = vpop.eup %4696 }
 0xfe2   :  { %v3523_v35 = vadd.f32 %v3522_v45, %v2092_v29  ;;  %v3525_v43 = vsub.f32 1.0, %v4697_v26  ;;  %v3527_v63 = vmul.f32 %v4697_v26, %v3358_v59 }
 0xfe4   :  { %4698 = vtanh.f32 %v3523_v35 }
 0xff1   :  { %v4699_v11 = vpop.eup %4698 }
 0xff2   :  { %v3526_v5 = vmul.f32 %v4699_v11, %v3525_v43 }
 0xff4   :  { %v3528_v46 = vadd.f32 %v3527_v63, %v3526_v5 }
 0xff6   :  { %v3530_v49 = vadd.f32 %v3528_v46, %v7103_v38 }
 0xff8   :  { %3532 = vst [vmem:[#allocation13 + $0x38] sm:$0xff] %v3530_v49 }
 0xff9   :  { %4909 = shalt.err (!%p4906_p1)
}
 0xffa   :  { %3544 = dma.vmem_to_hbm [thread:$0]  %s3539_s21, 1024, %s6849_s9, [#allocation6], %s4931_s23, %s4931_s23, %s4932_s24  }
 0xffb   :  { %4924 = dma.done.wait [#allocation6], 1024  }
 0xffc   :  { %4925 = vsyncadd [#allocation6], 4294966272 }
 0xffd   :  { %3548 = vsyncpa [#allocation5], 1 }
 0xffe   :  { %3549 = vsyncpa [#allocation8], 1 }
 0xfff   :  { %3550 = vsyncpa [#allocation11], 1 }
0x1000   :  { %3551 = vsyncpa [#allocation6], 1 }

</bundles_post_ra>
